<compile_context>
chip_gen: v7x
topology: tpu7x:2x2x1
jax: 0.10.0
libtpu: 0.0.40
codegen_flags: <defaults>
</compile_context>

<pallas_src>
import functools

import jax
import jax.numpy as jnp
from jax import lax
from jax.experimental import pallas as pl
from jax.experimental.pallas import tpu as pltpu


def _round_up(x, m):
    return ((x + m - 1) // m) * m


def _pick_l_tile(lo_e, band_rows, acc_rows, x_rows, vreg_budget=40):
    """Largest multiple-of-128 divisor of lo_e whose working set fits ~vreg_budget vregs."""
    best = 128
    for t in range(128, min(lo_e, 1024) + 1, 128):
        if lo_e % t:
            continue
        cols = t // 128
        need = band_rows * cols + acc_rows * cols + x_rows * (cols + 1)
        if need <= vreg_budget:
            best = t
    return best


def _inception_conv_kernel(x_ref, w_ref, b_ref, o_ref, *, K, Wp, L_tile,
                           n_tiles, Nb):
    # x_ref: (Nb, Cin_p, Lin_e)        per-element flattened (h, w) padded input
    # w_ref: (K, Cout_p, K*Cin_p)      combined weights, band order (kx, cin)
    # b_ref: (Cout_p, 1)               combined bias (f32)
    # o_ref: (Nb, Cout_p, Lo_e)        lane-dense, tile-aligned output
    Cout_p = o_ref.shape[1]
    Lrow = L_tile + K - 1
    # Hoisted once per grid step (JAX does not CSE broadcast_in_dim in loops).
    bias = jnp.broadcast_to(b_ref[...], (Cout_p, L_tile))

    def one_tile(b, base):
        # Static tap loops: band and f32 accumulator stay vreg-resident values;
        # kx shifts are slices of the already-loaded row (no extra VMEM loads).
        # TODO(synk): the shifts could also be expressed with pltpu.roll on the
        # row value if Mosaic ever lowers these slices back through VMEM.
        acc = bias
        for ky in range(K):
            row = x_ref[b, :, pl.ds(base + ky * Wp, Lrow)]          # (Cin_p, Lrow)
            band = jnp.concatenate(
                [row[:, kx:kx + L_tile] for kx in range(K)], axis=0)  # (K*Cin_p, L_tile)
            acc = acc + jnp.dot(w_ref[ky], band,
                                preferred_element_type=jnp.float32)
        o_ref[b, :, pl.ds(base, L_tile)] = acc.astype(o_ref.dtype)

    def one_element(b):
        if n_tiles <= 8:
            for t in range(n_tiles):                 # short fixed loop: static
                one_tile(b, t * L_tile)
        else:
            def tile_body(t, carry):
                one_tile(b, pl.multiple_of(t * L_tile, 128))
                return carry
            lax.fori_loop(0, n_tiles, tile_body, 0)

    if Nb <= 4:
        for b in range(Nb):                          # short fixed loop: static
            one_element(b)
    else:
        def batch_body(b, carry):
            one_element(b)
            return carry
        lax.fori_loop(0, Nb, batch_body, 0)


def inception_block_v1(x_nchw, weights, biases, *, batch_block=None,
                       compute_dtype=jnp.bfloat16):
    """x_nchw: (N, Cin, H, W); weights[i]: (Cout, Cin, k_i, k_i); biases[i]: (Cout,)."""
    num_kernels = len(weights)
    K = 2 * (num_kernels - 1) + 1
    pad = num_kernels - 1
    Cout, Cin = weights[0].shape[0], weights[0].shape[1]
    N, _, H, W = x_nchw.shape
    Hp, Wp = H + 2 * pad, W + 2 * pad

    cdt = jnp.dtype(compute_dtype)
    odt = x_nchw.dtype
    # dtype-aware sublane packing: 8 (4-byte) / 16 (2-byte) / 32 (1-byte).
    pack = max(8, 32 // cdt.itemsize)
    Cin_p = _round_up(Cin, pack)
    Cout_p = _round_up(Cout, pack)

    # ---- combine the branches into one KxK conv (plain-JAX glue, in f32) ----
    w_comb = jnp.zeros((K, K, Cin_p, Cout_p), jnp.float32)
    for i, w in enumerate(weights):
        k = w.shape[-1]
        d = pad - (k - 1) // 2
        w_hwio = jnp.transpose(w, (2, 3, 1, 0)).astype(jnp.float32)  # (k,k,Cin,Cout)
        w_comb = w_comb.at[d:d + k, d:d + k, :Cin, :Cout].add(w_hwio)
    w_comb = w_comb / num_kernels
    # (ky, kx, cin, cout) -> (ky, cout, kx*Cin_p + cin): matches the band rows.
    w_r = jnp.transpose(w_comb, (0, 3, 1, 2)).reshape(K, Cout_p, K * Cin_p)
    w_r = w_r.astype(compute_dtype)
    b_comb = jnp.zeros((Cout_p, 1), jnp.float32)
    b_comb = b_comb.at[:Cout, 0].set(sum(biases).astype(jnp.float32) / num_kernels)

    # ---- per-element lane layout: l = h*Wp + w (output only needs h < H) ----
    Lo_e = _round_up(H * Wp, 128)                    # output lanes per element
    band_rows = -(-(K * Cin_p) // pack)              # vreg rows of the tap band
    acc_rows = -(-Cout_p // 8)                       # f32 accumulator vreg rows
    x_rows = -(-Cin_p // pack)                       # loaded input-row vreg rows
    L_tile = _pick_l_tile(Lo_e, band_rows, acc_rows, x_rows)
    n_tiles = Lo_e // L_tile
    # Input must cover the last tile's deepest tap read, and the real data.
    Lin_e = _round_up(max(Lo_e + (K - 1) * (Wp + 1), Hp * Wp), 128)

    # ---- batch chunking: Nb elements per grid step, fully VMEM-accounted ----
    try:
        vmem_cap = pltpu.get_tpu_info().vmem_capacity_bytes
    except Exception:  # pragma: no cover - be conservative if query unavailable
        vmem_cap = 64 * 1024 * 1024
    vmem_budget = min(vmem_cap * 5 // 8, 96 * 1024 * 1024)  # ~40 MiB v7x, ~80 MiB v5e/v6e

    x_elem = Cin_p * Lin_e * cdt.itemsize
    o_elem = Cout_p * Lo_e * jnp.dtype(odt).itemsize
    w_bytes = K * Cout_p * (K * Cin_p) * cdt.itemsize
    fixed = 2 * w_bytes + 2 * Cout_p * 4 + (2 << 20)   # weights+bias (dbl-buffered) + scratch margin
    per_elem = 2 * (x_elem + o_elem)                   # x/out blocks, double-buffered
    if batch_block is None:
        Nb = int(max(1, min(N, (vmem_budget - fixed) // per_elem)))
        if N >= 2:
            # >= 2 "parallel" grid steps so both TensorCores get work (v7x).
            Nb = min(Nb, -(-N // 2))
    else:
        Nb = int(max(1, min(batch_block, N)))
    G = -(-N // Nb)
    Np = G * Nb
    vmem_limit = int(min(max(vmem_budget, fixed + Nb * per_elem + (4 << 20)),
                         vmem_cap * 7 // 8))

    # Pad batch + channels + spatial halo, flatten (h, w) per element.
    xp = jnp.pad(x_nchw.astype(compute_dtype),
                 ((0, Np - N), (0, Cin_p - Cin), (pad, pad), (pad, pad)))
    xf = xp.reshape(Np, Cin_p, Hp * Wp)
    xf = jnp.pad(xf, ((0, 0), (0, 0), (0, Lin_e - Hp * Wp)))

    kernel = functools.partial(_inception_conv_kernel, K=K, Wp=Wp,
                               L_tile=L_tile, n_tiles=n_tiles, Nb=Nb)
    out_flat = pl.pallas_call(
        kernel,
        out_shape=jax.ShapeDtypeStruct((Np, Cout_p, Lo_e), odt),
        grid_spec=pltpu.PrefetchScalarGridSpec(
            num_scalar_prefetch=0,
            grid=(G,),
            in_specs=[
                pl.BlockSpec((Nb, Cin_p, Lin_e), lambda g: (g, 0, 0)),
                # TODO(synk): mark this constant weight block single-buffered
                # (pipeline_mode=pl.Buffered(1)) and tile Cout/Cin onto extra
                # grid axes once channel counts reach ~256+.
                pl.BlockSpec((K, Cout_p, K * Cin_p), lambda g: (0, 0, 0)),
                pl.BlockSpec((Cout_p, 1), lambda g: (0, 0)),
            ],
            out_specs=pl.BlockSpec((Nb, Cout_p, Lo_e), lambda g: (g, 0, 0)),
        ),
        compiler_params=pltpu.CompilerParams(
            dimension_semantics=("parallel",),
            vmem_limit_bytes=vmem_limit,
        ),
    )(xf, w_r, b_comb)

    # ---- crop garbage lanes / padded channels / padded batch, back to NCHW ----
    # TODO(synk): for very large H*W per element, add a row-band grid axis
    # (K-1 halo) as a second "parallel" dimension to cut the W-pad garbage and
    # give v7x more parallel steps.
    o = out_flat[:N, :Cout, :H * Wp].reshape(N, Cout, H, Wp)[:, :, :, :W]
    return o


if __name__ == "__main__":
    key = jax.random.PRNGKey(0)
    N, Cin, Cout, H, W = 2, 4, 8, 16, 16
    num_kernels = 6

    kx_key, *wkeys = jax.random.split(key, num_kernels + 1)
    x = jax.random.normal(kx_key, (N, Cin, H, W), jnp.float32)

    # Deterministic kaiming_normal(mode='fan_out', nonlinearity='relu'), zero bias.
    weights, biases = [], []
    for i in range(num_kernels):
        k = 2 * i + 1
        fan_out = Cout * k * k
        std = (2.0 / fan_out) ** 0.5
        w = std * jax.random.normal(wkeys[i], (Cout, Cin, k, k), jnp.float32)
        weights.append(w)
        biases.append(jnp.zeros((Cout,), jnp.float32))

    # Reference: the literal PyTorch semantics (stack of convs, mean over kernels).
    refs = []
    for i in range(num_kernels):
        p = i
        r = lax.conv_general_dilated(
            x, weights[i], window_strides=(1, 1), padding=((p, p), (p, p)),
            dimension_numbers=("NCHW", "OIHW", "NCHW"))
        refs.append(r + biases[i].reshape(1, Cout, 1, 1))
    ref = jnp.mean(jnp.stack(refs, axis=-1), axis=-1)

    # Default path (bf16 MXU operands, f32 accumulation) + f32 path.
    out_bf16 = jax.block_until_ready(inception_block_v1(x, weights, biases))
    out_f32 = jax.block_until_ready(
        inception_block_v1(x, weights, biases, compute_dtype=jnp.float32))

    assert out_bf16.shape == out_f32.shape == ref.shape == (N, Cout, H, W)
    err_f32 = float(jnp.max(jnp.abs(out_f32 - ref)))
    err_bf16 = float(jnp.max(jnp.abs(out_bf16 - ref)))
    assert jnp.allclose(out_f32, ref, atol=1e-3, rtol=1e-3), f"f32 max_err={err_f32}"
    assert jnp.allclose(out_bf16, ref, atol=3e-2, rtol=3e-2), f"bf16 max_err={err_bf16}"
    print("KERNEL_OK")
</pallas_src>

<mosaic_0001>
module attributes {stable_mosaic.version = 11 : i64} {
  func.func @_inception_conv_kernel(%arg0: i32, %arg1: memref<1x16x896xbf16, #tpu.memory_space<vmem>>, %arg2: memref<11x16x176xbf16, #tpu.memory_space<vmem>>, %arg3: memref<16x1xf32, #tpu.memory_space<vmem>>, %arg4: memref<1x16x512xf32, #tpu.memory_space<vmem>>) attributes {dimension_semantics = [#tpu.dimension_semantics<parallel>], iteration_bounds = array<i64: 2>, scalar_prefetch = 0 : i64, scratch_operands = 0 : i64, tpu.core_type = #tpu.core_type<tc>, window_params = [{transform_indices = @transform_0, window_bounds = array<i64: 1, 16, 896>}, {pipeline_mode = #tpu.pipeline_mode<synchronous>, transform_indices = @transform_1, window_bounds = array<i64: 11, 16, 176>}, {pipeline_mode = #tpu.pipeline_mode<synchronous>, transform_indices = @transform_2, window_bounds = array<i64: 16, 1>}, {transform_indices = @transform_3, window_bounds = array<i64: 1, 16, 512>}]} {
    %c0 = arith.constant 0 : index
    %c0_0 = arith.constant 0 : index
    %0 = vector.load %arg3[%c0, %c0_0] : memref<16x1xf32, #tpu.memory_space<vmem>>, vector<16x1xf32>
    %1 = vector.shape_cast %0 : vector<16x1xf32> to vector<16x1xf32>
    %2 = vector.broadcast %1 : vector<16x1xf32> to vector<16x256xf32>
    %c0_1 = arith.constant 0 : index
    %c0_2 = arith.constant 0 : index
    %c0_3 = arith.constant 0 : index
    %3 = vector.load %arg1[%c0_1, %c0_2, %c0_3] : memref<1x16x896xbf16, #tpu.memory_space<vmem>>, vector<1x16x266xbf16>
    %4 = vector.shape_cast %3 : vector<1x16x266xbf16> to vector<16x266xbf16>
    %5 = vector.extract_strided_slice %4 {offsets = [0, 0], sizes = [16, 256], strides = [1, 1]} : vector<16x266xbf16> to vector<16x256xbf16>
    %6 = vector.extract_strided_slice %4 {offsets = [0, 1], sizes = [16, 256], strides = [1, 1]} : vector<16x266xbf16> to vector<16x256xbf16>
    %7 = vector.extract_strided_slice %4 {offsets = [0, 2], sizes = [16, 256], strides = [1, 1]} : vector<16x266xbf16> to vector<16x256xbf16>
    %8 = vector.extract_strided_slice %4 {offsets = [0, 3], sizes = [16, 256], strides = [1, 1]} : vector<16x266xbf16> to vector<16x256xbf16>
    %9 = vector.extract_strided_slice %4 {offsets = [0, 4], sizes = [16, 256], strides = [1, 1]} : vector<16x266xbf16> to vector<16x256xbf16>
    %10 = vector.extract_strided_slice %4 {offsets = [0, 5], sizes = [16, 256], strides = [1, 1]} : vector<16x266xbf16> to vector<16x256xbf16>
    %11 = vector.extract_strided_slice %4 {offsets = [0, 6], sizes = [16, 256], strides = [1, 1]} : vector<16x266xbf16> to vector<16x256xbf16>
    %12 = vector.extract_strided_slice %4 {offsets = [0, 7], sizes = [16, 256], strides = [1, 1]} : vector<16x266xbf16> to vector<16x256xbf16>
    %13 = vector.extract_strided_slice %4 {offsets = [0, 8], sizes = [16, 256], strides = [1, 1]} : vector<16x266xbf16> to vector<16x256xbf16>
    %14 = vector.extract_strided_slice %4 {offsets = [0, 9], sizes = [16, 256], strides = [1, 1]} : vector<16x266xbf16> to vector<16x256xbf16>
    %15 = vector.extract_strided_slice %4 {offsets = [0, 10], sizes = [16, 256], strides = [1, 1]} : vector<16x266xbf16> to vector<16x256xbf16>
    %16 = tpu.concatenate %5, %6, %7, %8, %9, %10, %11, %12, %13, %14, %15 in 0 : vector<16x256xbf16>, vector<16x256xbf16>, vector<16x256xbf16>, vector<16x256xbf16>, vector<16x256xbf16>, vector<16x256xbf16>, vector<16x256xbf16>, vector<16x256xbf16>, vector<16x256xbf16>, vector<16x256xbf16>, vector<16x256xbf16> -> vector<176x256xbf16>
    %c0_4 = arith.constant 0 : index
    %c0_5 = arith.constant 0 : index
    %c0_6 = arith.constant 0 : index
    %17 = vector.load %arg2[%c0_4, %c0_5, %c0_6] : memref<11x16x176xbf16, #tpu.memory_space<vmem>>, vector<1x16x176xbf16>
    %18 = vector.shape_cast %17 : vector<1x16x176xbf16> to vector<16x176xbf16>
    %cst = arith.constant dense<0.000000e+00> : vector<16x256xf32>
    %19 = tpu.matmul %18, %16, %cst {dimension_numbers = #tpu.dot_dimension_numbers<[1], [0], [0], [1], [0, 0, 1, 1], [], []>} : vector<16x176xbf16>, vector<176x256xbf16>, vector<16x256xf32> -> vector<16x256xf32>
    %20 = arith.addf %2, %19 : vector<16x256xf32>
    %c0_7 = arith.constant 0 : index
    %c0_8 = arith.constant 0 : index
    %c26 = arith.constant 26 : index
    %21 = vector.load %arg1[%c0_7, %c0_8, %c26] : memref<1x16x896xbf16, #tpu.memory_space<vmem>>, vector<1x16x266xbf16>
    %22 = vector.shape_cast %21 : vector<1x16x266xbf16> to vector<16x266xbf16>
    %23 = vector.extract_strided_slice %22 {offsets = [0, 0], sizes = [16, 256], strides = [1, 1]} : vector<16x266xbf16> to vector<16x256xbf16>
    %24 = vector.extract_strided_slice %22 {offsets = [0, 1], sizes = [16, 256], strides = [1, 1]} : vector<16x266xbf16> to vector<16x256xbf16>
    %25 = vector.extract_strided_slice %22 {offsets = [0, 2], sizes = [16, 256], strides = [1, 1]} : vector<16x266xbf16> to vector<16x256xbf16>
    %26 = vector.extract_strided_slice %22 {offsets = [0, 3], sizes = [16, 256], strides = [1, 1]} : vector<16x266xbf16> to vector<16x256xbf16>
    %27 = vector.extract_strided_slice %22 {offsets = [0, 4], sizes = [16, 256], strides = [1, 1]} : vector<16x266xbf16> to vector<16x256xbf16>
    %28 = vector.extract_strided_slice %22 {offsets = [0, 5], sizes = [16, 256], strides = [1, 1]} : vector<16x266xbf16> to vector<16x256xbf16>
    %29 = vector.extract_strided_slice %22 {offsets = [0, 6], sizes = [16, 256], strides = [1, 1]} : vector<16x266xbf16> to vector<16x256xbf16>
    %30 = vector.extract_strided_slice %22 {offsets = [0, 7], sizes = [16, 256], strides = [1, 1]} : vector<16x266xbf16> to vector<16x256xbf16>
    %31 = vector.extract_strided_slice %22 {offsets = [0, 8], sizes = [16, 256], strides = [1, 1]} : vector<16x266xbf16> to vector<16x256xbf16>
    %32 = vector.extract_strided_slice %22 {offsets = [0, 9], sizes = [16, 256], strides = [1, 1]} : vector<16x266xbf16> to vector<16x256xbf16>
    %33 = vector.extract_strided_slice %22 {offsets = [0, 10], sizes = [16, 256], strides = [1, 1]} : vector<16x266xbf16> to vector<16x256xbf16>
    %34 = tpu.concatenate %23, %24, %25, %26, %27, %28, %29, %30, %31, %32, %33 in 0 : vector<16x256xbf16>, vector<16x256xbf16>, vector<16x256xbf16>, vector<16x256xbf16>, vector<16x256xbf16>, vector<16x256xbf16>, vector<16x256xbf16>, vector<16x256xbf16>, vector<16x256xbf16>, vector<16x256xbf16>, vector<16x256xbf16> -> vector<176x256xbf16>
    %c1 = arith.constant 1 : index
    %c0_9 = arith.constant 0 : index
    %c0_10 = arith.constant 0 : index
    %35 = vector.load %arg2[%c1, %c0_9, %c0_10] : memref<11x16x176xbf16, #tpu.memory_space<vmem>>, vector<1x16x176xbf16>
    %36 = vector.shape_cast %35 : vector<1x16x176xbf16> to vector<16x176xbf16>
    %cst_11 = arith.constant dense<0.000000e+00> : vector<16x256xf32>
    %37 = tpu.matmul %36, %34, %cst_11 {dimension_numbers = #tpu.dot_dimension_numbers<[1], [0], [0], [1], [0, 0, 1, 1], [], []>} : vector<16x176xbf16>, vector<176x256xbf16>, vector<16x256xf32> -> vector<16x256xf32>
    %38 = arith.addf %20, %37 : vector<16x256xf32>
    %c0_12 = arith.constant 0 : index
    %c0_13 = arith.constant 0 : index
    %c52 = arith.constant 52 : index
    %39 = vector.load %arg1[%c0_12, %c0_13, %c52] : memref<1x16x896xbf16, #tpu.memory_space<vmem>>, vector<1x16x266xbf16>
    %40 = vector.shape_cast %39 : vector<1x16x266xbf16> to vector<16x266xbf16>
    %41 = vector.extract_strided_slice %40 {offsets = [0, 0], sizes = [16, 256], strides = [1, 1]} : vector<16x266xbf16> to vector<16x256xbf16>
    %42 = vector.extract_strided_slice %40 {offsets = [0, 1], sizes = [16, 256], strides = [1, 1]} : vector<16x266xbf16> to vector<16x256xbf16>
    %43 = vector.extract_strided_slice %40 {offsets = [0, 2], sizes = [16, 256], strides = [1, 1]} : vector<16x266xbf16> to vector<16x256xbf16>
    %44 = vector.extract_strided_slice %40 {offsets = [0, 3], sizes = [16, 256], strides = [1, 1]} : vector<16x266xbf16> to vector<16x256xbf16>
    %45 = vector.extract_strided_slice %40 {offsets = [0, 4], sizes = [16, 256], strides = [1, 1]} : vector<16x266xbf16> to vector<16x256xbf16>
    %46 = vector.extract_strided_slice %40 {offsets = [0, 5], sizes = [16, 256], strides = [1, 1]} : vector<16x266xbf16> to vector<16x256xbf16>
    %47 = vector.extract_strided_slice %40 {offsets = [0, 6], sizes = [16, 256], strides = [1, 1]} : vector<16x266xbf16> to vector<16x256xbf16>
    %48 = vector.extract_strided_slice %40 {offsets = [0, 7], sizes = [16, 256], strides = [1, 1]} : vector<16x266xbf16> to vector<16x256xbf16>
    %49 = vector.extract_strided_slice %40 {offsets = [0, 8], sizes = [16, 256], strides = [1, 1]} : vector<16x266xbf16> to vector<16x256xbf16>
    %50 = vector.extract_strided_slice %40 {offsets = [0, 9], sizes = [16, 256], strides = [1, 1]} : vector<16x266xbf16> to vector<16x256xbf16>
    %51 = vector.extract_strided_slice %40 {offsets = [0, 10], sizes = [16, 256], strides = [1, 1]} : vector<16x266xbf16> to vector<16x256xbf16>
    %52 = tpu.concatenate %41, %42, %43, %44, %45, %46, %47, %48, %49, %50, %51 in 0 : vector<16x256xbf16>, vector<16x256xbf16>, vector<16x256xbf16>, vector<16x256xbf16>, vector<16x256xbf16>, vector<16x256xbf16>, vector<16x256xbf16>, vector<16x256xbf16>, vector<16x256xbf16>, vector<16x256xbf16>, vector<16x256xbf16> -> vector<176x256xbf16>
    %c2 = arith.constant 2 : index
    %c0_14 = arith.constant 0 : index
    %c0_15 = arith.constant 0 : index
    %53 = vector.load %arg2[%c2, %c0_14, %c0_15] : memref<11x16x176xbf16, #tpu.memory_space<vmem>>, vector<1x16x176xbf16>
    %54 = vector.shape_cast %53 : vector<1x16x176xbf16> to vector<16x176xbf16>
    %cst_16 = arith.constant dense<0.000000e+00> : vector<16x256xf32>
    %55 = tpu.matmul %54, %52, %cst_16 {dimension_numbers = #tpu.dot_dimension_numbers<[1], [0], [0], [1], [0, 0, 1, 1], [], []>} : vector<16x176xbf16>, vector<176x256xbf16>, vector<16x256xf32> -> vector<16x256xf32>
    %56 = arith.addf %38, %55 : vector<16x256xf32>
    %c0_17 = arith.constant 0 : index
    %c0_18 = arith.constant 0 : index
    %c78 = arith.constant 78 : index
    %57 = vector.load %arg1[%c0_17, %c0_18, %c78] : memref<1x16x896xbf16, #tpu.memory_space<vmem>>, vector<1x16x266xbf16>
    %58 = vector.shape_cast %57 : vector<1x16x266xbf16> to vector<16x266xbf16>
    %59 = vector.extract_strided_slice %58 {offsets = [0, 0], sizes = [16, 256], strides = [1, 1]} : vector<16x266xbf16> to vector<16x256xbf16>
    %60 = vector.extract_strided_slice %58 {offsets = [0, 1], sizes = [16, 256], strides = [1, 1]} : vector<16x266xbf16> to vector<16x256xbf16>
    %61 = vector.extract_strided_slice %58 {offsets = [0, 2], sizes = [16, 256], strides = [1, 1]} : vector<16x266xbf16> to vector<16x256xbf16>
    %62 = vector.extract_strided_slice %58 {offsets = [0, 3], sizes = [16, 256], strides = [1, 1]} : vector<16x266xbf16> to vector<16x256xbf16>
    %63 = vector.extract_strided_slice %58 {offsets = [0, 4], sizes = [16, 256], strides = [1, 1]} : vector<16x266xbf16> to vector<16x256xbf16>
    %64 = vector.extract_strided_slice %58 {offsets = [0, 5], sizes = [16, 256], strides = [1, 1]} : vector<16x266xbf16> to vector<16x256xbf16>
    %65 = vector.extract_strided_slice %58 {offsets = [0, 6], sizes = [16, 256], strides = [1, 1]} : vector<16x266xbf16> to vector<16x256xbf16>
    %66 = vector.extract_strided_slice %58 {offsets = [0, 7], sizes = [16, 256], strides = [1, 1]} : vector<16x266xbf16> to vector<16x256xbf16>
    %67 = vector.extract_strided_slice %58 {offsets = [0, 8], sizes = [16, 256], strides = [1, 1]} : vector<16x266xbf16> to vector<16x256xbf16>
    %68 = vector.extract_strided_slice %58 {offsets = [0, 9], sizes = [16, 256], strides = [1, 1]} : vector<16x266xbf16> to vector<16x256xbf16>
    %69 = vector.extract_strided_slice %58 {offsets = [0, 10], sizes = [16, 256], strides = [1, 1]} : vector<16x266xbf16> to vector<16x256xbf16>
    %70 = tpu.concatenate %59, %60, %61, %62, %63, %64, %65, %66, %67, %68, %69 in 0 : vector<16x256xbf16>, vector<16x256xbf16>, vector<16x256xbf16>, vector<16x256xbf16>, vector<16x256xbf16>, vector<16x256xbf16>, vector<16x256xbf16>, vector<16x256xbf16>, vector<16x256xbf16>, vector<16x256xbf16>, vector<16x256xbf16> -> vector<176x256xbf16>
    %c3 = arith.constant 3 : index
    %c0_19 = arith.constant 0 : index
    %c0_20 = arith.constant 0 : index
    %71 = vector.load %arg2[%c3, %c0_19, %c0_20] : memref<11x16x176xbf16, #tpu.memory_space<vmem>>, vector<1x16x176xbf16>
    %72 = vector.shape_cast %71 : vector<1x16x176xbf16> to vector<16x176xbf16>
    %cst_21 = arith.constant dense<0.000000e+00> : vector<16x256xf32>
    %73 = tpu.matmul %72, %70, %cst_21 {dimension_numbers = #tpu.dot_dimension_numbers<[1], [0], [0], [1], [0, 0, 1, 1], [], []>} : vector<16x176xbf16>, vector<176x256xbf16>, vector<16x256xf32> -> vector<16x256xf32>
    %74 = arith.addf %56, %73 : vector<16x256xf32>
    %c0_22 = arith.constant 0 : index
    %c0_23 = arith.constant 0 : index
    %c104 = arith.constant 104 : index
    %75 = vector.load %arg1[%c0_22, %c0_23, %c104] : memref<1x16x896xbf16, #tpu.memory_space<vmem>>, vector<1x16x266xbf16>
    %76 = vector.shape_cast %75 : vector<1x16x266xbf16> to vector<16x266xbf16>
    %77 = vector.extract_strided_slice %76 {offsets = [0, 0], sizes = [16, 256], strides = [1, 1]} : vector<16x266xbf16> to vector<16x256xbf16>
    %78 = vector.extract_strided_slice %76 {offsets = [0, 1], sizes = [16, 256], strides = [1, 1]} : vector<16x266xbf16> to vector<16x256xbf16>
    %79 = vector.extract_strided_slice %76 {offsets = [0, 2], sizes = [16, 256], strides = [1, 1]} : vector<16x266xbf16> to vector<16x256xbf16>
    %80 = vector.extract_strided_slice %76 {offsets = [0, 3], sizes = [16, 256], strides = [1, 1]} : vector<16x266xbf16> to vector<16x256xbf16>
    %81 = vector.extract_strided_slice %76 {offsets = [0, 4], sizes = [16, 256], strides = [1, 1]} : vector<16x266xbf16> to vector<16x256xbf16>
    %82 = vector.extract_strided_slice %76 {offsets = [0, 5], sizes = [16, 256], strides = [1, 1]} : vector<16x266xbf16> to vector<16x256xbf16>
    %83 = vector.extract_strided_slice %76 {offsets = [0, 6], sizes = [16, 256], strides = [1, 1]} : vector<16x266xbf16> to vector<16x256xbf16>
    %84 = vector.extract_strided_slice %76 {offsets = [0, 7], sizes = [16, 256], strides = [1, 1]} : vector<16x266xbf16> to vector<16x256xbf16>
    %85 = vector.extract_strided_slice %76 {offsets = [0, 8], sizes = [16, 256], strides = [1, 1]} : vector<16x266xbf16> to vector<16x256xbf16>
    %86 = vector.extract_strided_slice %76 {offsets = [0, 9], sizes = [16, 256], strides = [1, 1]} : vector<16x266xbf16> to vector<16x256xbf16>
    %87 = vector.extract_strided_slice %76 {offsets = [0, 10], sizes = [16, 256], strides = [1, 1]} : vector<16x266xbf16> to vector<16x256xbf16>
    %88 = tpu.concatenate %77, %78, %79, %80, %81, %82, %83, %84, %85, %86, %87 in 0 : vector<16x256xbf16>, vector<16x256xbf16>, vector<16x256xbf16>, vector<16x256xbf16>, vector<16x256xbf16>, vector<16x256xbf16>, vector<16x256xbf16>, vector<16x256xbf16>, vector<16x256xbf16>, vector<16x256xbf16>, vector<16x256xbf16> -> vector<176x256xbf16>
    %c4 = arith.constant 4 : index
    %c0_24 = arith.constant 0 : index
    %c0_25 = arith.constant 0 : index
    %89 = vector.load %arg2[%c4, %c0_24, %c0_25] : memref<11x16x176xbf16, #tpu.memory_space<vmem>>, vector<1x16x176xbf16>
    %90 = vector.shape_cast %89 : vector<1x16x176xbf16> to vector<16x176xbf16>
    %cst_26 = arith.constant dense<0.000000e+00> : vector<16x256xf32>
    %91 = tpu.matmul %90, %88, %cst_26 {dimension_numbers = #tpu.dot_dimension_numbers<[1], [0], [0], [1], [0, 0, 1, 1], [], []>} : vector<16x176xbf16>, vector<176x256xbf16>, vector<16x256xf32> -> vector<16x256xf32>
    %92 = arith.addf %74, %91 : vector<16x256xf32>
    %c0_27 = arith.constant 0 : index
    %c0_28 = arith.constant 0 : index
    %c130 = arith.constant 130 : index
    %93 = vector.load %arg1[%c0_27, %c0_28, %c130] : memref<1x16x896xbf16, #tpu.memory_space<vmem>>, vector<1x16x266xbf16>
    %94 = vector.shape_cast %93 : vector<1x16x266xbf16> to vector<16x266xbf16>
    %95 = vector.extract_strided_slice %94 {offsets = [0, 0], sizes = [16, 256], strides = [1, 1]} : vector<16x266xbf16> to vector<16x256xbf16>
    %96 = vector.extract_strided_slice %94 {offsets = [0, 1], sizes = [16, 256], strides = [1, 1]} : vector<16x266xbf16> to vector<16x256xbf16>
    %97 = vector.extract_strided_slice %94 {offsets = [0, 2], sizes = [16, 256], strides = [1, 1]} : vector<16x266xbf16> to vector<16x256xbf16>
    %98 = vector.extract_strided_slice %94 {offsets = [0, 3], sizes = [16, 256], strides = [1, 1]} : vector<16x266xbf16> to vector<16x256xbf16>
    %99 = vector.extract_strided_slice %94 {offsets = [0, 4], sizes = [16, 256], strides = [1, 1]} : vector<16x266xbf16> to vector<16x256xbf16>
    %100 = vector.extract_strided_slice %94 {offsets = [0, 5], sizes = [16, 256], strides = [1, 1]} : vector<16x266xbf16> to vector<16x256xbf16>
    %101 = vector.extract_strided_slice %94 {offsets = [0, 6], sizes = [16, 256], strides = [1, 1]} : vector<16x266xbf16> to vector<16x256xbf16>
    %102 = vector.extract_strided_slice %94 {offsets = [0, 7], sizes = [16, 256], strides = [1, 1]} : vector<16x266xbf16> to vector<16x256xbf16>
    %103 = vector.extract_strided_slice %94 {offsets = [0, 8], sizes = [16, 256], strides = [1, 1]} : vector<16x266xbf16> to vector<16x256xbf16>
    %104 = vector.extract_strided_slice %94 {offsets = [0, 9], sizes = [16, 256], strides = [1, 1]} : vector<16x266xbf16> to vector<16x256xbf16>
    %105 = vector.extract_strided_slice %94 {offsets = [0, 10], sizes = [16, 256], strides = [1, 1]} : vector<16x266xbf16> to vector<16x256xbf16>
    %106 = tpu.concatenate %95, %96, %97, %98, %99, %100, %101, %102, %103, %104, %105 in 0 : vector<16x256xbf16>, vector<16x256xbf16>, vector<16x256xbf16>, vector<16x256xbf16>, vector<16x256xbf16>, vector<16x256xbf16>, vector<16x256xbf16>, vector<16x256xbf16>, vector<16x256xbf16>, vector<16x256xbf16>, vector<16x256xbf16> -> vector<176x256xbf16>
    %c5 = arith.constant 5 : index
    %c0_29 = arith.constant 0 : index
    %c0_30 = arith.constant 0 : index
    %107 = vector.load %arg2[%c5, %c0_29, %c0_30] : memref<11x16x176xbf16, #tpu.memory_space<vmem>>, vector<1x16x176xbf16>
    %108 = vector.shape_cast %107 : vector<1x16x176xbf16> to vector<16x176xbf16>
    %cst_31 = arith.constant dense<0.000000e+00> : vector<16x256xf32>
    %109 = tpu.matmul %108, %106, %cst_31 {dimension_numbers = #tpu.dot_dimension_numbers<[1], [0], [0], [1], [0, 0, 1, 1], [], []>} : vector<16x176xbf16>, vector<176x256xbf16>, vector<16x256xf32> -> vector<16x256xf32>
    %110 = arith.addf %92, %109 : vector<16x256xf32>
    %c0_32 = arith.constant 0 : index
    %c0_33 = arith.constant 0 : index
    %c156 = arith.constant 156 : index
    %111 = vector.load %arg1[%c0_32, %c0_33, %c156] : memref<1x16x896xbf16, #tpu.memory_space<vmem>>, vector<1x16x266xbf16>
    %112 = vector.shape_cast %111 : vector<1x16x266xbf16> to vector<16x266xbf16>
    %113 = vector.extract_strided_slice %112 {offsets = [0, 0], sizes = [16, 256], strides = [1, 1]} : vector<16x266xbf16> to vector<16x256xbf16>
    %114 = vector.extract_strided_slice %112 {offsets = [0, 1], sizes = [16, 256], strides = [1, 1]} : vector<16x266xbf16> to vector<16x256xbf16>
    %115 = vector.extract_strided_slice %112 {offsets = [0, 2], sizes = [16, 256], strides = [1, 1]} : vector<16x266xbf16> to vector<16x256xbf16>
    %116 = vector.extract_strided_slice %112 {offsets = [0, 3], sizes = [16, 256], strides = [1, 1]} : vector<16x266xbf16> to vector<16x256xbf16>
    %117 = vector.extract_strided_slice %112 {offsets = [0, 4], sizes = [16, 256], strides = [1, 1]} : vector<16x266xbf16> to vector<16x256xbf16>
    %118 = vector.extract_strided_slice %112 {offsets = [0, 5], sizes = [16, 256], strides = [1, 1]} : vector<16x266xbf16> to vector<16x256xbf16>
    %119 = vector.extract_strided_slice %112 {offsets = [0, 6], sizes = [16, 256], strides = [1, 1]} : vector<16x266xbf16> to vector<16x256xbf16>
    %120 = vector.extract_strided_slice %112 {offsets = [0, 7], sizes = [16, 256], strides = [1, 1]} : vector<16x266xbf16> to vector<16x256xbf16>
    %121 = vector.extract_strided_slice %112 {offsets = [0, 8], sizes = [16, 256], strides = [1, 1]} : vector<16x266xbf16> to vector<16x256xbf16>
    %122 = vector.extract_strided_slice %112 {offsets = [0, 9], sizes = [16, 256], strides = [1, 1]} : vector<16x266xbf16> to vector<16x256xbf16>
    %123 = vector.extract_strided_slice %112 {offsets = [0, 10], sizes = [16, 256], strides = [1, 1]} : vector<16x266xbf16> to vector<16x256xbf16>
    %124 = tpu.concatenate %113, %114, %115, %116, %117, %118, %119, %120, %121, %122, %123 in 0 : vector<16x256xbf16>, vector<16x256xbf16>, vector<16x256xbf16>, vector<16x256xbf16>, vector<16x256xbf16>, vector<16x256xbf16>, vector<16x256xbf16>, vector<16x256xbf16>, vector<16x256xbf16>, vector<16x256xbf16>, vector<16x256xbf16> -> vector<176x256xbf16>
    %c6 = arith.constant 6 : index
    %c0_34 = arith.constant 0 : index
    %c0_35 = arith.constant 0 : index
    %125 = vector.load %arg2[%c6, %c0_34, %c0_35] : memref<11x16x176xbf16, #tpu.memory_space<vmem>>, vector<1x16x176xbf16>
    %126 = vector.shape_cast %125 : vector<1x16x176xbf16> to vector<16x176xbf16>
    %cst_36 = arith.constant dense<0.000000e+00> : vector<16x256xf32>
    %127 = tpu.matmul %126, %124, %cst_36 {dimension_numbers = #tpu.dot_dimension_numbers<[1], [0], [0], [1], [0, 0, 1, 1], [], []>} : vector<16x176xbf16>, vector<176x256xbf16>, vector<16x256xf32> -> vector<16x256xf32>
    %128 = arith.addf %110, %127 : vector<16x256xf32>
    %c0_37 = arith.constant 0 : index
    %c0_38 = arith.constant 0 : index
    %c182 = arith.constant 182 : index
    %129 = vector.load %arg1[%c0_37, %c0_38, %c182] : memref<1x16x896xbf16, #tpu.memory_space<vmem>>, vector<1x16x266xbf16>
    %130 = vector.shape_cast %129 : vector<1x16x266xbf16> to vector<16x266xbf16>
    %131 = vector.extract_strided_slice %130 {offsets = [0, 0], sizes = [16, 256], strides = [1, 1]} : vector<16x266xbf16> to vector<16x256xbf16>
    %132 = vector.extract_strided_slice %130 {offsets = [0, 1], sizes = [16, 256], strides = [1, 1]} : vector<16x266xbf16> to vector<16x256xbf16>
    %133 = vector.extract_strided_slice %130 {offsets = [0, 2], sizes = [16, 256], strides = [1, 1]} : vector<16x266xbf16> to vector<16x256xbf16>
    %134 = vector.extract_strided_slice %130 {offsets = [0, 3], sizes = [16, 256], strides = [1, 1]} : vector<16x266xbf16> to vector<16x256xbf16>
    %135 = vector.extract_strided_slice %130 {offsets = [0, 4], sizes = [16, 256], strides = [1, 1]} : vector<16x266xbf16> to vector<16x256xbf16>
    %136 = vector.extract_strided_slice %130 {offsets = [0, 5], sizes = [16, 256], strides = [1, 1]} : vector<16x266xbf16> to vector<16x256xbf16>
    %137 = vector.extract_strided_slice %130 {offsets = [0, 6], sizes = [16, 256], strides = [1, 1]} : vector<16x266xbf16> to vector<16x256xbf16>
    %138 = vector.extract_strided_slice %130 {offsets = [0, 7], sizes = [16, 256], strides = [1, 1]} : vector<16x266xbf16> to vector<16x256xbf16>
    %139 = vector.extract_strided_slice %130 {offsets = [0, 8], sizes = [16, 256], strides = [1, 1]} : vector<16x266xbf16> to vector<16x256xbf16>
    %140 = vector.extract_strided_slice %130 {offsets = [0, 9], sizes = [16, 256], strides = [1, 1]} : vector<16x266xbf16> to vector<16x256xbf16>
    %141 = vector.extract_strided_slice %130 {offsets = [0, 10], sizes = [16, 256], strides = [1, 1]} : vector<16x266xbf16> to vector<16x256xbf16>
    %142 = tpu.concatenate %131, %132, %133, %134, %135, %136, %137, %138, %139, %140, %141 in 0 : vector<16x256xbf16>, vector<16x256xbf16>, vector<16x256xbf16>, vector<16x256xbf16>, vector<16x256xbf16>, vector<16x256xbf16>, vector<16x256xbf16>, vector<16x256xbf16>, vector<16x256xbf16>, vector<16x256xbf16>, vector<16x256xbf16> -> vector<176x256xbf16>
    %c7 = arith.constant 7 : index
    %c0_39 = arith.constant 0 : index
    %c0_40 = arith.constant 0 : index
    %143 = vector.load %arg2[%c7, %c0_39, %c0_40] : memref<11x16x176xbf16, #tpu.memory_space<vmem>>, vector<1x16x176xbf16>
    %144 = vector.shape_cast %143 : vector<1x16x176xbf16> to vector<16x176xbf16>
    %cst_41 = arith.constant dense<0.000000e+00> : vector<16x256xf32>
    %145 = tpu.matmul %144, %142, %cst_41 {dimension_numbers = #tpu.dot_dimension_numbers<[1], [0], [0], [1], [0, 0, 1, 1], [], []>} : vector<16x176xbf16>, vector<176x256xbf16>, vector<16x256xf32> -> vector<16x256xf32>
    %146 = arith.addf %128, %145 : vector<16x256xf32>
    %c0_42 = arith.constant 0 : index
    %c0_43 = arith.constant 0 : index
    %c208 = arith.constant 208 : index
    %147 = vector.load %arg1[%c0_42, %c0_43, %c208] : memref<1x16x896xbf16, #tpu.memory_space<vmem>>, vector<1x16x266xbf16>
    %148 = vector.shape_cast %147 : vector<1x16x266xbf16> to vector<16x266xbf16>
    %149 = vector.extract_strided_slice %148 {offsets = [0, 0], sizes = [16, 256], strides = [1, 1]} : vector<16x266xbf16> to vector<16x256xbf16>
    %150 = vector.extract_strided_slice %148 {offsets = [0, 1], sizes = [16, 256], strides = [1, 1]} : vector<16x266xbf16> to vector<16x256xbf16>
    %151 = vector.extract_strided_slice %148 {offsets = [0, 2], sizes = [16, 256], strides = [1, 1]} : vector<16x266xbf16> to vector<16x256xbf16>
    %152 = vector.extract_strided_slice %148 {offsets = [0, 3], sizes = [16, 256], strides = [1, 1]} : vector<16x266xbf16> to vector<16x256xbf16>
    %153 = vector.extract_strided_slice %148 {offsets = [0, 4], sizes = [16, 256], strides = [1, 1]} : vector<16x266xbf16> to vector<16x256xbf16>
    %154 = vector.extract_strided_slice %148 {offsets = [0, 5], sizes = [16, 256], strides = [1, 1]} : vector<16x266xbf16> to vector<16x256xbf16>
    %155 = vector.extract_strided_slice %148 {offsets = [0, 6], sizes = [16, 256], strides = [1, 1]} : vector<16x266xbf16> to vector<16x256xbf16>
    %156 = vector.extract_strided_slice %148 {offsets = [0, 7], sizes = [16, 256], strides = [1, 1]} : vector<16x266xbf16> to vector<16x256xbf16>
    %157 = vector.extract_strided_slice %148 {offsets = [0, 8], sizes = [16, 256], strides = [1, 1]} : vector<16x266xbf16> to vector<16x256xbf16>
    %158 = vector.extract_strided_slice %148 {offsets = [0, 9], sizes = [16, 256], strides = [1, 1]} : vector<16x266xbf16> to vector<16x256xbf16>
    %159 = vector.extract_strided_slice %148 {offsets = [0, 10], sizes = [16, 256], strides = [1, 1]} : vector<16x266xbf16> to vector<16x256xbf16>
    %160 = tpu.concatenate %149, %150, %151, %152, %153, %154, %155, %156, %157, %158, %159 in 0 : vector<16x256xbf16>, vector<16x256xbf16>, vector<16x256xbf16>, vector<16x256xbf16>, vector<16x256xbf16>, vector<16x256xbf16>, vector<16x256xbf16>, vector<16x256xbf16>, vector<16x256xbf16>, vector<16x256xbf16>, vector<16x256xbf16> -> vector<176x256xbf16>
    %c8 = arith.constant 8 : index
    %c0_44 = arith.constant 0 : index
    %c0_45 = arith.constant 0 : index
    %161 = vector.load %arg2[%c8, %c0_44, %c0_45] : memref<11x16x176xbf16, #tpu.memory_space<vmem>>, vector<1x16x176xbf16>
    %162 = vector.shape_cast %161 : vector<1x16x176xbf16> to vector<16x176xbf16>
    %cst_46 = arith.constant dense<0.000000e+00> : vector<16x256xf32>
    %163 = tpu.matmul %162, %160, %cst_46 {dimension_numbers = #tpu.dot_dimension_numbers<[1], [0], [0], [1], [0, 0, 1, 1], [], []>} : vector<16x176xbf16>, vector<176x256xbf16>, vector<16x256xf32> -> vector<16x256xf32>
    %164 = arith.addf %146, %163 : vector<16x256xf32>
    %c0_47 = arith.constant 0 : index
    %c0_48 = arith.constant 0 : index
    %c234 = arith.constant 234 : index
    %165 = vector.load %arg1[%c0_47, %c0_48, %c234] : memref<1x16x896xbf16, #tpu.memory_space<vmem>>, vector<1x16x266xbf16>
    %166 = vector.shape_cast %165 : vector<1x16x266xbf16> to vector<16x266xbf16>
    %167 = vector.extract_strided_slice %166 {offsets = [0, 0], sizes = [16, 256], strides = [1, 1]} : vector<16x266xbf16> to vector<16x256xbf16>
    %168 = vector.extract_strided_slice %166 {offsets = [0, 1], sizes = [16, 256], strides = [1, 1]} : vector<16x266xbf16> to vector<16x256xbf16>
    %169 = vector.extract_strided_slice %166 {offsets = [0, 2], sizes = [16, 256], strides = [1, 1]} : vector<16x266xbf16> to vector<16x256xbf16>
    %170 = vector.extract_strided_slice %166 {offsets = [0, 3], sizes = [16, 256], strides = [1, 1]} : vector<16x266xbf16> to vector<16x256xbf16>
    %171 = vector.extract_strided_slice %166 {offsets = [0, 4], sizes = [16, 256], strides = [1, 1]} : vector<16x266xbf16> to vector<16x256xbf16>
    %172 = vector.extract_strided_slice %166 {offsets = [0, 5], sizes = [16, 256], strides = [1, 1]} : vector<16x266xbf16> to vector<16x256xbf16>
    %173 = vector.extract_strided_slice %166 {offsets = [0, 6], sizes = [16, 256], strides = [1, 1]} : vector<16x266xbf16> to vector<16x256xbf16>
    %174 = vector.extract_strided_slice %166 {offsets = [0, 7], sizes = [16, 256], strides = [1, 1]} : vector<16x266xbf16> to vector<16x256xbf16>
    %175 = vector.extract_strided_slice %166 {offsets = [0, 8], sizes = [16, 256], strides = [1, 1]} : vector<16x266xbf16> to vector<16x256xbf16>
    %176 = vector.extract_strided_slice %166 {offsets = [0, 9], sizes = [16, 256], strides = [1, 1]} : vector<16x266xbf16> to vector<16x256xbf16>
    %177 = vector.extract_strided_slice %166 {offsets = [0, 10], sizes = [16, 256], strides = [1, 1]} : vector<16x266xbf16> to vector<16x256xbf16>
    %178 = tpu.concatenate %167, %168, %169, %170, %171, %172, %173, %174, %175, %176, %177 in 0 : vector<16x256xbf16>, vector<16x256xbf16>, vector<16x256xbf16>, vector<16x256xbf16>, vector<16x256xbf16>, vector<16x256xbf16>, vector<16x256xbf16>, vector<16x256xbf16>, vector<16x256xbf16>, vector<16x256xbf16>, vector<16x256xbf16> -> vector<176x256xbf16>
    %c9 = arith.constant 9 : index
    %c0_49 = arith.constant 0 : index
    %c0_50 = arith.constant 0 : index
    %179 = vector.load %arg2[%c9, %c0_49, %c0_50] : memref<11x16x176xbf16, #tpu.memory_space<vmem>>, vector<1x16x176xbf16>
    %180 = vector.shape_cast %179 : vector<1x16x176xbf16> to vector<16x176xbf16>
    %cst_51 = arith.constant dense<0.000000e+00> : vector<16x256xf32>
    %181 = tpu.matmul %180, %178, %cst_51 {dimension_numbers = #tpu.dot_dimension_numbers<[1], [0], [0], [1], [0, 0, 1, 1], [], []>} : vector<16x176xbf16>, vector<176x256xbf16>, vector<16x256xf32> -> vector<16x256xf32>
    %182 = arith.addf %164, %181 : vector<16x256xf32>
    %c0_52 = arith.constant 0 : index
    %c0_53 = arith.constant 0 : index
    %c260 = arith.constant 260 : index
    %183 = vector.load %arg1[%c0_52, %c0_53, %c260] : memref<1x16x896xbf16, #tpu.memory_space<vmem>>, vector<1x16x266xbf16>
    %184 = vector.shape_cast %183 : vector<1x16x266xbf16> to vector<16x266xbf16>
    %185 = vector.extract_strided_slice %184 {offsets = [0, 0], sizes = [16, 256], strides = [1, 1]} : vector<16x266xbf16> to vector<16x256xbf16>
    %186 = vector.extract_strided_slice %184 {offsets = [0, 1], sizes = [16, 256], strides = [1, 1]} : vector<16x266xbf16> to vector<16x256xbf16>
    %187 = vector.extract_strided_slice %184 {offsets = [0, 2], sizes = [16, 256], strides = [1, 1]} : vector<16x266xbf16> to vector<16x256xbf16>
    %188 = vector.extract_strided_slice %184 {offsets = [0, 3], sizes = [16, 256], strides = [1, 1]} : vector<16x266xbf16> to vector<16x256xbf16>
    %189 = vector.extract_strided_slice %184 {offsets = [0, 4], sizes = [16, 256], strides = [1, 1]} : vector<16x266xbf16> to vector<16x256xbf16>
    %190 = vector.extract_strided_slice %184 {offsets = [0, 5], sizes = [16, 256], strides = [1, 1]} : vector<16x266xbf16> to vector<16x256xbf16>
    %191 = vector.extract_strided_slice %184 {offsets = [0, 6], sizes = [16, 256], strides = [1, 1]} : vector<16x266xbf16> to vector<16x256xbf16>
    %192 = vector.extract_strided_slice %184 {offsets = [0, 7], sizes = [16, 256], strides = [1, 1]} : vector<16x266xbf16> to vector<16x256xbf16>
    %193 = vector.extract_strided_slice %184 {offsets = [0, 8], sizes = [16, 256], strides = [1, 1]} : vector<16x266xbf16> to vector<16x256xbf16>
    %194 = vector.extract_strided_slice %184 {offsets = [0, 9], sizes = [16, 256], strides = [1, 1]} : vector<16x266xbf16> to vector<16x256xbf16>
    %195 = vector.extract_strided_slice %184 {offsets = [0, 10], sizes = [16, 256], strides = [1, 1]} : vector<16x266xbf16> to vector<16x256xbf16>
    %196 = tpu.concatenate %185, %186, %187, %188, %189, %190, %191, %192, %193, %194, %195 in 0 : vector<16x256xbf16>, vector<16x256xbf16>, vector<16x256xbf16>, vector<16x256xbf16>, vector<16x256xbf16>, vector<16x256xbf16>, vector<16x256xbf16>, vector<16x256xbf16>, vector<16x256xbf16>, vector<16x256xbf16>, vector<16x256xbf16> -> vector<176x256xbf16>
    %c10 = arith.constant 10 : index
    %c0_54 = arith.constant 0 : index
    %c0_55 = arith.constant 0 : index
    %197 = vector.load %arg2[%c10, %c0_54, %c0_55] : memref<11x16x176xbf16, #tpu.memory_space<vmem>>, vector<1x16x176xbf16>
    %198 = vector.shape_cast %197 : vector<1x16x176xbf16> to vector<16x176xbf16>
    %cst_56 = arith.constant dense<0.000000e+00> : vector<16x256xf32>
    %199 = tpu.matmul %198, %196, %cst_56 {dimension_numbers = #tpu.dot_dimension_numbers<[1], [0], [0], [1], [0, 0, 1, 1], [], []>} : vector<16x176xbf16>, vector<176x256xbf16>, vector<16x256xf32> -> vector<16x256xf32>
    %200 = arith.addf %182, %199 : vector<16x256xf32>
    %c0_57 = arith.constant 0 : index
    %c0_58 = arith.constant 0 : index
    %c0_59 = arith.constant 0 : index
    %201 = vector.load %arg4[%c0_57, %c0_58, %c0_59] : memref<1x16x512xf32, #tpu.memory_space<vmem>>, vector<1x16x256xf32>
    %202 = vector.shape_cast %201 : vector<1x16x256xf32> to vector<16x256xf32>
    %203 = vector.shape_cast %200 : vector<16x256xf32> to vector<1x16x256xf32>
    tpu.vector_store %arg4[%c0_57, %c0_58, %c0_59], %203 {strides = array<i32>} : memref<1x16x512xf32, #tpu.memory_space<vmem>>, vector<1x16x256xf32>,
    %c0_60 = arith.constant 0 : index
    %c0_61 = arith.constant 0 : index
    %c256 = arith.constant 256 : index
    %204 = vector.load %arg1[%c0_60, %c0_61, %c256] : memref<1x16x896xbf16, #tpu.memory_space<vmem>>, vector<1x16x266xbf16>
    %205 = vector.shape_cast %204 : vector<1x16x266xbf16> to vector<16x266xbf16>
    %206 = vector.extract_strided_slice %205 {offsets = [0, 0], sizes = [16, 256], strides = [1, 1]} : vector<16x266xbf16> to vector<16x256xbf16>
    %207 = vector.extract_strided_slice %205 {offsets = [0, 1], sizes = [16, 256], strides = [1, 1]} : vector<16x266xbf16> to vector<16x256xbf16>
    %208 = vector.extract_strided_slice %205 {offsets = [0, 2], sizes = [16, 256], strides = [1, 1]} : vector<16x266xbf16> to vector<16x256xbf16>
    %209 = vector.extract_strided_slice %205 {offsets = [0, 3], sizes = [16, 256], strides = [1, 1]} : vector<16x266xbf16> to vector<16x256xbf16>
    %210 = vector.extract_strided_slice %205 {offsets = [0, 4], sizes = [16, 256], strides = [1, 1]} : vector<16x266xbf16> to vector<16x256xbf16>
    %211 = vector.extract_strided_slice %205 {offsets = [0, 5], sizes = [16, 256], strides = [1, 1]} : vector<16x266xbf16> to vector<16x256xbf16>
    %212 = vector.extract_strided_slice %205 {offsets = [0, 6], sizes = [16, 256], strides = [1, 1]} : vector<16x266xbf16> to vector<16x256xbf16>
    %213 = vector.extract_strided_slice %205 {offsets = [0, 7], sizes = [16, 256], strides = [1, 1]} : vector<16x266xbf16> to vector<16x256xbf16>
    %214 = vector.extract_strided_slice %205 {offsets = [0, 8], sizes = [16, 256], strides = [1, 1]} : vector<16x266xbf16> to vector<16x256xbf16>
    %215 = vector.extract_strided_slice %205 {offsets = [0, 9], sizes = [16, 256], strides = [1, 1]} : vector<16x266xbf16> to vector<16x256xbf16>
    %216 = vector.extract_strided_slice %205 {offsets = [0, 10], sizes = [16, 256], strides = [1, 1]} : vector<16x266xbf16> to vector<16x256xbf16>
    %217 = tpu.concatenate %206, %207, %208, %209, %210, %211, %212, %213, %214, %215, %216 in 0 : vector<16x256xbf16>, vector<16x256xbf16>, vector<16x256xbf16>, vector<16x256xbf16>, vector<16x256xbf16>, vector<16x256xbf16>, vector<16x256xbf16>, vector<16x256xbf16>, vector<16x256xbf16>, vector<16x256xbf16>, vector<16x256xbf16> -> vector<176x256xbf16>
    %c0_62 = arith.constant 0 : index
    %c0_63 = arith.constant 0 : index
    %c0_64 = arith.constant 0 : index
    %218 = vector.load %arg2[%c0_62, %c0_63, %c0_64] : memref<11x16x176xbf16, #tpu.memory_space<vmem>>, vector<1x16x176xbf16>
    %219 = vector.shape_cast %218 : vector<1x16x176xbf16> to vector<16x176xbf16>
    %cst_65 = arith.constant dense<0.000000e+00> : vector<16x256xf32>
    %220 = tpu.matmul %219, %217, %cst_65 {dimension_numbers = #tpu.dot_dimension_numbers<[1], [0], [0], [1], [0, 0, 1, 1], [], []>} : vector<16x176xbf16>, vector<176x256xbf16>, vector<16x256xf32> -> vector<16x256xf32>
    %221 = arith.addf %2, %220 : vector<16x256xf32>
    %c0_66 = arith.constant 0 : index
    %c0_67 = arith.constant 0 : index
    %c282 = arith.constant 282 : index
    %222 = vector.load %arg1[%c0_66, %c0_67, %c282] : memref<1x16x896xbf16, #tpu.memory_space<vmem>>, vector<1x16x266xbf16>
    %223 = vector.shape_cast %222 : vector<1x16x266xbf16> to vector<16x266xbf16>
    %224 = vector.extract_strided_slice %223 {offsets = [0, 0], sizes = [16, 256], strides = [1, 1]} : vector<16x266xbf16> to vector<16x256xbf16>
    %225 = vector.extract_strided_slice %223 {offsets = [0, 1], sizes = [16, 256], strides = [1, 1]} : vector<16x266xbf16> to vector<16x256xbf16>
    %226 = vector.extract_strided_slice %223 {offsets = [0, 2], sizes = [16, 256], strides = [1, 1]} : vector<16x266xbf16> to vector<16x256xbf16>
    %227 = vector.extract_strided_slice %223 {offsets = [0, 3], sizes = [16, 256], strides = [1, 1]} : vector<16x266xbf16> to vector<16x256xbf16>
    %228 = vector.extract_strided_slice %223 {offsets = [0, 4], sizes = [16, 256], strides = [1, 1]} : vector<16x266xbf16> to vector<16x256xbf16>
    %229 = vector.extract_strided_slice %223 {offsets = [0, 5], sizes = [16, 256], strides = [1, 1]} : vector<16x266xbf16> to vector<16x256xbf16>
    %230 = vector.extract_strided_slice %223 {offsets = [0, 6], sizes = [16, 256], strides = [1, 1]} : vector<16x266xbf16> to vector<16x256xbf16>
    %231 = vector.extract_strided_slice %223 {offsets = [0, 7], sizes = [16, 256], strides = [1, 1]} : vector<16x266xbf16> to vector<16x256xbf16>
    %232 = vector.extract_strided_slice %223 {offsets = [0, 8], sizes = [16, 256], strides = [1, 1]} : vector<16x266xbf16> to vector<16x256xbf16>
    %233 = vector.extract_strided_slice %223 {offsets = [0, 9], sizes = [16, 256], strides = [1, 1]} : vector<16x266xbf16> to vector<16x256xbf16>
    %234 = vector.extract_strided_slice %223 {offsets = [0, 10], sizes = [16, 256], strides = [1, 1]} : vector<16x266xbf16> to vector<16x256xbf16>
    %235 = tpu.concatenate %224, %225, %226, %227, %228, %229, %230, %231, %232, %233, %234 in 0 : vector<16x256xbf16>, vector<16x256xbf16>, vector<16x256xbf16>, vector<16x256xbf16>, vector<16x256xbf16>, vector<16x256xbf16>, vector<16x256xbf16>, vector<16x256xbf16>, vector<16x256xbf16>, vector<16x256xbf16>, vector<16x256xbf16> -> vector<176x256xbf16>
    %c1_68 = arith.constant 1 : index
    %c0_69 = arith.constant 0 : index
    %c0_70 = arith.constant 0 : index
    %236 = vector.load %arg2[%c1_68, %c0_69, %c0_70] : memref<11x16x176xbf16, #tpu.memory_space<vmem>>, vector<1x16x176xbf16>
    %237 = vector.shape_cast %236 : vector<1x16x176xbf16> to vector<16x176xbf16>
    %cst_71 = arith.constant dense<0.000000e+00> : vector<16x256xf32>
    %238 = tpu.matmul %237, %235, %cst_71 {dimension_numbers = #tpu.dot_dimension_numbers<[1], [0], [0], [1], [0, 0, 1, 1], [], []>} : vector<16x176xbf16>, vector<176x256xbf16>, vector<16x256xf32> -> vector<16x256xf32>
    %239 = arith.addf %221, %238 : vector<16x256xf32>
    %c0_72 = arith.constant 0 : index
    %c0_73 = arith.constant 0 : index
    %c308 = arith.constant 308 : index
    %240 = vector.load %arg1[%c0_72, %c0_73, %c308] : memref<1x16x896xbf16, #tpu.memory_space<vmem>>, vector<1x16x266xbf16>
    %241 = vector.shape_cast %240 : vector<1x16x266xbf16> to vector<16x266xbf16>
    %242 = vector.extract_strided_slice %241 {offsets = [0, 0], sizes = [16, 256], strides = [1, 1]} : vector<16x266xbf16> to vector<16x256xbf16>
    %243 = vector.extract_strided_slice %241 {offsets = [0, 1], sizes = [16, 256], strides = [1, 1]} : vector<16x266xbf16> to vector<16x256xbf16>
    %244 = vector.extract_strided_slice %241 {offsets = [0, 2], sizes = [16, 256], strides = [1, 1]} : vector<16x266xbf16> to vector<16x256xbf16>
    %245 = vector.extract_strided_slice %241 {offsets = [0, 3], sizes = [16, 256], strides = [1, 1]} : vector<16x266xbf16> to vector<16x256xbf16>
    %246 = vector.extract_strided_slice %241 {offsets = [0, 4], sizes = [16, 256], strides = [1, 1]} : vector<16x266xbf16> to vector<16x256xbf16>
    %247 = vector.extract_strided_slice %241 {offsets = [0, 5], sizes = [16, 256], strides = [1, 1]} : vector<16x266xbf16> to vector<16x256xbf16>
    %248 = vector.extract_strided_slice %241 {offsets = [0, 6], sizes = [16, 256], strides = [1, 1]} : vector<16x266xbf16> to vector<16x256xbf16>
    %249 = vector.extract_strided_slice %241 {offsets = [0, 7], sizes = [16, 256], strides = [1, 1]} : vector<16x266xbf16> to vector<16x256xbf16>
    %250 = vector.extract_strided_slice %241 {offsets = [0, 8], sizes = [16, 256], strides = [1, 1]} : vector<16x266xbf16> to vector<16x256xbf16>
    %251 = vector.extract_strided_slice %241 {offsets = [0, 9], sizes = [16, 256], strides = [1, 1]} : vector<16x266xbf16> to vector<16x256xbf16>
    %252 = vector.extract_strided_slice %241 {offsets = [0, 10], sizes = [16, 256], strides = [1, 1]} : vector<16x266xbf16> to vector<16x256xbf16>
    %253 = tpu.concatenate %242, %243, %244, %245, %246, %247, %248, %249, %250, %251, %252 in 0 : vector<16x256xbf16>, vector<16x256xbf16>, vector<16x256xbf16>, vector<16x256xbf16>, vector<16x256xbf16>, vector<16x256xbf16>, vector<16x256xbf16>, vector<16x256xbf16>, vector<16x256xbf16>, vector<16x256xbf16>, vector<16x256xbf16> -> vector<176x256xbf16>
    %c2_74 = arith.constant 2 : index
    %c0_75 = arith.constant 0 : index
    %c0_76 = arith.constant 0 : index
    %254 = vector.load %arg2[%c2_74, %c0_75, %c0_76] : memref<11x16x176xbf16, #tpu.memory_space<vmem>>, vector<1x16x176xbf16>
    %255 = vector.shape_cast %254 : vector<1x16x176xbf16> to vector<16x176xbf16>
    %cst_77 = arith.constant dense<0.000000e+00> : vector<16x256xf32>
    %256 = tpu.matmul %255, %253, %cst_77 {dimension_numbers = #tpu.dot_dimension_numbers<[1], [0], [0], [1], [0, 0, 1, 1], [], []>} : vector<16x176xbf16>, vector<176x256xbf16>, vector<16x256xf32> -> vector<16x256xf32>
    %257 = arith.addf %239, %256 : vector<16x256xf32>
    %c0_78 = arith.constant 0 : index
    %c0_79 = arith.constant 0 : index
    %c334 = arith.constant 334 : index
    %258 = vector.load %arg1[%c0_78, %c0_79, %c334] : memref<1x16x896xbf16, #tpu.memory_space<vmem>>, vector<1x16x266xbf16>
    %259 = vector.shape_cast %258 : vector<1x16x266xbf16> to vector<16x266xbf16>
    %260 = vector.extract_strided_slice %259 {offsets = [0, 0], sizes = [16, 256], strides = [1, 1]} : vector<16x266xbf16> to vector<16x256xbf16>
    %261 = vector.extract_strided_slice %259 {offsets = [0, 1], sizes = [16, 256], strides = [1, 1]} : vector<16x266xbf16> to vector<16x256xbf16>
    %262 = vector.extract_strided_slice %259 {offsets = [0, 2], sizes = [16, 256], strides = [1, 1]} : vector<16x266xbf16> to vector<16x256xbf16>
    %263 = vector.extract_strided_slice %259 {offsets = [0, 3], sizes = [16, 256], strides = [1, 1]} : vector<16x266xbf16> to vector<16x256xbf16>
    %264 = vector.extract_strided_slice %259 {offsets = [0, 4], sizes = [16, 256], strides = [1, 1]} : vector<16x266xbf16> to vector<16x256xbf16>
    %265 = vector.extract_strided_slice %259 {offsets = [0, 5], sizes = [16, 256], strides = [1, 1]} : vector<16x266xbf16> to vector<16x256xbf16>
    %266 = vector.extract_strided_slice %259 {offsets = [0, 6], sizes = [16, 256], strides = [1, 1]} : vector<16x266xbf16> to vector<16x256xbf16>
    %267 = vector.extract_strided_slice %259 {offsets = [0, 7], sizes = [16, 256], strides = [1, 1]} : vector<16x266xbf16> to vector<16x256xbf16>
    %268 = vector.extract_strided_slice %259 {offsets = [0, 8], sizes = [16, 256], strides = [1, 1]} : vector<16x266xbf16> to vector<16x256xbf16>
    %269 = vector.extract_strided_slice %259 {offsets = [0, 9], sizes = [16, 256], strides = [1, 1]} : vector<16x266xbf16> to vector<16x256xbf16>
    %270 = vector.extract_strided_slice %259 {offsets = [0, 10], sizes = [16, 256], strides = [1, 1]} : vector<16x266xbf16> to vector<16x256xbf16>
    %271 = tpu.concatenate %260, %261, %262, %263, %264, %265, %266, %267, %268, %269, %270 in 0 : vector<16x256xbf16>, vector<16x256xbf16>, vector<16x256xbf16>, vector<16x256xbf16>, vector<16x256xbf16>, vector<16x256xbf16>, vector<16x256xbf16>, vector<16x256xbf16>, vector<16x256xbf16>, vector<16x256xbf16>, vector<16x256xbf16> -> vector<176x256xbf16>
    %c3_80 = arith.constant 3 : index
    %c0_81 = arith.constant 0 : index
    %c0_82 = arith.constant 0 : index
    %272 = vector.load %arg2[%c3_80, %c0_81, %c0_82] : memref<11x16x176xbf16, #tpu.memory_space<vmem>>, vector<1x16x176xbf16>
    %273 = vector.shape_cast %272 : vector<1x16x176xbf16> to vector<16x176xbf16>
    %cst_83 = arith.constant dense<0.000000e+00> : vector<16x256xf32>
    %274 = tpu.matmul %273, %271, %cst_83 {dimension_numbers = #tpu.dot_dimension_numbers<[1], [0], [0], [1], [0, 0, 1, 1], [], []>} : vector<16x176xbf16>, vector<176x256xbf16>, vector<16x256xf32> -> vector<16x256xf32>
    %275 = arith.addf %257, %274 : vector<16x256xf32>
    %c0_84 = arith.constant 0 : index
    %c0_85 = arith.constant 0 : index
    %c360 = arith.constant 360 : index
    %276 = vector.load %arg1[%c0_84, %c0_85, %c360] : memref<1x16x896xbf16, #tpu.memory_space<vmem>>, vector<1x16x266xbf16>
    %277 = vector.shape_cast %276 : vector<1x16x266xbf16> to vector<16x266xbf16>
    %278 = vector.extract_strided_slice %277 {offsets = [0, 0], sizes = [16, 256], strides = [1, 1]} : vector<16x266xbf16> to vector<16x256xbf16>
    %279 = vector.extract_strided_slice %277 {offsets = [0, 1], sizes = [16, 256], strides = [1, 1]} : vector<16x266xbf16> to vector<16x256xbf16>
    %280 = vector.extract_strided_slice %277 {offsets = [0, 2], sizes = [16, 256], strides = [1, 1]} : vector<16x266xbf16> to vector<16x256xbf16>
    %281 = vector.extract_strided_slice %277 {offsets = [0, 3], sizes = [16, 256], strides = [1, 1]} : vector<16x266xbf16> to vector<16x256xbf16>
    %282 = vector.extract_strided_slice %277 {offsets = [0, 4], sizes = [16, 256], strides = [1, 1]} : vector<16x266xbf16> to vector<16x256xbf16>
    %283 = vector.extract_strided_slice %277 {offsets = [0, 5], sizes = [16, 256], strides = [1, 1]} : vector<16x266xbf16> to vector<16x256xbf16>
    %284 = vector.extract_strided_slice %277 {offsets = [0, 6], sizes = [16, 256], strides = [1, 1]} : vector<16x266xbf16> to vector<16x256xbf16>
    %285 = vector.extract_strided_slice %277 {offsets = [0, 7], sizes = [16, 256], strides = [1, 1]} : vector<16x266xbf16> to vector<16x256xbf16>
    %286 = vector.extract_strided_slice %277 {offsets = [0, 8], sizes = [16, 256], strides = [1, 1]} : vector<16x266xbf16> to vector<16x256xbf16>
    %287 = vector.extract_strided_slice %277 {offsets = [0, 9], sizes = [16, 256], strides = [1, 1]} : vector<16x266xbf16> to vector<16x256xbf16>
    %288 = vector.extract_strided_slice %277 {offsets = [0, 10], sizes = [16, 256], strides = [1, 1]} : vector<16x266xbf16> to vector<16x256xbf16>
    %289 = tpu.concatenate %278, %279, %280, %281, %282, %283, %284, %285, %286, %287, %288 in 0 : vector<16x256xbf16>, vector<16x256xbf16>, vector<16x256xbf16>, vector<16x256xbf16>, vector<16x256xbf16>, vector<16x256xbf16>, vector<16x256xbf16>, vector<16x256xbf16>, vector<16x256xbf16>, vector<16x256xbf16>, vector<16x256xbf16> -> vector<176x256xbf16>
    %c4_86 = arith.constant 4 : index
    %c0_87 = arith.constant 0 : index
    %c0_88 = arith.constant 0 : index
    %290 = vector.load %arg2[%c4_86, %c0_87, %c0_88] : memref<11x16x176xbf16, #tpu.memory_space<vmem>>, vector<1x16x176xbf16>
    %291 = vector.shape_cast %290 : vector<1x16x176xbf16> to vector<16x176xbf16>
    %cst_89 = arith.constant dense<0.000000e+00> : vector<16x256xf32>
    %292 = tpu.matmul %291, %289, %cst_89 {dimension_numbers = #tpu.dot_dimension_numbers<[1], [0], [0], [1], [0, 0, 1, 1], [], []>} : vector<16x176xbf16>, vector<176x256xbf16>, vector<16x256xf32> -> vector<16x256xf32>
    %293 = arith.addf %275, %292 : vector<16x256xf32>
    %c0_90 = arith.constant 0 : index
    %c0_91 = arith.constant 0 : index
    %c386 = arith.constant 386 : index
    %294 = vector.load %arg1[%c0_90, %c0_91, %c386] : memref<1x16x896xbf16, #tpu.memory_space<vmem>>, vector<1x16x266xbf16>
    %295 = vector.shape_cast %294 : vector<1x16x266xbf16> to vector<16x266xbf16>
    %296 = vector.extract_strided_slice %295 {offsets = [0, 0], sizes = [16, 256], strides = [1, 1]} : vector<16x266xbf16> to vector<16x256xbf16>
    %297 = vector.extract_strided_slice %295 {offsets = [0, 1], sizes = [16, 256], strides = [1, 1]} : vector<16x266xbf16> to vector<16x256xbf16>
    %298 = vector.extract_strided_slice %295 {offsets = [0, 2], sizes = [16, 256], strides = [1, 1]} : vector<16x266xbf16> to vector<16x256xbf16>
    %299 = vector.extract_strided_slice %295 {offsets = [0, 3], sizes = [16, 256], strides = [1, 1]} : vector<16x266xbf16> to vector<16x256xbf16>
    %300 = vector.extract_strided_slice %295 {offsets = [0, 4], sizes = [16, 256], strides = [1, 1]} : vector<16x266xbf16> to vector<16x256xbf16>
    %301 = vector.extract_strided_slice %295 {offsets = [0, 5], sizes = [16, 256], strides = [1, 1]} : vector<16x266xbf16> to vector<16x256xbf16>
    %302 = vector.extract_strided_slice %295 {offsets = [0, 6], sizes = [16, 256], strides = [1, 1]} : vector<16x266xbf16> to vector<16x256xbf16>
    %303 = vector.extract_strided_slice %295 {offsets = [0, 7], sizes = [16, 256], strides = [1, 1]} : vector<16x266xbf16> to vector<16x256xbf16>
    %304 = vector.extract_strided_slice %295 {offsets = [0, 8], sizes = [16, 256], strides = [1, 1]} : vector<16x266xbf16> to vector<16x256xbf16>
    %305 = vector.extract_strided_slice %295 {offsets = [0, 9], sizes = [16, 256], strides = [1, 1]} : vector<16x266xbf16> to vector<16x256xbf16>
    %306 = vector.extract_strided_slice %295 {offsets = [0, 10], sizes = [16, 256], strides = [1, 1]} : vector<16x266xbf16> to vector<16x256xbf16>
    %307 = tpu.concatenate %296, %297, %298, %299, %300, %301, %302, %303, %304, %305, %306 in 0 : vector<16x256xbf16>, vector<16x256xbf16>, vector<16x256xbf16>, vector<16x256xbf16>, vector<16x256xbf16>, vector<16x256xbf16>, vector<16x256xbf16>, vector<16x256xbf16>, vector<16x256xbf16>, vector<16x256xbf16>, vector<16x256xbf16> -> vector<176x256xbf16>
    %c5_92 = arith.constant 5 : index
    %c0_93 = arith.constant 0 : index
    %c0_94 = arith.constant 0 : index
    %308 = vector.load %arg2[%c5_92, %c0_93, %c0_94] : memref<11x16x176xbf16, #tpu.memory_space<vmem>>, vector<1x16x176xbf16>
    %309 = vector.shape_cast %308 : vector<1x16x176xbf16> to vector<16x176xbf16>
    %cst_95 = arith.constant dense<0.000000e+00> : vector<16x256xf32>
    %310 = tpu.matmul %309, %307, %cst_95 {dimension_numbers = #tpu.dot_dimension_numbers<[1], [0], [0], [1], [0, 0, 1, 1], [], []>} : vector<16x176xbf16>, vector<176x256xbf16>, vector<16x256xf32> -> vector<16x256xf32>
    %311 = arith.addf %293, %310 : vector<16x256xf32>
    %c0_96 = arith.constant 0 : index
    %c0_97 = arith.constant 0 : index
    %c412 = arith.constant 412 : index
    %312 = vector.load %arg1[%c0_96, %c0_97, %c412] : memref<1x16x896xbf16, #tpu.memory_space<vmem>>, vector<1x16x266xbf16>
    %313 = vector.shape_cast %312 : vector<1x16x266xbf16> to vector<16x266xbf16>
    %314 = vector.extract_strided_slice %313 {offsets = [0, 0], sizes = [16, 256], strides = [1, 1]} : vector<16x266xbf16> to vector<16x256xbf16>
    %315 = vector.extract_strided_slice %313 {offsets = [0, 1], sizes = [16, 256], strides = [1, 1]} : vector<16x266xbf16> to vector<16x256xbf16>
    %316 = vector.extract_strided_slice %313 {offsets = [0, 2], sizes = [16, 256], strides = [1, 1]} : vector<16x266xbf16> to vector<16x256xbf16>
    %317 = vector.extract_strided_slice %313 {offsets = [0, 3], sizes = [16, 256], strides = [1, 1]} : vector<16x266xbf16> to vector<16x256xbf16>
    %318 = vector.extract_strided_slice %313 {offsets = [0, 4], sizes = [16, 256], strides = [1, 1]} : vector<16x266xbf16> to vector<16x256xbf16>
    %319 = vector.extract_strided_slice %313 {offsets = [0, 5], sizes = [16, 256], strides = [1, 1]} : vector<16x266xbf16> to vector<16x256xbf16>
    %320 = vector.extract_strided_slice %313 {offsets = [0, 6], sizes = [16, 256], strides = [1, 1]} : vector<16x266xbf16> to vector<16x256xbf16>
    %321 = vector.extract_strided_slice %313 {offsets = [0, 7], sizes = [16, 256], strides = [1, 1]} : vector<16x266xbf16> to vector<16x256xbf16>
    %322 = vector.extract_strided_slice %313 {offsets = [0, 8], sizes = [16, 256], strides = [1, 1]} : vector<16x266xbf16> to vector<16x256xbf16>
    %323 = vector.extract_strided_slice %313 {offsets = [0, 9], sizes = [16, 256], strides = [1, 1]} : vector<16x266xbf16> to vector<16x256xbf16>
    %324 = vector.extract_strided_slice %313 {offsets = [0, 10], sizes = [16, 256], strides = [1, 1]} : vector<16x266xbf16> to vector<16x256xbf16>
    %325 = tpu.concatenate %314, %315, %316, %317, %318, %319, %320, %321, %322, %323, %324 in 0 : vector<16x256xbf16>, vector<16x256xbf16>, vector<16x256xbf16>, vector<16x256xbf16>, vector<16x256xbf16>, vector<16x256xbf16>, vector<16x256xbf16>, vector<16x256xbf16>, vector<16x256xbf16>, vector<16x256xbf16>, vector<16x256xbf16> -> vector<176x256xbf16>
    %c6_98 = arith.constant 6 : index
    %c0_99 = arith.constant 0 : index
    %c0_100 = arith.constant 0 : index
    %326 = vector.load %arg2[%c6_98, %c0_99, %c0_100] : memref<11x16x176xbf16, #tpu.memory_space<vmem>>, vector<1x16x176xbf16>
    %327 = vector.shape_cast %326 : vector<1x16x176xbf16> to vector<16x176xbf16>
    %cst_101 = arith.constant dense<0.000000e+00> : vector<16x256xf32>
    %328 = tpu.matmul %327, %325, %cst_101 {dimension_numbers = #tpu.dot_dimension_numbers<[1], [0], [0], [1], [0, 0, 1, 1], [], []>} : vector<16x176xbf16>, vector<176x256xbf16>, vector<16x256xf32> -> vector<16x256xf32>
    %329 = arith.addf %311, %328 : vector<16x256xf32>
    %c0_102 = arith.constant 0 : index
    %c0_103 = arith.constant 0 : index
    %c438 = arith.constant 438 : index
    %330 = vector.load %arg1[%c0_102, %c0_103, %c438] : memref<1x16x896xbf16, #tpu.memory_space<vmem>>, vector<1x16x266xbf16>
    %331 = vector.shape_cast %330 : vector<1x16x266xbf16> to vector<16x266xbf16>
    %332 = vector.extract_strided_slice %331 {offsets = [0, 0], sizes = [16, 256], strides = [1, 1]} : vector<16x266xbf16> to vector<16x256xbf16>
    %333 = vector.extract_strided_slice %331 {offsets = [0, 1], sizes = [16, 256], strides = [1, 1]} : vector<16x266xbf16> to vector<16x256xbf16>
    %334 = vector.extract_strided_slice %331 {offsets = [0, 2], sizes = [16, 256], strides = [1, 1]} : vector<16x266xbf16> to vector<16x256xbf16>
    %335 = vector.extract_strided_slice %331 {offsets = [0, 3], sizes = [16, 256], strides = [1, 1]} : vector<16x266xbf16> to vector<16x256xbf16>
    %336 = vector.extract_strided_slice %331 {offsets = [0, 4], sizes = [16, 256], strides = [1, 1]} : vector<16x266xbf16> to vector<16x256xbf16>
    %337 = vector.extract_strided_slice %331 {offsets = [0, 5], sizes = [16, 256], strides = [1, 1]} : vector<16x266xbf16> to vector<16x256xbf16>
    %338 = vector.extract_strided_slice %331 {offsets = [0, 6], sizes = [16, 256], strides = [1, 1]} : vector<16x266xbf16> to vector<16x256xbf16>
    %339 = vector.extract_strided_slice %331 {offsets = [0, 7], sizes = [16, 256], strides = [1, 1]} : vector<16x266xbf16> to vector<16x256xbf16>
    %340 = vector.extract_strided_slice %331 {offsets = [0, 8], sizes = [16, 256], strides = [1, 1]} : vector<16x266xbf16> to vector<16x256xbf16>
    %341 = vector.extract_strided_slice %331 {offsets = [0, 9], sizes = [16, 256], strides = [1, 1]} : vector<16x266xbf16> to vector<16x256xbf16>
    %342 = vector.extract_strided_slice %331 {offsets = [0, 10], sizes = [16, 256], strides = [1, 1]} : vector<16x266xbf16> to vector<16x256xbf16>
    %343 = tpu.concatenate %332, %333, %334, %335, %336, %337, %338, %339, %340, %341, %342 in 0 : vector<16x256xbf16>, vector<16x256xbf16>, vector<16x256xbf16>, vector<16x256xbf16>, vector<16x256xbf16>, vector<16x256xbf16>, vector<16x256xbf16>, vector<16x256xbf16>, vector<16x256xbf16>, vector<16x256xbf16>, vector<16x256xbf16> -> vector<176x256xbf16>
    %c7_104 = arith.constant 7 : index
    %c0_105 = arith.constant 0 : index
    %c0_106 = arith.constant 0 : index
    %344 = vector.load %arg2[%c7_104, %c0_105, %c0_106] : memref<11x16x176xbf16, #tpu.memory_space<vmem>>, vector<1x16x176xbf16>
    %345 = vector.shape_cast %344 : vector<1x16x176xbf16> to vector<16x176xbf16>
    %cst_107 = arith.constant dense<0.000000e+00> : vector<16x256xf32>
    %346 = tpu.matmul %345, %343, %cst_107 {dimension_numbers = #tpu.dot_dimension_numbers<[1], [0], [0], [1], [0, 0, 1, 1], [], []>} : vector<16x176xbf16>, vector<176x256xbf16>, vector<16x256xf32> -> vector<16x256xf32>
    %347 = arith.addf %329, %346 : vector<16x256xf32>
    %c0_108 = arith.constant 0 : index
    %c0_109 = arith.constant 0 : index
    %c464 = arith.constant 464 : index
    %348 = vector.load %arg1[%c0_108, %c0_109, %c464] : memref<1x16x896xbf16, #tpu.memory_space<vmem>>, vector<1x16x266xbf16>
    %349 = vector.shape_cast %348 : vector<1x16x266xbf16> to vector<16x266xbf16>
    %350 = vector.extract_strided_slice %349 {offsets = [0, 0], sizes = [16, 256], strides = [1, 1]} : vector<16x266xbf16> to vector<16x256xbf16>
    %351 = vector.extract_strided_slice %349 {offsets = [0, 1], sizes = [16, 256], strides = [1, 1]} : vector<16x266xbf16> to vector<16x256xbf16>
    %352 = vector.extract_strided_slice %349 {offsets = [0, 2], sizes = [16, 256], strides = [1, 1]} : vector<16x266xbf16> to vector<16x256xbf16>
    %353 = vector.extract_strided_slice %349 {offsets = [0, 3], sizes = [16, 256], strides = [1, 1]} : vector<16x266xbf16> to vector<16x256xbf16>
    %354 = vector.extract_strided_slice %349 {offsets = [0, 4], sizes = [16, 256], strides = [1, 1]} : vector<16x266xbf16> to vector<16x256xbf16>
    %355 = vector.extract_strided_slice %349 {offsets = [0, 5], sizes = [16, 256], strides = [1, 1]} : vector<16x266xbf16> to vector<16x256xbf16>
    %356 = vector.extract_strided_slice %349 {offsets = [0, 6], sizes = [16, 256], strides = [1, 1]} : vector<16x266xbf16> to vector<16x256xbf16>
    %357 = vector.extract_strided_slice %349 {offsets = [0, 7], sizes = [16, 256], strides = [1, 1]} : vector<16x266xbf16> to vector<16x256xbf16>
    %358 = vector.extract_strided_slice %349 {offsets = [0, 8], sizes = [16, 256], strides = [1, 1]} : vector<16x266xbf16> to vector<16x256xbf16>
    %359 = vector.extract_strided_slice %349 {offsets = [0, 9], sizes = [16, 256], strides = [1, 1]} : vector<16x266xbf16> to vector<16x256xbf16>
    %360 = vector.extract_strided_slice %349 {offsets = [0, 10], sizes = [16, 256], strides = [1, 1]} : vector<16x266xbf16> to vector<16x256xbf16>
    %361 = tpu.concatenate %350, %351, %352, %353, %354, %355, %356, %357, %358, %359, %360 in 0 : vector<16x256xbf16>, vector<16x256xbf16>, vector<16x256xbf16>, vector<16x256xbf16>, vector<16x256xbf16>, vector<16x256xbf16>, vector<16x256xbf16>, vector<16x256xbf16>, vector<16x256xbf16>, vector<16x256xbf16>, vector<16x256xbf16> -> vector<176x256xbf16>
    %c8_110 = arith.constant 8 : index
    %c0_111 = arith.constant 0 : index
    %c0_112 = arith.constant 0 : index
    %362 = vector.load %arg2[%c8_110, %c0_111, %c0_112] : memref<11x16x176xbf16, #tpu.memory_space<vmem>>, vector<1x16x176xbf16>
    %363 = vector.shape_cast %362 : vector<1x16x176xbf16> to vector<16x176xbf16>
    %cst_113 = arith.constant dense<0.000000e+00> : vector<16x256xf32>
    %364 = tpu.matmul %363, %361, %cst_113 {dimension_numbers = #tpu.dot_dimension_numbers<[1], [0], [0], [1], [0, 0, 1, 1], [], []>} : vector<16x176xbf16>, vector<176x256xbf16>, vector<16x256xf32> -> vector<16x256xf32>
    %365 = arith.addf %347, %364 : vector<16x256xf32>
    %c0_114 = arith.constant 0 : index
    %c0_115 = arith.constant 0 : index
    %c490 = arith.constant 490 : index
    %366 = vector.load %arg1[%c0_114, %c0_115, %c490] : memref<1x16x896xbf16, #tpu.memory_space<vmem>>, vector<1x16x266xbf16>
    %367 = vector.shape_cast %366 : vector<1x16x266xbf16> to vector<16x266xbf16>
    %368 = vector.extract_strided_slice %367 {offsets = [0, 0], sizes = [16, 256], strides = [1, 1]} : vector<16x266xbf16> to vector<16x256xbf16>
    %369 = vector.extract_strided_slice %367 {offsets = [0, 1], sizes = [16, 256], strides = [1, 1]} : vector<16x266xbf16> to vector<16x256xbf16>
    %370 = vector.extract_strided_slice %367 {offsets = [0, 2], sizes = [16, 256], strides = [1, 1]} : vector<16x266xbf16> to vector<16x256xbf16>
    %371 = vector.extract_strided_slice %367 {offsets = [0, 3], sizes = [16, 256], strides = [1, 1]} : vector<16x266xbf16> to vector<16x256xbf16>
    %372 = vector.extract_strided_slice %367 {offsets = [0, 4], sizes = [16, 256], strides = [1, 1]} : vector<16x266xbf16> to vector<16x256xbf16>
    %373 = vector.extract_strided_slice %367 {offsets = [0, 5], sizes = [16, 256], strides = [1, 1]} : vector<16x266xbf16> to vector<16x256xbf16>
    %374 = vector.extract_strided_slice %367 {offsets = [0, 6], sizes = [16, 256], strides = [1, 1]} : vector<16x266xbf16> to vector<16x256xbf16>
    %375 = vector.extract_strided_slice %367 {offsets = [0, 7], sizes = [16, 256], strides = [1, 1]} : vector<16x266xbf16> to vector<16x256xbf16>
    %376 = vector.extract_strided_slice %367 {offsets = [0, 8], sizes = [16, 256], strides = [1, 1]} : vector<16x266xbf16> to vector<16x256xbf16>
    %377 = vector.extract_strided_slice %367 {offsets = [0, 9], sizes = [16, 256], strides = [1, 1]} : vector<16x266xbf16> to vector<16x256xbf16>
    %378 = vector.extract_strided_slice %367 {offsets = [0, 10], sizes = [16, 256], strides = [1, 1]} : vector<16x266xbf16> to vector<16x256xbf16>
    %379 = tpu.concatenate %368, %369, %370, %371, %372, %373, %374, %375, %376, %377, %378 in 0 : vector<16x256xbf16>, vector<16x256xbf16>, vector<16x256xbf16>, vector<16x256xbf16>, vector<16x256xbf16>, vector<16x256xbf16>, vector<16x256xbf16>, vector<16x256xbf16>, vector<16x256xbf16>, vector<16x256xbf16>, vector<16x256xbf16> -> vector<176x256xbf16>
    %c9_116 = arith.constant 9 : index
    %c0_117 = arith.constant 0 : index
    %c0_118 = arith.constant 0 : index
    %380 = vector.load %arg2[%c9_116, %c0_117, %c0_118] : memref<11x16x176xbf16, #tpu.memory_space<vmem>>, vector<1x16x176xbf16>
    %381 = vector.shape_cast %380 : vector<1x16x176xbf16> to vector<16x176xbf16>
    %cst_119 = arith.constant dense<0.000000e+00> : vector<16x256xf32>
    %382 = tpu.matmul %381, %379, %cst_119 {dimension_numbers = #tpu.dot_dimension_numbers<[1], [0], [0], [1], [0, 0, 1, 1], [], []>} : vector<16x176xbf16>, vector<176x256xbf16>, vector<16x256xf32> -> vector<16x256xf32>
    %383 = arith.addf %365, %382 : vector<16x256xf32>
    %c0_120 = arith.constant 0 : index
    %c0_121 = arith.constant 0 : index
    %c516 = arith.constant 516 : index
    %384 = vector.load %arg1[%c0_120, %c0_121, %c516] : memref<1x16x896xbf16, #tpu.memory_space<vmem>>, vector<1x16x266xbf16>
    %385 = vector.shape_cast %384 : vector<1x16x266xbf16> to vector<16x266xbf16>
    %386 = vector.extract_strided_slice %385 {offsets = [0, 0], sizes = [16, 256], strides = [1, 1]} : vector<16x266xbf16> to vector<16x256xbf16>
    %387 = vector.extract_strided_slice %385 {offsets = [0, 1], sizes = [16, 256], strides = [1, 1]} : vector<16x266xbf16> to vector<16x256xbf16>
    %388 = vector.extract_strided_slice %385 {offsets = [0, 2], sizes = [16, 256], strides = [1, 1]} : vector<16x266xbf16> to vector<16x256xbf16>
    %389 = vector.extract_strided_slice %385 {offsets = [0, 3], sizes = [16, 256], strides = [1, 1]} : vector<16x266xbf16> to vector<16x256xbf16>
    %390 = vector.extract_strided_slice %385 {offsets = [0, 4], sizes = [16, 256], strides = [1, 1]} : vector<16x266xbf16> to vector<16x256xbf16>
    %391 = vector.extract_strided_slice %385 {offsets = [0, 5], sizes = [16, 256], strides = [1, 1]} : vector<16x266xbf16> to vector<16x256xbf16>
    %392 = vector.extract_strided_slice %385 {offsets = [0, 6], sizes = [16, 256], strides = [1, 1]} : vector<16x266xbf16> to vector<16x256xbf16>
    %393 = vector.extract_strided_slice %385 {offsets = [0, 7], sizes = [16, 256], strides = [1, 1]} : vector<16x266xbf16> to vector<16x256xbf16>
    %394 = vector.extract_strided_slice %385 {offsets = [0, 8], sizes = [16, 256], strides = [1, 1]} : vector<16x266xbf16> to vector<16x256xbf16>
    %395 = vector.extract_strided_slice %385 {offsets = [0, 9], sizes = [16, 256], strides = [1, 1]} : vector<16x266xbf16> to vector<16x256xbf16>
    %396 = vector.extract_strided_slice %385 {offsets = [0, 10], sizes = [16, 256], strides = [1, 1]} : vector<16x266xbf16> to vector<16x256xbf16>
    %397 = tpu.concatenate %386, %387, %388, %389, %390, %391, %392, %393, %394, %395, %396 in 0 : vector<16x256xbf16>, vector<16x256xbf16>, vector<16x256xbf16>, vector<16x256xbf16>, vector<16x256xbf16>, vector<16x256xbf16>, vector<16x256xbf16>, vector<16x256xbf16>, vector<16x256xbf16>, vector<16x256xbf16>, vector<16x256xbf16> -> vector<176x256xbf16>
    %c10_122 = arith.constant 10 : index
    %c0_123 = arith.constant 0 : index
    %c0_124 = arith.constant 0 : index
    %398 = vector.load %arg2[%c10_122, %c0_123, %c0_124] : memref<11x16x176xbf16, #tpu.memory_space<vmem>>, vector<1x16x176xbf16>
    %399 = vector.shape_cast %398 : vector<1x16x176xbf16> to vector<16x176xbf16>
    %cst_125 = arith.constant dense<0.000000e+00> : vector<16x256xf32>
    %400 = tpu.matmul %399, %397, %cst_125 {dimension_numbers = #tpu.dot_dimension_numbers<[1], [0], [0], [1], [0, 0, 1, 1], [], []>} : vector<16x176xbf16>, vector<176x256xbf16>, vector<16x256xf32> -> vector<16x256xf32>
    %401 = arith.addf %383, %400 : vector<16x256xf32>
    %c0_126 = arith.constant 0 : index
    %c0_127 = arith.constant 0 : index
    %c256_128 = arith.constant 256 : index
    %402 = vector.load %arg4[%c0_126, %c0_127, %c256_128] : memref<1x16x512xf32, #tpu.memory_space<vmem>>, vector<1x16x256xf32>
    %403 = vector.shape_cast %402 : vector<1x16x256xf32> to vector<16x256xf32>
    %404 = vector.shape_cast %401 : vector<16x256xf32> to vector<1x16x256xf32>
    tpu.vector_store %arg4[%c0_126, %c0_127, %c256_128], %404 {strides = array<i32>} : memref<1x16x512xf32, #tpu.memory_space<vmem>>, vector<1x16x256xf32>,
    return
  }
  func.func @transform_0(%arg0: i32) -> (i32, i32, i32) {
    %c0_i32 = arith.constant 0 : i32
    %c0_i32_0 = arith.constant 0 : i32
    %c0_i32_1 = arith.constant 0 : i32
    return %arg0, %c0_i32, %c0_i32_0 : i32, i32, i32
  }
  func.func @transform_1(%arg0: i32) -> (i32, i32, i32) {
    %c0_i32 = arith.constant 0 : i32
    %c0_i32_0 = arith.constant 0 : i32
    %c0_i32_1 = arith.constant 0 : i32
    %c0_i32_2 = arith.constant 0 : i32
    return %c0_i32, %c0_i32_0, %c0_i32_1 : i32, i32, i32
  }
  func.func @transform_2(%arg0: i32) -> (i32, i32) {
    %c0_i32 = arith.constant 0 : i32
    %c0_i32_0 = arith.constant 0 : i32
    %c0_i32_1 = arith.constant 0 : i32
    return %c0_i32, %c0_i32_0 : i32, i32
  }
  func.func @transform_3(%arg0: i32) -> (i32, i32, i32) {
    %c0_i32 = arith.constant 0 : i32
    %c0_i32_0 = arith.constant 0 : i32
    %c0_i32_1 = arith.constant 0 : i32
    return %arg0, %c0_i32, %c0_i32_0 : i32, i32, i32
  }
}

</mosaic_0001>

<bundles_post_ra>
// kernel: tpu_custom_call.1
= control target key start
LH: loop header
LB: loop body
LE: loop exit
PB: predicated region body
PF: predicated region fallthrough
CT: control target
= control target key end

     0   :  { %8 = vsyncpa [#allocation3], 0  ;;  %s7843_s0 = inlined_call_operand.hbm [shape: bf16[2,16,896], index: 0, kind: input, shape index: {}]   ;;  %s7844_s1 = inlined_call_operand.hbm [shape: bf16[11,16,176], index: 1, kind: input, shape index: {}]   ;;  %s7845_s2 = inlined_call_operand.vmem [shape: f32[16,1], index: 2, kind: input, shape index: {}]   ;;  %s7846_s3 = inlined_call_operand.hbm [shape: f32[2,16,512], index: 3, kind: output, shape index: {}]  }
   0x1   :  { %10 = vsyncpa [#allocation3 + $0x1], 0 }
   0x2   :  { %11 = vsyncpa [#allocation6], 0 }
   0x3   :  { %12 = vsyncpa [#allocation4], 0 }
   0x4   :  { %14 = vsyncpa [#allocation4 + $0x1], 0  ;;  %s5032_s12 = smov 0   ;;  %s5034_s13 = smov 0  }
   0x5   :  { %s5036_s14 = smov 0   ;;  %s5038_s15 = smov 0  }
   0x6 LB: > { %s5053_s16 = sadd.s32 4294967295, %s4982_s15   ;;  %s4487_s17 = sadd.s32 4294967294, %s4982_s15   ;;  %s4982_s15 = sphi %s5038_s15, %s7907_s15   ;;  %s4978_s14 = sphi %s5036_s14, %s7906_s14   ;;  %s4974_s13 = sphi %s5034_s13, %s7905_s13   ;;  %s4970_s12 = sphi %s5032_s12, %s7904_s12  }
   0x7   : > { %p40_p0 = scmp.ne.s32.totalorder %s4974_s13, %s4970_s12  ;;  %p7847_p1 = scmp.eq.s32.totalorder %s5053_s16, 0 }
   0x8   : > { %p112_p3 = scmp.eq.s32.totalorder %s4487_s17, 1  ;;  %p4488_p5 = scmp.ge.s32.totalorder %s4982_s15, 1 }
   0x9   : > { %p5062_p4 = por %p7847_p1, %p40_p0  ;;  %p119_p7 = scmp.lt.s32.totalorder %s4982_s15, 3 }
   0xa   : > { %p5067_p6 = por %p112_p3, %p40_p0  ;;  %s4984_s21 = smov [#allocation5]  }
   0xb   : > { %s7856_s18 = scalar_select %p5062_p4, 1, 0 }
   0xc   : > { %s7857_s19 = scalar_select %p5067_p6, 1, 0 }
   0xd   : > { %p5072_p8 = pnand %p4488_p5, %p119_p7  ;;  %s131_s22 = sshll.u32 %s4984_s21, 4  ;;  %s5076_s22 = int_to_ptr.vmem [resolvable:$true] %s131_s22 }
   0xe   : > { %s5088_s24 = sadd.s32 1, %s4982_s15   ;;  %s27_s25 = sadd.s32 1, %s4978_s14 }
   0xf   : > { %s7858_s20 = scalar_select %p5072_p8, 1, 0 }
  0x10   : > { %p4684_p9 = pneg %p5072_p8  ;;  %s24_s26 = ssub.s32 %s4982_s15, %s5088_s24 }
  0x11   : > { %s4854_s29 = scalar_lea.hbm %s7844_s1, 2816 }
  0x12   : > { %p5083_p11 = pnand %p4684_p9, %p7847_p1  ;;  %p4855_p12 = scmp.ne.s32.totalorder %s7844_s1, %s4854_s29 }
  0x13   : > { %p4861_p5 = scmp.lt.u32.totalorder %s4854_s29, %s7844_s1 }
  0x14   : > { %p4856_p13 = pneg %p5083_p11 }
  0x16   : > { %p4857_p0 = pnand %p4856_p13, %p4855_p12 }
  0x18   : > { %p4858_p3 = pneg %p4857_p0 }
  0x1a   : > { %p4863_p7 = pnand %p4861_p5, %p4858_p3 }
  0x1c   : > { %4866 = shalt.err (!%p4863_p7)
}
  0x1d   : > { %s4867_s7 = scalar_lea.vmem %s5076_s22, 2816  ;;  %p4875_p2 = scmp.lt.s32.totalorder %s5076_s22, %s5076_s22 }
  0x1e   : > { %p4868_p9 = scmp.ne.s32.totalorder %s5076_s22, %s4867_s7  ;;  %p4876_p6 = scmp.lt.s32.totalorder %s4867_s7, %s4867_s7 }
  0x20   : > { %p4870_p10 = pnand %p4868_p9, %p4856_p13  ;;  %p4877_p4 = por %p4876_p6, %p4875_p2 }
  0x22   : > { %p4871_p1 = pneg %p4870_p10 }
  0x24   : > { %p4878_p8 = pnand %p4877_p4, %p4871_p1 }
  0x26   : > { %4881 = shalt.err (!%p4878_p8)
}
  0x27   : > { %s4985_s8 = smov 128   ;;  %s4986_s9 = smov 8  }
  0x28   : > { %4687 = dma.hbm_to_vmem [thread:$0]  (!%p5083_p11), %s7844_s1, 2816, %s5076_s22, [#allocation6], %s4985_s8, %s4985_s8, %s4986_s9  }
  0x29   : > { %p25_p2 = scmp.eq.s32.totalorder %s24_s26, 0  ;;  %p34_p1 = scmp.ne.s32.totalorder %s4978_s14, %s4974_s13 }
  0x2a   : > { %p35_p4 = scmp.eq.s32.totalorder %s4982_s15, 0  ;;  %p4697_p6 = scmp.lt.s32.totalorder %s4982_s15, 2 }
  0x2b   : > { %s5119_s17 = scalar_select %p25_p2, %s4978_s14, %s27_s25  }
  0x2c   : > { %p36_p8 = por %p35_p4, %p34_p1  ;;  %p7860_p10 = scmp.eq.s32.totalorder %s5053_s16, 1 }
  0x2d   : > { %s148_s27 = sand.u32 1, %s4978_s14   ;;  %s4674_s28 = smul.u32 896, %s4982_s15 }
  0x2e   : > { %p5123_p12 = por %p7860_p10, %p34_p1  ;;  %s4673_s29 = smul.u32 56, %s148_s27 }
  0x2f   : > { %s5132_s4 = scalar_lea.hbm %s7843_s0, %s4674_s28  ;;  %p5134_p11 = pnand %p4697_p6, %p36_p8 }
  0x30   : > { %s152_s25 = scalar_lea.vmem [#allocation2], %s4673_s29  ;;  %s5140_s5 = scalar_lea.sflag [#allocation3], %s148_s27 }
  0x31   : > { %s159_s26 = sshll.u32 %s152_s25, 4  ;;  %s4882_s6 = scalar_lea.hbm %s5132_s4, 896  ;;  %s5138_s26 = int_to_ptr.vmem [resolvable:$true] %s159_s26 }
  0x32   : > { %p4883_p13 = scmp.ne.s32.totalorder %s5132_s4, %s4882_s6  ;;  %p4884_p0 = pneg %p5134_p11 }
  0x33   : > { %s4887_s9 = scalar_lea.hbm %s7843_s0, 1792  ;;  %p4888_p7 = scmp.lt.u32.totalorder %s5132_s4, %s7843_s0 }
  0x34   : > { %p4885_p3 = pnand %p4884_p0, %p4883_p13  ;;  %p4889_p9 = scmp.lt.u32.totalorder %s4887_s9, %s4882_s6 }
  0x35   : > { %p4891_p1 = scmp.lt.u32.totalorder %s4882_s6, %s5132_s4 }
  0x36   : > { %p4886_p5 = pneg %p4885_p3  ;;  %p4890_p2 = por %p4889_p9, %p4888_p7 }
  0x38   : > { %p4892_p4 = por %p4891_p1, %p4890_p2 }
  0x3a   : > { %p4893_p6 = pnand %p4892_p4, %p4886_p5 }
  0x3c   : > { %4896 = shalt.err (!%p4893_p6)
}
  0x3d   : > { %s4897_s27 = scalar_lea.vmem %s5138_s26, 896  ;;  %s4987_s28 = smov [#allocation2]  }
  0x3e   : > { %p4898_p8 = scmp.ne.s32.totalorder %s5138_s26, %s4897_s27  ;;  %s4902_s29 = sshll.u32 %s4987_s28, 4  ;;  %s4903_s29 = int_to_ptr.vmem [resolvable:$false] %s4902_s29 }
  0x3f   : > { %s4904_s23 = scalar_lea.vmem %s4903_s29, 1792  ;;  %p4905_p3 = scmp.lt.s32.totalorder %s5138_s26, %s4903_s29 }
  0x40   : > { %p4900_p10 = pnand %p4898_p8, %p4884_p0  ;;  %p4906_p7 = scmp.lt.s32.totalorder %s4904_s23, %s4897_s27 }
  0x42   : > { %p4901_p13 = pneg %p4900_p10  ;;  %p4907_p9 = por %p4906_p7, %p4905_p3 }
  0x44   : > { %p4908_p2 = pnand %p4907_p9, %p4901_p13 }
  0x46   : > { %4911 = shalt.err (!%p4908_p2)
}
  0x47   : > { %s4988_s30 = smov 448   ;;  %s4989_s25 = smov 28  }
  0x48   : > { %4691 = dma.hbm_to_vmem [thread:$0]  (!%p5134_p11), %s5132_s4, 896, %s5138_s26, %s5140_s5, %s4988_s30, %s4988_s30, %s4989_s25  }
  0x49   : > { %p7863_p0 = scmp.ne.s32.totalorder %s7858_s20, 0 }
  0x4a   : > { %s5171_s6 = sand.u32 (!%p7863_p0), 1, %s4974_s13   ;;  %p7864_p5 = scmp.ne.s32.totalorder (!%p7863_p0), %s7856_s18, 0 }
  0x4b   : > { %171 = sbr.rel (%p7863_p0) target bundleno = 2428 (0x97c), region = 32  ;;  %s174_s8 = scalar_lea.sflag (!%p7863_p0), [#allocation3], %s5171_s6 }
  0x4c   : > { %s4675_s7 = smul.u32 (!%p7863_p0), 56, %s5171_s6 }
  0x4e   : > { %s5175_s9 = scalar_lea.vmem (!%p7863_p0), [#allocation2], %s4675_s7 }
  0x52   : > { %4957 = dma.done.wait (%p7864_p5), %s174_s8, 896  }
  0x53   : > { %4959 = vsyncadd (%p7864_p5), %s174_s8, 4294966400  ;;  %p7865_p11 = scmp.eq.s32.totalorder %s5053_s16, 0 }
  0x55   : > { %4961 = dma.done.wait (%p7865_p11), [#allocation6], 2816   ;;  %p7866_p1 = pmov %p7865_p11 }
  0x56   : > { %v4990_v0 = vmov 0   ;;  %v205_v1 = vld [vmem:[%s7845_s2] sm:$0xff]  ;;  %v206_v4 = vld [vmem:[%s7845_s2 + $0x8] sm:$0xff]  ;;  %s4991_s26 = smov 127   ;;  %s4992_s5 = smov 126   ;;  %vm242_vm0 = vcmask 1039360  }
  0x57   : > { %4963 = vsyncadd (%p7866_p1), [#allocation6], 4294964480  ;;  %4758 = vset.pattern.permute.xlu0 %v4990_v0  ;;  %v5189_v2 = vld [vmem:[%s5175_s9] ss:$28 sps:$4 sm:$0xff]   ;;  %v5202_v5 = vld [vmem:[%s5175_s9 + $0x8] ss:$28 sps:$4 sm:$0xff]  }
  0x58   : > { %209 = vperm.xlu0 %4758, %v205_v1   ;;  %v5192_v3 = vld [vmem:[%s5175_s9 + $0x4] ss:$28 sps:$4 sm:$0xff]   ;;  %236 = vrot.lane.b32.xlu1 %v5189_v2, %s4991_s26  ;;  %s4993_s10 = smov 125   ;;  %s4994_s11 = smov 124   ;;  %vm253_vm1 = vcmask 1031168   ;;  %vm264_vm2 = vcmask 1022976  }
  0x59   : > { %361 = vmatprep.subr.bf16.mxu0 %v5192_v3  ;;  %s4995_s27 = smov 123   ;;  %s4996_s28 = smov 122   ;;  %v4765_v23 = vld [vmem:[#allocation5 + $0x4] ss:$8 sps:$4 sm:$0xff]   ;;  %vm357_vm3 = vcmask 392192   ;;  %vm275_vm4 = vcmask 1014784  }
  0x5a   : > { %362 = vmatpush1.bf16.msra.mxu0 %v5189_v2  ;;  %s4997_s29 = smov 121   ;;  %s4998_s23 = smov 120   ;;  %4500 = vmatprep.mubr.msk.bf16.mxu0 %vm357_vm3, %v4765_v23  ;;  %vm286_vm5 = vcmask 1006592   ;;  %vm297_vm6 = vcmask 998400   ;;  %vm308_vm7 = vcmask 990208   ;;  %vm319_vm8 = vcmask 982016  }
  0x5b   : > { %s4999_s30 = smov 119   ;;  %s5000_s25 = smov 118   ;;  %vm330_vm9 = vcmask 973824   ;;  %vm341_vm10 = vcmask 965632   ;;  %v4763_v59 = vld [vmem:[#allocation5] ss:$8 sps:$4 sm:$0xff]  }
  0x5c   : > { %214 = vperm.xlu0 %4758, %v206_v4   ;;  %238 = vrot.lane.b32.xlu1 %v5192_v3, %s4991_s26  ;;  %s5001_s7 = smov 102   ;;  %vm486_vm11 = vcmask 834560   ;;  %s5002_s8 = smov 76   ;;  %v4766_v1 = vld [vmem:[#allocation5 + $0x14] ss:$8 sps:$4 sm:$0xff]   ;;  %vm659_vm12 = vcmask 621568  }
  0x5d   : > { %s5003_s20 = smov 50   ;;  %s5004_s4 = smov 24   ;;  %vm832_vm13 = vcmask 408576   ;;  %vm7852_vm14 = vcmask 195584   ;;  %vm1439_vm15 = vcmask 818176  }
  0x5e   : > { %s7850_s18 = smov 100   ;;  %s7853_s22 = smov 74  }
  0x60   : > { %240 = vrot.lane.b32.xlu0 %v5202_v5, %s4991_s26  ;;  %247 = vrot.lane.b32.xlu1 %v5189_v2, %s4992_s5 }
  0x64   : > { %249 = vrot.lane.b32.xlu0 %v5192_v3, %s4992_s5  ;;  %251 = vrot.lane.b32.xlu1 %v5202_v5, %s4992_s5 }
  0x68   : > { %258 = vrot.lane.b32.xlu0 %v5189_v2, %s4993_s10  ;;  %260 = vrot.lane.b32.xlu1 %v5192_v3, %s4993_s10 }
  0x6c   : > { %262 = vrot.lane.b32.xlu0 %v5202_v5, %s4993_s10  ;;  %269 = vrot.lane.b32.xlu1 %v5189_v2, %s4994_s11 }
  0x70   : > { %271 = vrot.lane.b32.xlu0 %v5192_v3, %s4994_s11  ;;  %273 = vrot.lane.b32.xlu1 %v5202_v5, %s4994_s11 }
  0x74   : > { %280 = vrot.lane.b32.xlu0 %v5189_v2, %s4995_s27  ;;  %282 = vrot.lane.b32.xlu1 %v5192_v3, %s4995_s27 }
  0x78   : > { %284 = vrot.lane.b32.xlu0 %v5202_v5, %s4995_s27  ;;  %291 = vrot.lane.b32.xlu1 %v5189_v2, %s4996_s28 }
  0x7c   : > { %293 = vrot.lane.b32.xlu0 %v5192_v3, %s4996_s28  ;;  %295 = vrot.lane.b32.xlu1 %v5202_v5, %s4996_s28 }
  0x80   : > { %302 = vrot.lane.b32.xlu0 %v5189_v2, %s4997_s29  ;;  %304 = vrot.lane.b32.xlu1 %v5192_v3, %s4997_s29 }
  0x84   : > { %306 = vrot.lane.b32.xlu0 %v5202_v5, %s4997_s29  ;;  %313 = vrot.lane.b32.xlu1 %v5189_v2, %s4998_s23 }
  0x88   : > { %315 = vrot.lane.b32.xlu0 %v5192_v3, %s4998_s23  ;;  %317 = vrot.lane.b32.xlu1 %v5202_v5, %s4998_s23 }
  0x8c   : > { %324 = vrot.lane.b32.xlu0 %v5189_v2, %s4999_s30  ;;  %326 = vrot.lane.b32.xlu1 %v5192_v3, %s4999_s30 }
  0x90   : > { %328 = vrot.lane.b32.xlu0 %v5202_v5, %s4999_s30  ;;  %335 = vrot.lane.b32.xlu1 %v5189_v2, %s5000_s25 }
  0x94   : > { %337 = vrot.lane.b32.xlu0 %v5192_v3, %s5000_s25  ;;  %339 = vrot.lane.b32.xlu1 %v5202_v5, %s5000_s25 }
  0x98   : > { %420 = vrot.lane.b32.xlu0 %v5189_v2, %s5001_s7  ;;  %422 = vrot.lane.b32.xlu1 %v5192_v3, %s5001_s7 }
  0x9c   : > { %424 = vrot.lane.b32.xlu0 %v5202_v5, %s5001_s7 }
  0xca   : > { %v237_v6 = vpop.permute.xlu1 %236 }
  0xce   : > { %v239_v7 = vpop.permute.xlu1 %238 }
  0xcf   : > { %v5285_v16 = vsel %vm242_vm0, %v237_v6, %v239_v7 }
  0xd2   : > { %v248_v8 = vpop.permute.xlu1 %247 }
  0xd6   : > { %v5270_v10 = vpop.permute.xlu1 %251 }
  0xd7   : > { %v5268_v9 = vpop.permute.xlu0 %209  ;;  %436 = vrot.lane.b32.xlu0 %v5270_v10, %s5001_s7 }
  0xda   : > { %v261_v12 = vpop.permute.xlu1 %260 }
  0xdb   : > { %v5274_v11 = vpop.permute.xlu0 %214 }
  0xde   : > { %v270_v14 = vpop.permute.xlu1 %269 }
  0xdf   : > { %v5276_v13 = vpop.permute.xlu0 %240 }
  0xe0   : > { %430 = vrot.lane.b32.xlu1 %v5276_v13, %s5001_s7  ;;  %v5282_v15 = vsel %vm242_vm0, %v239_v7, %v5276_v13 }
  0xe1   : > { %363 = vmatprep.subr.bf16.mxu0 %v5282_v15 }
  0xe2   : > { %364 = vmatpush1.bf16.msra.mxu0 %v5285_v16  ;;  %v5296_v20 = vpop.permute.xlu1 %273 }
  0xe3   : > { %v250_v17 = vpop.permute.xlu0 %249  ;;  %448 = vrot.lane.b32.xlu0 %v5296_v20, %s5001_s7 }
  0xe4   : > { %v5290_v18 = vsel %vm253_vm1, %v248_v8, %v250_v17  ;;  %v5294_v19 = vsel %vm253_vm1, %v250_v17, %v5270_v10 }
  0xe5   : > { %365 = vmatprep.subr.bf16.mxu0 %v5294_v19 }
  0xe6   : > { %366 = vmatpush1.bf16.msra.mxu0 %v5290_v18  ;;  %v283_v22 = vpop.permute.xlu1 %282 }
  0xe7   : > { %v259_v21 = vpop.permute.xlu0 %258 }
  0xe8   : > { %v5312_v27 = vsel %vm264_vm2, %v259_v21, %v261_v12 }
  0xea   : > { %v292_v25 = vpop.permute.xlu1 %291 }
  0xeb   : > { %v5302_v24 = vpop.permute.xlu0 %262 }
  0xec   : > { %442 = vrot.lane.b32.xlu1 %v5302_v24, %s5001_s7  ;;  %v5308_v26 = vsel %vm264_vm2, %v261_v12, %v5302_v24 }
  0xed   : > { %367 = vmatprep.subr.bf16.mxu0 %v5308_v26 }
  0xee   : > { %368 = vmatpush1.bf16.msra.mxu0 %v5312_v27  ;;  %v5323_v31 = vpop.permute.xlu1 %295 }
  0xef   : > { %v272_v28 = vpop.permute.xlu0 %271  ;;  %460 = vrot.lane.b32.xlu0 %v5323_v31, %s5001_s7 }
  0xf0   : > { %v5317_v29 = vsel %vm275_vm4, %v270_v14, %v272_v28  ;;  %v5321_v30 = vsel %vm275_vm4, %v272_v28, %v5296_v20 }
  0xf1   : > { %369 = vmatprep.subr.bf16.mxu0 %v5321_v30 }
  0xf2   : > { %370 = vmatpush1.bf16.msra.mxu0 %v5317_v29  ;;  %v305_v33 = vpop.permute.xlu1 %304 }
  0xf3   : > { %v281_v32 = vpop.permute.xlu0 %280 }
  0xf4   : > { %v5338_v37 = vsel %vm286_vm5, %v281_v32, %v283_v22 }
  0xf6   : > { %v314_v35 = vpop.permute.xlu1 %313 }
  0xf7   : > { %v5329_v34 = vpop.permute.xlu0 %284 }
  0xf8   : > { %454 = vrot.lane.b32.xlu1 %v5329_v34, %s5001_s7  ;;  %v5335_v36 = vsel %vm286_vm5, %v283_v22, %v5329_v34 }
  0xf9   : > { %371 = vmatprep.subr.bf16.mxu0 %v5335_v36 }
  0xfa   : > { %372 = vmatpush1.bf16.msra.mxu0 %v5338_v37  ;;  %v5349_v41 = vpop.permute.xlu1 %317 }
  0xfb   : > { %v294_v38 = vpop.permute.xlu0 %293  ;;  %472 = vrot.lane.b32.xlu0 %v5349_v41, %s5001_s7 }
  0xfc   : > { %v5343_v39 = vsel %vm297_vm6, %v292_v25, %v294_v38  ;;  %v5347_v40 = vsel %vm297_vm6, %v294_v38, %v5323_v31 }
  0xfd   : > { %373 = vmatprep.subr.bf16.mxu0 %v5347_v40 }
  0xfe   : > { %374 = vmatpush1.bf16.msra.mxu0 %v5343_v39  ;;  %v327_v49 = vpop.permute.xlu1 %326 }
  0xff   : > { %v303_v42 = vpop.permute.xlu0 %302  ;;  %428 = vrot.lane.b32.xlu0 %v5282_v15, %s5001_s7 }
 0x100   : > { %v5366_v45 = vsel %vm308_vm7, %v303_v42, %v305_v33 }
 0x102   : > { %v336_v51 = vpop.permute.xlu1 %335 }
 0x103   : > { %v5357_v43 = vpop.permute.xlu0 %306  ;;  %432 = vrot.lane.b32.xlu0 %v5290_v18, %s5001_s7 }
 0x104   : > { %466 = vrot.lane.b32.xlu1 %v5357_v43, %s5001_s7  ;;  %v5363_v44 = vsel %vm308_vm7, %v305_v33, %v5357_v43 }
 0x105   : > { %375 = vmatprep.subr.bf16.mxu0 %v5363_v44 }
 0x106   : > { %376 = vmatpush1.bf16.msra.mxu0 %v5366_v45  ;;  %v5400_v56 = vpop.permute.xlu1 %339 }
 0x107   : > { %v316_v46 = vpop.permute.xlu0 %315  ;;  %440 = vrot.lane.b32.xlu0 %v5308_v26, %s5001_s7 }
 0x108   : > { %v5373_v47 = vsel %vm319_vm8, %v314_v35, %v316_v46  ;;  %v5377_v48 = vsel %vm319_vm8, %v316_v46, %v5349_v41 }
 0x109   : > { %377 = vmatprep.subr.bf16.mxu0 %v5377_v48 }
 0x10a   : > { %378 = vmatpush1.bf16.msra.mxu0 %v5373_v47  ;;  %v423_v61 = vpop.permute.xlu1 %422 }
 0x10b   : > { %v325_v50 = vpop.permute.xlu0 %324  ;;  %444 = vrot.lane.b32.xlu0 %v5317_v29, %s5001_s7 }
 0x10c   : > { %v5394_v54 = vsel %vm330_vm9, %v325_v50, %v327_v49 }
 0x10f   : > { %v5385_v52 = vpop.permute.xlu0 %328  ;;  %452 = vrot.lane.b32.xlu0 %v5335_v36, %s5001_s7 }
 0x110   : > { %478 = vrot.lane.b32.xlu1 %v5385_v52, %s5001_s7  ;;  %v5391_v53 = vsel %vm330_vm9, %v327_v49, %v5385_v52 }
 0x111   : > { %379 = vmatprep.subr.bf16.mxu0 %v5391_v53 }
 0x112   : > { %380 = vmatpush1.bf16.msra.mxu0 %v5394_v54 }
 0x113   : > { %v338_v55 = vpop.permute.xlu0 %337  ;;  %456 = vrot.lane.b32.xlu0 %v5343_v39, %s5001_s7 }
 0x114   : > { %426 = vrot.lane.b32.xlu1 %v5285_v16, %s5001_s7  ;;  %v5406_v57 = vsel %vm341_vm10, %v338_v55, %v5400_v56  ;;  %v5411_v58 = vsel %vm341_vm10, %v336_v51, %v338_v55 }
 0x115   : > { %381 = vmatprep.subr.bf16.mxu0 %v5406_v57 }
 0x116   : > { %382 = vmatpush1.bf16.msra.mxu0 %v5411_v58 }
 0x117   : > { %v421_v60 = vpop.permute.xlu0 %420  ;;  %464 = vrot.lane.b32.xlu0 %v5363_v44, %s5001_s7 }
 0x118   : > { %434 = vrot.lane.b32.xlu1 %v5294_v19, %s5001_s7  ;;  %v487_v62 = vsel %vm486_vm11, %v421_v60, %v423_v61 }
 0x119   : > { %394 = vmatmul.mubr.bf16.vlgmr.msra.gmra.mrb[0].mxu0 %v4763_v59 }
 0x11a   : > { %4503 = vmatprep.mubr.msk.bf16.mxu0 %vm357_vm3, %v4766_v1 }
 0x11b   : > { %v425_v63 = vpop.permute.xlu0 %424  ;;  %468 = vrot.lane.b32.xlu0 %v5373_v47, %s5001_s7 }
 0x11c   : > { %438 = vrot.lane.b32.xlu1 %v5312_v27, %s5001_s7  ;;  %v488_v0 = vsel %vm486_vm11, %v423_v61, %v425_v63 }
 0x11d   : > { %534 = vmatprep.subr.bf16.mxu0 %v488_v0 }
 0x11e   : > { %535 = vmatpush1.bf16.msra.mxu0 %v487_v62 }
 0x11f   : > { %476 = vrot.lane.b32.xlu0 %v5391_v53, %s5001_s7 }
 0x120   : > { %446 = vrot.lane.b32.xlu1 %v5321_v30, %s5001_s7 }
 0x123   : > { %480 = vrot.lane.b32.xlu0 %v5411_v58, %s5001_s7 }
 0x124   : > { %450 = vrot.lane.b32.xlu1 %v5338_v37, %s5001_s7 }
 0x127   : > { %484 = vrot.lane.b32.xlu0 %v5400_v56, %s5001_s7 }
 0x128   : > { %458 = vrot.lane.b32.xlu1 %v5347_v40, %s5001_s7 }
 0x12b   : > { %595 = vrot.lane.b32.xlu0 %v5192_v3, %s5002_s8 }
 0x12c   : > { %462 = vrot.lane.b32.xlu1 %v5366_v45, %s5001_s7 }
 0x12f   : > { %599 = vrot.lane.b32.xlu0 %v5285_v16, %s5002_s8 }
 0x130   : > { %470 = vrot.lane.b32.xlu1 %v5377_v48, %s5001_s7 }
 0x133   : > { %603 = vrot.lane.b32.xlu0 %v5276_v13, %s5002_s8 }
 0x134   : > { %474 = vrot.lane.b32.xlu1 %v5394_v54, %s5001_s7 }
 0x137   : > { %607 = vrot.lane.b32.xlu0 %v5294_v19, %s5002_s8 }
 0x138   : > { %482 = vrot.lane.b32.xlu1 %v5406_v57, %s5001_s7 }
 0x13b   : > { %611 = vrot.lane.b32.xlu0 %v5312_v27, %s5002_s8 }
 0x13c   : > { %593 = vrot.lane.b32.xlu1 %v5189_v2, %s5002_s8 }
 0x13f   : > { %615 = vrot.lane.b32.xlu0 %v5302_v24, %s5002_s8 }
 0x140   : > { %597 = vrot.lane.b32.xlu1 %v5202_v5, %s5002_s8 }
 0x143   : > { %619 = vrot.lane.b32.xlu0 %v5321_v30, %s5002_s8 }
 0x144   : > { %601 = vrot.lane.b32.xlu1 %v5282_v15, %s5002_s8 }
 0x147   : > { %623 = vrot.lane.b32.xlu0 %v5338_v37, %s5002_s8 }
 0x148   : > { %605 = vrot.lane.b32.xlu1 %v5290_v18, %s5002_s8 }
 0x149   : > { %v437_v4 = vpop.permute.xlu0 %436 }
 0x14b   : > { %627 = vrot.lane.b32.xlu0 %v5329_v34, %s5002_s8 }
 0x14c   : > { %609 = vrot.lane.b32.xlu1 %v5270_v10, %s5002_s8 }
 0x14f   : > { %631 = vrot.lane.b32.xlu0 %v5347_v40, %s5002_s8 }
 0x150   : > { %613 = vrot.lane.b32.xlu1 %v5308_v26, %s5002_s8 }
 0x152   : > { %v431_v12 = vpop.permute.xlu1 %430 }
 0x153   : > { %635 = vrot.lane.b32.xlu0 %v5366_v45, %s5002_s8 }
 0x154   : > { %617 = vrot.lane.b32.xlu1 %v5317_v29, %s5002_s8 }
 0x155   : > { %v449_v6 = vpop.permute.xlu0 %448 }
 0x157   : > { %639 = vrot.lane.b32.xlu0 %v5357_v43, %s5002_s8 }
 0x158   : > { %621 = vrot.lane.b32.xlu1 %v5296_v20, %s5002_s8 }
 0x15b   : > { %643 = vrot.lane.b32.xlu0 %v5377_v48, %s5002_s8 }
 0x15c   : > { %625 = vrot.lane.b32.xlu1 %v5335_v36, %s5002_s8 }
 0x15e   : > { %v443_v21 = vpop.permute.xlu1 %442 }
 0x15f   : > { %647 = vrot.lane.b32.xlu0 %v5394_v54, %s5002_s8 }
 0x160   : > { %629 = vrot.lane.b32.xlu1 %v5343_v39, %s5002_s8 }
 0x161   : > { %v5502_v7 = vpop.permute.xlu0 %460 }
 0x163   : > { %651 = vrot.lane.b32.xlu0 %v5385_v52, %s5002_s8 }
 0x164   : > { %633 = vrot.lane.b32.xlu1 %v5323_v31, %s5002_s8 }
 0x167   : > { %655 = vrot.lane.b32.xlu0 %v5406_v57, %s5002_s8 }
 0x168   : > { %637 = vrot.lane.b32.xlu1 %v5363_v44, %s5002_s8 }
 0x16a   : > { %v455_v23 = vpop.permute.xlu1 %454 }
 0x16b   : > { %766 = vrot.lane.b32.xlu0 %v5189_v2, %s5003_s20 }
 0x16c   : > { %641 = vrot.lane.b32.xlu1 %v5373_v47, %s5002_s8 }
 0x16d   : > { %v5508_v8 = vpop.permute.xlu0 %472 }
 0x16f   : > { %770 = vrot.lane.b32.xlu0 %v5202_v5, %s5003_s20 }
 0x170   : > { %645 = vrot.lane.b32.xlu1 %v5349_v41, %s5002_s8 }
 0x171   : > { %v429_v14 = vpop.permute.xlu0 %428 }
 0x172   : > { %v490_v17 = vsel %vm486_vm11, %v429_v14, %v431_v12 }
 0x173   : > { %774 = vrot.lane.b32.xlu0 %v5282_v15, %s5003_s20  ;;  %536 = vmatprep.subr.bf16.mxu0 %v490_v17 }
 0x174   : > { %649 = vrot.lane.b32.xlu1 %v5391_v53, %s5002_s8 }
 0x175   : > { %v433_v22 = vpop.permute.xlu0 %432 }
 0x176   : > { %v467_v28 = vpop.permute.xlu1 %466 }
 0x177   : > { %778 = vrot.lane.b32.xlu0 %v5290_v18, %s5003_s20 }
 0x178   : > { %653 = vrot.lane.b32.xlu1 %v5411_v58, %s5002_s8 }
 0x179   : > { %v441_v25 = vpop.permute.xlu0 %440 }
 0x17a   : > { %v494_v59 = vsel %vm486_vm11, %v441_v25, %v443_v21 }
 0x17b   : > { %782 = vrot.lane.b32.xlu0 %v5270_v10, %s5003_s20 }
 0x17c   : > { %657 = vrot.lane.b32.xlu1 %v5400_v56, %s5002_s8 }
 0x17d   : > { %v445_v32 = vpop.permute.xlu0 %444 }
 0x17f   : > { %786 = vrot.lane.b32.xlu0 %v5308_v26, %s5003_s20 }
 0x180   : > { %768 = vrot.lane.b32.xlu1 %v5192_v3, %s5003_s20 }
 0x181   : > { %v453_v35 = vpop.permute.xlu0 %452 }
 0x182   : > { %v5531_v33 = vpop.permute.xlu1 %478  ;;  %v498_v12 = vsel %vm486_vm11, %v453_v35, %v455_v23 }
 0x183   : > { %790 = vrot.lane.b32.xlu0 %v5317_v29, %s5003_s20 }
 0x184   : > { %772 = vrot.lane.b32.xlu1 %v5285_v16, %s5003_s20 }
 0x185   : > { %v457_v46 = vpop.permute.xlu0 %456 }
 0x186   : > { %v427_v38 = vpop.permute.xlu1 %426 }
 0x187   : > { %v489_v42 = vsel %vm486_vm11, %v427_v38, %v429_v14  ;;  %794 = vrot.lane.b32.xlu0 %v5296_v20, %s5003_s20 }
 0x188   : > { %776 = vrot.lane.b32.xlu1 %v5276_v13, %s5003_s20  ;;  %537 = vmatpush1.bf16.msra.mxu0 %v489_v42 }
 0x189   : > { %v465_v50 = vpop.permute.xlu0 %464 }
 0x18a   : > { %v435_v49 = vpop.permute.xlu1 %434  ;;  %v502_v23 = vsel %vm486_vm11, %v465_v50, %v467_v28 }
 0x18b   : > { %v492_v51 = vsel %vm486_vm11, %v435_v49, %v437_v4  ;;  %v491_v55 = vsel %vm486_vm11, %v433_v22, %v435_v49  ;;  %798 = vrot.lane.b32.xlu0 %v5335_v36, %s5003_s20 }
 0x18c   : > { %780 = vrot.lane.b32.xlu1 %v5294_v19, %s5003_s20  ;;  %538 = vmatprep.subr.bf16.mxu0 %v492_v51 }
 0x18d   : > { %539 = vmatpush1.bf16.msra.mxu0 %v491_v55  ;;  %v469_v62 = vpop.permute.xlu0 %468 }
 0x18e   : > { %v439_v60 = vpop.permute.xlu1 %438  ;;  %540 = vmatprep.subr.bf16.mxu0 %v494_v59 }
 0x18f   : > { %v493_v61 = vsel %vm486_vm11, %v439_v60, %v441_v25  ;;  %802 = vrot.lane.b32.xlu0 %v5343_v39, %s5003_s20 }
 0x190   : > { %784 = vrot.lane.b32.xlu1 %v5312_v27, %s5003_s20 }
 0x191   : > { %541 = vmatpush1.bf16.msra.mxu0 %v493_v61  ;;  %v477_v0 = vpop.permute.xlu0 %476 }
 0x192   : > { %v447_v63 = vpop.permute.xlu1 %446  ;;  %v506_v28 = vsel %vm486_vm11, %v477_v0, %v5531_v33  ;;  %v4768_v33 = vld [vmem:[#allocation5 + $0x10] ss:$8 sps:$4 sm:$0xff]  }
 0x193   : > { %v496_v1 = vsel %vm486_vm11, %v447_v63, %v449_v6  ;;  %v495_v4 = vsel %vm486_vm11, %v445_v32, %v447_v63  ;;  %806 = vrot.lane.b32.xlu0 %v5323_v31, %s5003_s20  ;;  %v4769_v63 = vld [vmem:[#allocation5 + $0x24] ss:$8 sps:$4 sm:$0xff]  }
 0x194   : > { %788 = vrot.lane.b32.xlu1 %v5302_v24, %s5003_s20  ;;  %542 = vmatprep.subr.bf16.mxu0 %v496_v1 }
 0x195   : > { %543 = vmatpush1.bf16.msra.mxu0 %v495_v4  ;;  %v481_v21 = vpop.permute.xlu0 %480 }
 0x196   : > { %v451_v14 = vpop.permute.xlu1 %450  ;;  %544 = vmatprep.subr.bf16.mxu0 %v498_v12 }
 0x197   : > { %v497_v17 = vsel %vm486_vm11, %v451_v14, %v453_v35  ;;  %810 = vrot.lane.b32.xlu0 %v5363_v44, %s5003_s20 }
 0x198   : > { %792 = vrot.lane.b32.xlu1 %v5321_v30, %s5003_s20 }
 0x199   : > { %545 = vmatpush1.bf16.msra.mxu0 %v497_v17  ;;  %v485_v22 = vpop.permute.xlu0 %484 }
 0x19a   : > { %v459_v6 = vpop.permute.xlu1 %458 }
 0x19b   : > { %v500_v25 = vsel %vm486_vm11, %v459_v6, %v5502_v7  ;;  %v499_v32 = vsel %vm486_vm11, %v457_v46, %v459_v6  ;;  %814 = vrot.lane.b32.xlu0 %v5373_v47, %s5003_s20 }
 0x19c   : > { %796 = vrot.lane.b32.xlu1 %v5338_v37, %s5003_s20  ;;  %546 = vmatprep.subr.bf16.mxu0 %v500_v25 }
 0x19d   : > { %547 = vmatpush1.bf16.msra.mxu0 %v499_v32  ;;  %v596_v42 = vpop.permute.xlu0 %595 }
 0x19e   : > { %v463_v35 = vpop.permute.xlu1 %462  ;;  %548 = vmatprep.subr.bf16.mxu0 %v502_v23 }
 0x19f   : > { %v501_v38 = vsel %vm486_vm11, %v463_v35, %v465_v50  ;;  %818 = vrot.lane.b32.xlu0 %v5349_v41, %s5003_s20 }
 0x1a0   : > { %800 = vrot.lane.b32.xlu1 %v5329_v34, %s5003_s20 }
 0x1a1   : > { %549 = vmatpush1.bf16.msra.mxu0 %v501_v38  ;;  %v600_v46 = vpop.permute.xlu0 %599 }
 0x1a2   : > { %v471_v7 = vpop.permute.xlu1 %470 }
 0x1a3   : > { %v504_v49 = vsel %vm486_vm11, %v471_v7, %v5508_v8  ;;  %v503_v51 = vsel %vm486_vm11, %v469_v62, %v471_v7  ;;  %822 = vrot.lane.b32.xlu0 %v5391_v53, %s5003_s20 }
 0x1a4   : > { %804 = vrot.lane.b32.xlu1 %v5347_v40, %s5003_s20  ;;  %550 = vmatprep.subr.bf16.mxu0 %v504_v49 }
 0x1a5   : > { %551 = vmatpush1.bf16.msra.mxu0 %v503_v51  ;;  %v604_v59 = vpop.permute.xlu0 %603 }
 0x1a6   : > { %v475_v50 = vpop.permute.xlu1 %474  ;;  %552 = vmatprep.subr.bf16.mxu0 %v506_v28 }
 0x1a7   : > { %v505_v55 = vsel %vm486_vm11, %v475_v50, %v477_v0  ;;  %826 = vrot.lane.b32.xlu0 %v5411_v58, %s5003_s20 }
 0x1a8   : > { %808 = vrot.lane.b32.xlu1 %v5366_v45, %s5003_s20 }
 0x1a9   : > { %553 = vmatpush1.bf16.msra.mxu0 %v505_v55  ;;  %v608_v60 = vpop.permute.xlu0 %607 }
 0x1aa   : > { %v483_v8 = vpop.permute.xlu1 %482 }
 0x1ab   : > { %v508_v61 = vsel %vm486_vm11, %v483_v8, %v485_v22  ;;  %v507_v62 = vsel %vm486_vm11, %v481_v21, %v483_v8  ;;  %830 = vrot.lane.b32.xlu0 %v5400_v56, %s5003_s20 }
 0x1ac   : > { %812 = vrot.lane.b32.xlu1 %v5357_v43, %s5003_s20  ;;  %554 = vmatprep.subr.bf16.mxu0 %v508_v61 }
 0x1ad   : > { %555 = vmatpush1.bf16.msra.mxu0 %v507_v62  ;;  %v612_v1 = vpop.permute.xlu0 %611 }
 0x1ae   : > { %v594_v0 = vpop.permute.xlu1 %593 }
 0x1af   : > { %941 = vrot.lane.b32.xlu0 %v5192_v3, %s5004_s4  ;;  %v660_v17 = vsel %vm659_vm12, %v594_v0, %v596_v42 }
 0x1b0   : > { %816 = vrot.lane.b32.xlu1 %v5377_v48, %s5003_s20  ;;  %567 = vmatmul.mubr.bf16.vlgmr.msra.gmra.mrb[0].mxu0 %v4768_v33 }
 0x1b1   : > { %4506 = vmatprep.mubr.msk.bf16.mxu0 %vm357_vm3, %v4769_v63  ;;  %v616_v12 = vpop.permute.xlu0 %615 }
 0x1b2   : > { %v598_v4 = vpop.permute.xlu1 %597 }
 0x1b3   : > { %v661_v14 = vsel %vm659_vm12, %v596_v42, %v598_v4  ;;  %945 = vrot.lane.b32.xlu0 %v5285_v16, %s5004_s4 }
 0x1b4   : > { %820 = vrot.lane.b32.xlu1 %v5394_v54, %s5003_s20  ;;  %707 = vmatprep.subr.bf16.mxu0 %v661_v14 }
 0x1b5   : > { %708 = vmatpush1.bf16.msra.mxu0 %v660_v17  ;;  %v620_v6 = vpop.permute.xlu0 %619 }
 0x1b6   : > { %v602_v21 = vpop.permute.xlu1 %601 }
 0x1b7   : > { %v663_v3 = vsel %vm659_vm12, %v602_v21, %v604_v59  ;;  %v662_v22 = vsel %vm659_vm12, %v600_v46, %v602_v21  ;;  %949 = vrot.lane.b32.xlu0 %v5276_v13, %s5004_s4 }
 0x1b8   : > { %824 = vrot.lane.b32.xlu1 %v5385_v52, %s5003_s20  ;;  %709 = vmatprep.subr.bf16.mxu0 %v663_v3  ;;  %v5704_v3 = vld [vmem:[%s5175_s9 + $0x8] ss:$28 sps:$4 sm:$0xff]  }
 0x1b9   : > { %710 = vmatpush1.bf16.msra.mxu0 %v662_v22  ;;  %v624_v32 = vpop.permute.xlu0 %623 }
 0x1ba   : > { %v606_v25 = vpop.permute.xlu1 %605 }
 0x1bb   : > { %953 = vrot.lane.b32.xlu0 %v5294_v19, %s5004_s4  ;;  %v664_v38 = vsel %vm659_vm12, %v606_v25, %v608_v60 }
 0x1bc   : > { %828 = vrot.lane.b32.xlu1 %v5406_v57, %s5003_s20 }
 0x1bd   : > { %v628_v23 = vpop.permute.xlu0 %627 }
 0x1be   : > { %v610_v16 = vpop.permute.xlu1 %609 }
 0x1bf   : > { %v665_v35 = vsel %vm659_vm12, %v608_v60, %v610_v16  ;;  %957 = vrot.lane.b32.xlu0 %v5312_v27, %s5004_s4 }
 0x1c0   : > { %939 = vrot.lane.b32.xlu1 %v5189_v2, %s5004_s4  ;;  %711 = vmatprep.subr.bf16.mxu0 %v665_v35 }
 0x1c1   : > { %712 = vmatpush1.bf16.msra.mxu0 %v664_v38  ;;  %v632_v42 = vpop.permute.xlu0 %631 }
 0x1c2   : > { %v614_v13 = vpop.permute.xlu1 %613 }
 0x1c3   : > { %v667_v7 = vsel %vm659_vm12, %v614_v13, %v616_v12  ;;  %v666_v19 = vsel %vm659_vm12, %v612_v1, %v614_v13  ;;  %961 = vrot.lane.b32.xlu0 %v5302_v24, %s5004_s4  ;;  %v4776_v12 = vld [vmem:[#allocation5 + $0x34] ss:$8 sps:$4 sm:$0xff]  }
 0x1c4   : > { %943 = vrot.lane.b32.xlu1 %v5202_v5, %s5004_s4  ;;  %713 = vmatprep.subr.bf16.mxu0 %v667_v7 }
 0x1c5   : > { %714 = vmatpush1.bf16.msra.mxu0 %v666_v19  ;;  %v636_v46 = vpop.permute.xlu0 %635 }
 0x1c6   : > { %v618_v2 = vpop.permute.xlu1 %617 }
 0x1c7   : > { %965 = vrot.lane.b32.xlu0 %v5321_v30, %s5004_s4  ;;  %v668_v28 = vsel %vm659_vm12, %v618_v2, %v620_v6 }
 0x1c8   : > { %947 = vrot.lane.b32.xlu1 %v5282_v15, %s5004_s4 }
 0x1c9   : > { %v640_v49 = vpop.permute.xlu0 %639 }
 0x1ca   : > { %v622_v27 = vpop.permute.xlu1 %621 }
 0x1cb   : > { %v669_v51 = vsel %vm659_vm12, %v620_v6, %v622_v27  ;;  %969 = vrot.lane.b32.xlu0 %v5338_v37, %s5004_s4 }
 0x1cc   : > { %951 = vrot.lane.b32.xlu1 %v5290_v18, %s5004_s4  ;;  %715 = vmatprep.subr.bf16.mxu0 %v669_v51 }
 0x1cd   : > { %716 = vmatpush1.bf16.msra.mxu0 %v668_v28  ;;  %v644_v24 = vpop.permute.xlu0 %643 }
 0x1ce   : > { %v626_v5 = vpop.permute.xlu1 %625 }
 0x1cf   : > { %v671_v15 = vsel %vm659_vm12, %v626_v5, %v628_v23  ;;  %v670_v30 = vsel %vm659_vm12, %v624_v32, %v626_v5  ;;  %973 = vrot.lane.b32.xlu0 %v5329_v34, %s5004_s4 }
 0x1d0   : > { %955 = vrot.lane.b32.xlu1 %v5270_v10, %s5004_s4  ;;  %717 = vmatprep.subr.bf16.mxu0 %v671_v15 }
 0x1d1   : > { %718 = vmatpush1.bf16.msra.mxu0 %v670_v30  ;;  %v648_v50 = vpop.permute.xlu0 %647 }
 0x1d2   : > { %v630_v18 = vpop.permute.xlu1 %629 }
 0x1d3   : > { %977 = vrot.lane.b32.xlu0 %v5347_v40, %s5004_s4  ;;  %v672_v8 = vsel %vm659_vm12, %v630_v18, %v632_v42 }
 0x1d4   : > { %959 = vrot.lane.b32.xlu1 %v5308_v26, %s5004_s4 }
 0x1d5   : > { %v652_v55 = vpop.permute.xlu0 %651 }
 0x1d6   : > { %v634_v37 = vpop.permute.xlu1 %633 }
 0x1d7   : > { %v673_v59 = vsel %vm659_vm12, %v632_v42, %v634_v37  ;;  %981 = vrot.lane.b32.xlu0 %v5366_v45, %s5004_s4 }
 0x1d8   : > { %963 = vrot.lane.b32.xlu1 %v5317_v29, %s5004_s4  ;;  %719 = vmatprep.subr.bf16.mxu0 %v673_v59 }
 0x1d9   : > { %720 = vmatpush1.bf16.msra.mxu0 %v672_v8  ;;  %v656_v34 = vpop.permute.xlu0 %655 }
 0x1da   : > { %v638_v10 = vpop.permute.xlu1 %637 }
 0x1db   : > { %v675_v26 = vsel %vm659_vm12, %v638_v10, %v640_v49  ;;  %v674_v40 = vsel %vm659_vm12, %v636_v46, %v638_v10  ;;  %985 = vrot.lane.b32.xlu0 %v5357_v43, %s5004_s4 }
 0x1dc   : > { %967 = vrot.lane.b32.xlu1 %v5296_v20, %s5004_s4  ;;  %721 = vmatprep.subr.bf16.mxu0 %v675_v26 }
 0x1dd   : > { %722 = vmatpush1.bf16.msra.mxu0 %v674_v40  ;;  %v767_v60 = vpop.permute.xlu0 %766 }
 0x1de   : > { %v642_v29 = vpop.permute.xlu1 %641 }
 0x1df   : > { %989 = vrot.lane.b32.xlu0 %v5377_v48, %s5004_s4  ;;  %v676_v33 = vsel %vm659_vm12, %v642_v29, %v644_v24 }
 0x1e0   : > { %971 = vrot.lane.b32.xlu1 %v5335_v36, %s5004_s4 }
 0x1e1   : > { %v771_v61 = vpop.permute.xlu0 %770 }
 0x1e2   : > { %v646_v45 = vpop.permute.xlu1 %645 }
 0x1e3   : > { %v677_v62 = vsel %vm659_vm12, %v644_v24, %v646_v45  ;;  %993 = vrot.lane.b32.xlu0 %v5394_v54, %s5004_s4  ;;  %v5685_v54 = vld [vmem:[%s5175_s9 + $0x4] ss:$28 sps:$4 sm:$0xff]  }
 0x1e4   : > { %975 = vrot.lane.b32.xlu1 %v5343_v39, %s5004_s4  ;;  %723 = vmatprep.subr.bf16.mxu0 %v677_v62 }
 0x1e5   : > { %724 = vmatpush1.bf16.msra.mxu0 %v676_v33  ;;  %v775_v36 = vpop.permute.xlu0 %774 }
 0x1e6   : > { %v650_v20 = vpop.permute.xlu1 %649 }
 0x1e7   : > { %v679_v43 = vsel %vm659_vm12, %v650_v20, %v652_v55  ;;  %v678_v48 = vsel %vm659_vm12, %v648_v50, %v650_v20  ;;  %997 = vrot.lane.b32.xlu0 %v5385_v52, %s5004_s4  ;;  %v4771_v52 = vld [vmem:[#allocation5 + $0x20] ss:$8 sps:$4 sm:$0xff]  }
 0x1e8   : > { %979 = vrot.lane.b32.xlu1 %v5323_v31, %s5004_s4  ;;  %725 = vmatprep.subr.bf16.mxu0 %v679_v43 }
 0x1e9   : > { %726 = vmatpush1.bf16.msra.mxu0 %v678_v48  ;;  %v779_v63 = vpop.permute.xlu0 %778 }
 0x1ea   : > { %v654_v39 = vpop.permute.xlu1 %653 }
 0x1eb   : > { %1001 = vrot.lane.b32.xlu0 %v5406_v57, %s5004_s4  ;;  %v680_v4 = vsel %vm659_vm12, %v654_v39, %v656_v34 }
 0x1ec   : > { %983 = vrot.lane.b32.xlu1 %v5363_v44, %s5004_s4  ;;  %v5694_v44 = vld [vmem:[%s5175_s9 + $0xc] ss:$28 sps:$4 sm:$0xff]  }
 0x1ed   : > { %v783_v1 = vpop.permute.xlu0 %782 }
 0x1ee   : > { %v658_v0 = vpop.permute.xlu1 %657 }
 0x1ef   : > { %v681_v31 = vsel %vm659_vm12, %v656_v34, %v658_v0  ;;  %1117 = vrot.lane.b32.xlu0 %v5685_v54, %s4991_s26 }
 0x1f0   : > { %987 = vrot.lane.b32.xlu1 %v5373_v47, %s5004_s4  ;;  %727 = vmatprep.subr.bf16.mxu0 %v681_v31  ;;  %v4779_v31 = vld [vmem:[#allocation5 + $0x44] ss:$8 sps:$4 sm:$0xff]  }
 0x1f1   : > { %728 = vmatpush1.bf16.msra.mxu0 %v680_v4  ;;  %v787_v14 = vpop.permute.xlu0 %786 }
 0x1f2   : > { %v769_v57 = vpop.permute.xlu1 %768 }
 0x1f3   : > { %v834_v17 = vsel %vm832_vm13, %v769_v57, %v771_v61  ;;  %v833_v21 = vsel %vm832_vm13, %v767_v60, %v769_v57  ;;  %1121 = vrot.lane.b32.xlu0 %v5694_v44, %s4991_s26 }
 0x1f4   : > { %991 = vrot.lane.b32.xlu1 %v5349_v41, %s5004_s4  ;;  %880 = vmatprep.subr.bf16.mxu0 %v834_v17 }
 0x1f5   : > { %740 = vmatmul.mubr.bf16.vlgmr.msra.gmra.mrb[0].mxu0 %v4771_v52  ;;  %v791_v6 = vpop.permute.xlu0 %790 }
 0x1f6   : > { %881 = vmatpush1.bf16.msra.mxu0 %v833_v21  ;;  %v773_v47 = vpop.permute.xlu1 %772  ;;  %4509 = vmatprep.mubr.msk.bf16.mxu0 %vm357_vm3, %v4776_v12 }
 0x1f7   : > { %1127 = vrot.lane.b32.xlu0 %v5704_v3, %s4992_s5  ;;  %v835_v32 = vsel %vm832_vm13, %v773_v47, %v775_v36 }
 0x1f8   : > { %995 = vrot.lane.b32.xlu1 %v5391_v53, %s5004_s4 }
 0x1f9   : > { %v795_v41 = vpop.permute.xlu0 %794 }
 0x1fa   : > { %v777_v22 = vpop.permute.xlu1 %776 }
 0x1fb   : > { %v836_v25 = vsel %vm832_vm13, %v775_v36, %v777_v22  ;;  %1133 = vrot.lane.b32.xlu0 %v5685_v54, %s4993_s10 }
 0x1fc   : > { %999 = vrot.lane.b32.xlu1 %v5411_v58, %s5004_s4  ;;  %882 = vmatprep.subr.bf16.mxu0 %v836_v25 }
 0x1fd   : > { %883 = vmatpush1.bf16.msra.mxu0 %v835_v32  ;;  %v799_v23 = vpop.permute.xlu0 %798 }
 0x1fe   : > { %v781_v16 = vpop.permute.xlu1 %780 }
 0x1ff   : > { %v838_v53 = vsel %vm832_vm13, %v781_v16, %v783_v1  ;;  %v837_v35 = vsel %vm832_vm13, %v779_v63, %v781_v16  ;;  %1137 = vrot.lane.b32.xlu0 %v5694_v44, %s4993_s10  ;;  %v4778_v1 = vld [vmem:[#allocation5 + $0x30] ss:$8 sps:$4 sm:$0xff]  }
 0x200   : > { %1003 = vrot.lane.b32.xlu1 %v5400_v56, %s5004_s4  ;;  %884 = vmatprep.subr.bf16.mxu0 %v838_v53 }
 0x201   : > { %885 = vmatpush1.bf16.msra.mxu0 %v837_v35  ;;  %v803_v38 = vpop.permute.xlu0 %802 }
 0x202   : > { %v785_v58 = vpop.permute.xlu1 %784 }
 0x203   : > { %1143 = vrot.lane.b32.xlu0 %v5704_v3, %s4994_s11  ;;  %v839_v19 = vsel %vm832_vm13, %v785_v58, %v787_v14 }
 0x204   : > { %1119 = vrot.lane.b32.xlu1 %v5704_v3, %s4991_s26 }
 0x205   : > { %v807_v42 = vpop.permute.xlu0 %806 }
 0x206   : > { %v789_v13 = vpop.permute.xlu1 %788 }
 0x207   : > { %v840_v7 = vsel %vm832_vm13, %v787_v14, %v789_v13  ;;  %1149 = vrot.lane.b32.xlu0 %v5685_v54, %s4995_s27 }
 0x208   : > { %1125 = vrot.lane.b32.xlu1 %v5685_v54, %s4992_s5  ;;  %886 = vmatprep.subr.bf16.mxu0 %v840_v7 }
 0x209   : > { %887 = vmatpush1.bf16.msra.mxu0 %v839_v19  ;;  %v811_v2 = vpop.permute.xlu0 %810 }
 0x20a   : > { %v793_v56 = vpop.permute.xlu1 %792 }
 0x20b   : > { %v842_v46 = vsel %vm832_vm13, %v793_v56, %v795_v41  ;;  %v841_v27 = vsel %vm832_vm13, %v791_v6, %v793_v56  ;;  %1153 = vrot.lane.b32.xlu0 %v5694_v44, %s4995_s27 }
 0x20c   : > { %1129 = vrot.lane.b32.xlu1 %v5694_v44, %s4992_s5  ;;  %888 = vmatprep.subr.bf16.mxu0 %v842_v46 }
 0x20d   : > { %889 = vmatpush1.bf16.msra.mxu0 %v841_v27  ;;  %v815_v51 = vpop.permute.xlu0 %814 }
 0x20e   : > { %v797_v49 = vpop.permute.xlu1 %796 }
 0x20f   : > { %1159 = vrot.lane.b32.xlu0 %v5704_v3, %s4996_s28  ;;  %v843_v15 = vsel %vm832_vm13, %v797_v49, %v799_v23 }
 0x210   : > { %1135 = vrot.lane.b32.xlu1 %v5704_v3, %s4993_s10 }
 0x211   : > { %v819_v5 = vpop.permute.xlu0 %818 }
 0x212   : > { %v801_v28 = vpop.permute.xlu1 %800 }
 0x213   : > { %v844_v24 = vsel %vm832_vm13, %v799_v23, %v801_v28  ;;  %1165 = vrot.lane.b32.xlu0 %v5685_v54, %s4997_s29 }
 0x214   : > { %1141 = vrot.lane.b32.xlu1 %v5685_v54, %s4994_s11  ;;  %890 = vmatprep.subr.bf16.mxu0 %v844_v24 }
 0x215   : > { %891 = vmatpush1.bf16.msra.mxu0 %v843_v15  ;;  %v823_v18 = vpop.permute.xlu0 %822 }
 0x216   : > { %v805_v30 = vpop.permute.xlu1 %804 }
 0x217   : > { %v846_v50 = vsel %vm832_vm13, %v805_v30, %v807_v42  ;;  %v845_v37 = vsel %vm832_vm13, %v803_v38, %v805_v30  ;;  %1169 = vrot.lane.b32.xlu0 %v5694_v44, %s4997_s29 }
 0x218   : > { %1145 = vrot.lane.b32.xlu1 %v5694_v44, %s4994_s11  ;;  %892 = vmatprep.subr.bf16.mxu0 %v846_v50 }
 0x219   : > { %893 = vmatpush1.bf16.msra.mxu0 %v845_v37  ;;  %v827_v59 = vpop.permute.xlu0 %826 }
 0x21a   : > { %v809_v55 = vpop.permute.xlu1 %808 }
 0x21b   : > { %1175 = vrot.lane.b32.xlu0 %v5704_v3, %s4998_s23  ;;  %v847_v26 = vsel %vm832_vm13, %v809_v55, %v811_v2 }
 0x21c   : > { %1151 = vrot.lane.b32.xlu1 %v5704_v3, %s4995_s27 }
 0x21d   : > { %v831_v10 = vpop.permute.xlu0 %830 }
 0x21e   : > { %v813_v8 = vpop.permute.xlu1 %812 }
 0x21f   : > { %v848_v34 = vsel %vm832_vm13, %v811_v2, %v813_v8  ;;  %1181 = vrot.lane.b32.xlu0 %v5685_v54, %s4999_s30 }
 0x220   : > { %1157 = vrot.lane.b32.xlu1 %v5685_v54, %s4996_s28  ;;  %894 = vmatprep.subr.bf16.mxu0 %v848_v34 }
 0x221   : > { %895 = vmatpush1.bf16.msra.mxu0 %v847_v26  ;;  %v942_v29 = vpop.permute.xlu0 %941 }
 0x222   : > { %v817_v40 = vpop.permute.xlu1 %816 }
 0x223   : > { %v850_v60 = vsel %vm832_vm13, %v817_v40, %v819_v5  ;;  %v849_v45 = vsel %vm832_vm13, %v815_v51, %v817_v40  ;;  %1185 = vrot.lane.b32.xlu0 %v5694_v44, %s4999_s30 }
 0x224   : > { %1161 = vrot.lane.b32.xlu1 %v5694_v44, %s4996_s28  ;;  %896 = vmatprep.subr.bf16.mxu0 %v850_v60 }
 0x225   : > { %897 = vmatpush1.bf16.msra.mxu0 %v849_v45  ;;  %v946_v62 = vpop.permute.xlu0 %945 }
 0x226   : > { %v821_v61 = vpop.permute.xlu1 %820 }
 0x227   : > { %1191 = vrot.lane.b32.xlu0 %v5704_v3, %s5000_s25  ;;  %v851_v43 = vsel %vm832_vm13, %v821_v61, %v823_v18 }
 0x228   : > { %1167 = vrot.lane.b32.xlu1 %v5704_v3, %s4997_s29 }
 0x229   : > { %v950_v20 = vpop.permute.xlu0 %949 }
 0x22a   : > { %v825_v33 = vpop.permute.xlu1 %824 }
 0x22b   : > { %v852_v36 = vsel %vm832_vm13, %v823_v18, %v825_v33 }
 0x22c   : > { %1173 = vrot.lane.b32.xlu1 %v5685_v54, %s4998_s23  ;;  %898 = vmatprep.subr.bf16.mxu0 %v852_v36 }
 0x22d   : > { %899 = vmatpush1.bf16.msra.mxu0 %v851_v43  ;;  %v954_v39 = vpop.permute.xlu0 %953 }
 0x22e   : > { %v829_v48 = vpop.permute.xlu1 %828 }
 0x22f   : > { %v854_v63 = vsel %vm832_vm13, %v829_v48, %v831_v10  ;;  %v853_v0 = vsel %vm832_vm13, %v827_v59, %v829_v48 }
 0x230   : > { %1177 = vrot.lane.b32.xlu1 %v5694_v44, %s4998_s23  ;;  %900 = vmatprep.subr.bf16.mxu0 %v854_v63 }
 0x231   : > { %901 = vmatpush1.bf16.msra.mxu0 %v853_v0  ;;  %v958_v52 = vpop.permute.xlu0 %957  ;;  %v4781_v0 = vld [vmem:[#allocation5 + $0x40] ss:$8 sps:$4 sm:$0xff]  }
 0x232   : > { %v940_v4 = vpop.permute.xlu1 %939 }
 0x233   : > { %v1006_v17 = vsel %vm7852_vm14, %v940_v4, %v942_v29 }
 0x234   : > { %1183 = vrot.lane.b32.xlu1 %v5704_v3, %s4999_s30  ;;  %913 = vmatmul.mubr.bf16.vlgmr.msra.gmra.mrb[0].mxu0 %v4778_v1 }
 0x235   : > { %4512 = vmatprep.mubr.msk.bf16.mxu0 %vm357_vm3, %v4779_v31  ;;  %v962_v12 = vpop.permute.xlu0 %961 }
 0x236   : > { %v944_v57 = vpop.permute.xlu1 %943 }
 0x237   : > { %v1007_v14 = vsel %vm7852_vm14, %v942_v29, %v944_v57 }
 0x238   : > { %1189 = vrot.lane.b32.xlu1 %v5685_v54, %s5000_s25  ;;  %1053 = vmatprep.subr.bf16.mxu0 %v1007_v14 }
 0x239   : > { %1054 = vmatpush1.bf16.msra.mxu0 %v1006_v17  ;;  %v966_v47 = vpop.permute.xlu0 %965 }
 0x23a   : > { %v948_v21 = vpop.permute.xlu1 %947 }
 0x23b   : > { %v1009_v6 = vsel %vm7852_vm14, %v948_v21, %v950_v20  ;;  %v1008_v22 = vsel %vm7852_vm14, %v946_v62, %v948_v21 }
 0x23c   : > { %1193 = vrot.lane.b32.xlu1 %v5694_v44, %s5000_s25  ;;  %1055 = vmatprep.subr.bf16.mxu0 %v1009_v6 }
 0x23d   : > { %1056 = vmatpush1.bf16.msra.mxu0 %v1008_v22  ;;  %v970_v25 = vpop.permute.xlu0 %969 }
 0x23e   : > { %v952_v41 = vpop.permute.xlu1 %951 }
 0x23f   : > { %v1010_v53 = vsel %vm7852_vm14, %v952_v41, %v954_v39 }
 0x241   : > { %v974_v16 = vpop.permute.xlu0 %973 }
 0x242   : > { %v956_v32 = vpop.permute.xlu1 %955 }
 0x243   : > { %v1011_v23 = vsel %vm7852_vm14, %v954_v39, %v956_v32 }
 0x244   : > { %1057 = vmatprep.subr.bf16.mxu0 %v1011_v23 }
 0x245   : > { %1058 = vmatpush1.bf16.msra.mxu0 %v1010_v53  ;;  %v978_v58 = vpop.permute.xlu0 %977 }
 0x246   : > { %v960_v35 = vpop.permute.xlu1 %959 }
 0x247   : > { %v1013_v38 = vsel %vm7852_vm14, %v960_v35, %v962_v12  ;;  %v1012_v13 = vsel %vm7852_vm14, %v958_v52, %v960_v35 }
 0x248   : > { %1059 = vmatprep.subr.bf16.mxu0 %v1013_v38 }
 0x249   : > { %1060 = vmatpush1.bf16.msra.mxu0 %v1012_v13  ;;  %v982_v7 = vpop.permute.xlu0 %981 }
 0x24a   : > { %v964_v42 = vpop.permute.xlu1 %963 }
 0x24b   : > { %v1014_v46 = vsel %vm7852_vm14, %v964_v42, %v966_v47 }
 0x24d   : > { %v986_v56 = vpop.permute.xlu0 %985 }
 0x24e   : > { %v968_v19 = vpop.permute.xlu1 %967 }
 0x24f   : > { %v1015_v2 = vsel %vm7852_vm14, %v966_v47, %v968_v19 }
 0x250   : > { %1061 = vmatprep.subr.bf16.mxu0 %v1015_v2 }
 0x251   : > { %1062 = vmatpush1.bf16.msra.mxu0 %v1014_v46  ;;  %v990_v49 = vpop.permute.xlu0 %989 }
 0x252   : > { %v972_v27 = vpop.permute.xlu1 %971 }
 0x253   : > { %v1017_v51 = vsel %vm7852_vm14, %v972_v27, %v974_v16  ;;  %v1016_v28 = vsel %vm7852_vm14, %v970_v25, %v972_v27 }
 0x254   : > { %1063 = vmatprep.subr.bf16.mxu0 %v1017_v51 }
 0x255   : > { %1064 = vmatpush1.bf16.msra.mxu0 %v1016_v28  ;;  %v994_v24 = vpop.permute.xlu0 %993 }
 0x256   : > { %v976_v5 = vpop.permute.xlu1 %975 }
 0x257   : > { %v1018_v50 = vsel %vm7852_vm14, %v976_v5, %v978_v58 }
 0x259   : > { %v998_v30 = vpop.permute.xlu0 %997 }
 0x25a   : > { %v980_v15 = vpop.permute.xlu1 %979 }
 0x25b   : > { %v1019_v18 = vsel %vm7852_vm14, %v978_v58, %v980_v15 }
 0x25c   : > { %1065 = vmatprep.subr.bf16.mxu0 %v1019_v18 }
 0x25d   : > { %1066 = vmatpush1.bf16.msra.mxu0 %v1018_v50  ;;  %v1002_v55 = vpop.permute.xlu0 %1001 }
 0x25e   : > { %v984_v37 = vpop.permute.xlu1 %983 }
 0x25f   : > { %v1021_v59 = vsel %vm7852_vm14, %v984_v37, %v986_v56  ;;  %v1020_v8 = vsel %vm7852_vm14, %v982_v7, %v984_v37 }
 0x260   : > { %1067 = vmatprep.subr.bf16.mxu0 %v1021_v59 }
 0x261   : > { %1068 = vmatpush1.bf16.msra.mxu0 %v1020_v8  ;;  %v1118_v34 = vpop.permute.xlu0 %1117 }
 0x262   : > { %v988_v10 = vpop.permute.xlu1 %987 }
 0x263   : > { %v1022_v60 = vsel %vm7852_vm14, %v988_v10, %v990_v49 }
 0x265   : > { %v5806_v29 = vpop.permute.xlu0 %1121 }
 0x266   : > { %v992_v26 = vpop.permute.xlu1 %991 }
 0x267   : > { %v1023_v40 = vsel %vm7852_vm14, %v990_v49, %v992_v26 }
 0x268   : > { %1069 = vmatprep.subr.bf16.mxu0 %v1023_v40 }
 0x269   : > { %1070 = vmatpush1.bf16.msra.mxu0 %v1022_v60  ;;  %v1128_v33 = vpop.permute.xlu0 %1127 }
 0x26a   : > { %v996_v45 = vpop.permute.xlu1 %995 }
 0x26b   : > { %v1025_v61 = vsel %vm7852_vm14, %v996_v45, %v998_v30  ;;  %v1024_v62 = vsel %vm7852_vm14, %v994_v24, %v996_v45 }
 0x26c   : > { %1071 = vmatprep.subr.bf16.mxu0 %v1025_v61 }
 0x26d   : > { %1072 = vmatpush1.bf16.msra.mxu0 %v1024_v62  ;;  %v1134_v36 = vpop.permute.xlu0 %1133 }
 0x26e   : > { %v1000_v20 = vpop.permute.xlu1 %999 }
 0x26f   : > { %v1026_v63 = vsel %vm7852_vm14, %v1000_v20, %v1002_v55 }
 0x271   : > { %v5812_v39 = vpop.permute.xlu0 %1137 }
 0x272   : > { %v1004_v43 = vpop.permute.xlu1 %1003 }
 0x273   : > { %v1027_v48 = vsel %vm7852_vm14, %v1002_v55, %v1004_v43  ;;  %vm7855_vm14 = vcmask 605184  }
 0x274   : > { %1073 = vmatprep.subr.bf16.mxu0 %v1027_v48 }
 0x275   : > { %1074 = vmatpush1.bf16.msra.mxu0 %v1026_v63  ;;  %v1144_v52 = vpop.permute.xlu0 %1143 }
 0x276   : > { %v1120_v1 = vpop.permute.xlu1 %1119 }
 0x277   : > { %v5816_v31 = vsel %vm242_vm0, %v1118_v34, %v1120_v1  ;;  %v5820_v4 = vsel %vm242_vm0, %v1120_v1, %v5806_v29  ;;  %v4782_v34 = vld [vmem:[#allocation5 + $0x54] ss:$8 sps:$4 sm:$0xff]  }
 0x278   : > { %1209 = vrot.lane.b32.xlu0 %v5816_v31, %s4992_s5  ;;  %1211 = vrot.lane.b32.xlu1 %v5820_v4, %s4992_s5 }
 0x279   : > { %1086 = vmatmul.mubr.bf16.vlgmr.msra.gmra.mrb[0].mxu0 %v4781_v0  ;;  %v1150_v14 = vpop.permute.xlu0 %1149 }
 0x27a   : > { %v1126_v57 = vpop.permute.xlu1 %1125  ;;  %4518 = vmatprep.mubr.msk.bf16.mxu0 %vm357_vm3, %v4782_v34 }
 0x27b   : > { %v5827_v12 = vsel %vm253_vm1, %v1126_v57, %v1128_v33 }
 0x27c   : > { %1213 = vrot.lane.b32.xlu0 %v5806_v29, %s4992_s5  ;;  %1215 = vrot.lane.b32.xlu1 %v5827_v12, %s4992_s5 }
 0x27d   : > { %v5839_v47 = vpop.permute.xlu0 %1153 }
 0x27e   : > { %v5833_v17 = vpop.permute.xlu1 %1129 }
 0x27f   : > { %v5837_v21 = vsel %vm253_vm1, %v1128_v33, %v5833_v17 }
 0x280   : > { %1217 = vrot.lane.b32.xlu0 %v5837_v21, %s4992_s5  ;;  %1314 = vmatprep.subr.bf16.mxu0 %v5837_v21 }
 0x281   : > { %1219 = vrot.lane.b32.xlu1 %v5833_v17, %s4992_s5  ;;  %1315 = vmatpush1.bf16.msra.mxu0 %v5827_v12  ;;  %v1160_v25 = vpop.permute.xlu0 %1159 }
 0x282   : > { %v1136_v6 = vpop.permute.xlu1 %1135 }
 0x283   : > { %v5848_v22 = vsel %vm264_vm2, %v1134_v36, %v1136_v6  ;;  %v5852_v41 = vsel %vm264_vm2, %v1136_v6, %v5812_v39 }
 0x284   : > { %1221 = vrot.lane.b32.xlu0 %v5848_v22, %s4992_s5 }
 0x285   : > { %1223 = vrot.lane.b32.xlu1 %v5852_v41, %s4992_s5  ;;  %v1166_v53 = vpop.permute.xlu0 %1165 }
 0x286   : > { %v1142_v32 = vpop.permute.xlu1 %1141 }
 0x287   : > { %v5859_v16 = vsel %vm275_vm4, %v1142_v32, %v1144_v52 }
 0x288   : > { %1225 = vrot.lane.b32.xlu0 %v5812_v39, %s4992_s5 }
 0x289   : > { %1227 = vrot.lane.b32.xlu1 %v5859_v16, %s4992_s5  ;;  %v5884_v42 = vpop.permute.xlu0 %1169 }
 0x28a   : > { %v5865_v23 = vpop.permute.xlu1 %1145 }
 0x28b   : > { %v5869_v35 = vsel %vm275_vm4, %v1144_v52, %v5865_v23 }
 0x28c   : > { %1229 = vrot.lane.b32.xlu0 %v5869_v35, %s4992_s5 }
 0x28d   : > { %1231 = vrot.lane.b32.xlu1 %v5865_v23, %s4992_s5  ;;  %v1176_v2 = vpop.permute.xlu0 %1175 }
 0x28e   : > { %v1152_v58 = vpop.permute.xlu1 %1151 }
 0x28f   : > { %v5876_v38 = vsel %vm286_vm5, %v1150_v14, %v1152_v58  ;;  %v5880_v13 = vsel %vm286_vm5, %v1152_v58, %v5839_v47 }
 0x290   : > { %1233 = vrot.lane.b32.xlu0 %v5876_v38, %s4992_s5 }
 0x291   : > { %1235 = vrot.lane.b32.xlu1 %v5880_v13, %s4992_s5  ;;  %v1182_v28 = vpop.permute.xlu0 %1181 }
 0x292   : > { %v1158_v7 = vpop.permute.xlu1 %1157 }
 0x293   : > { %v5889_v19 = vsel %vm297_vm6, %v1158_v7, %v1160_v25 }
 0x294   : > { %1237 = vrot.lane.b32.xlu0 %v5839_v47, %s4992_s5 }
 0x295   : > { %1239 = vrot.lane.b32.xlu1 %v5889_v19, %s4992_s5  ;;  %v5925_v30 = vpop.permute.xlu0 %1185 }
 0x296   : > { %v5895_v56 = vpop.permute.xlu1 %1161 }
 0x297   : > { %v5899_v46 = vsel %vm297_vm6, %v1160_v25, %v5895_v56 }
 0x298   : > { %1241 = vrot.lane.b32.xlu0 %v5899_v46, %s4992_s5 }
 0x299   : > { %1243 = vrot.lane.b32.xlu1 %v5895_v56, %s4992_s5  ;;  %v1192_v59 = vpop.permute.xlu0 %1191 }
 0x29a   : > { %v1168_v27 = vpop.permute.xlu1 %1167 }
 0x29b   : > { %v5906_v49 = vsel %vm308_vm7, %v1166_v53, %v1168_v27  ;;  %v5910_v51 = vsel %vm308_vm7, %v1168_v27, %v5884_v42 }
 0x29c   : > { %1245 = vrot.lane.b32.xlu0 %v5906_v49, %s4992_s5 }
 0x29d   : > { %1247 = vrot.lane.b32.xlu1 %v5910_v51, %s4992_s5 }
 0x29e   : > { %v1174_v5 = vpop.permute.xlu1 %1173 }
 0x29f   : > { %v5917_v24 = vsel %vm319_vm8, %v1174_v5, %v1176_v2 }
 0x2a0   : > { %1249 = vrot.lane.b32.xlu0 %v5884_v42, %s4992_s5 }
 0x2a1   : > { %1251 = vrot.lane.b32.xlu1 %v5917_v24, %s4992_s5 }
 0x2a2   : > { %v5923_v15 = vpop.permute.xlu1 %1177 }
 0x2a3   : > { %v5929_v18 = vsel %vm319_vm8, %v1176_v2, %v5923_v15 }
 0x2a4   : > { %1253 = vrot.lane.b32.xlu0 %v5929_v18, %s4992_s5 }
 0x2a5   : > { %1255 = vrot.lane.b32.xlu1 %v5923_v15, %s4992_s5 }
 0x2a6   : > { %v1184_v50 = vpop.permute.xlu1 %1183 }
 0x2a7   : > { %v5936_v37 = vsel %vm330_vm9, %v1182_v28, %v1184_v50  ;;  %v5940_v55 = vsel %vm330_vm9, %v1184_v50, %v5925_v30 }
 0x2a8   : > { %1257 = vrot.lane.b32.xlu0 %v5936_v37, %s4992_s5 }
 0x2a9   : > { %1259 = vrot.lane.b32.xlu1 %v5940_v55, %s4992_s5 }
 0x2aa   : > { %v1190_v8 = vpop.permute.xlu1 %1189 }
 0x2ab   : > { %v5947_v10 = vsel %vm341_vm10, %v1190_v8, %v1192_v59 }
 0x2ac   : > { %1261 = vrot.lane.b32.xlu0 %v5925_v30, %s4992_s5 }
 0x2ad   : > { %1263 = vrot.lane.b32.xlu1 %v5947_v10, %s4992_s5 }
 0x2ae   : > { %v5954_v26 = vpop.permute.xlu1 %1193 }
 0x2af   : > { %v5958_v40 = vsel %vm341_vm10, %v1192_v59, %v5954_v26 }
 0x2b0   : > { %1265 = vrot.lane.b32.xlu0 %v5958_v40, %s4992_s5 }
 0x2b1   : > { %1267 = vrot.lane.b32.xlu1 %v5954_v26, %s4992_s5 }
 0x2b4   : > { %1373 = vrot.lane.b32.xlu0 %v5685_v54, %s7850_s18 }
 0x2b5   : > { %1375 = vrot.lane.b32.xlu1 %v5704_v3, %s7850_s18 }
 0x2b8   : > { %1377 = vrot.lane.b32.xlu0 %v5694_v44, %s7850_s18 }
 0x2b9   : > { %1379 = vrot.lane.b32.xlu1 %v5816_v31, %s7850_s18 }
 0x2bc   : > { %1381 = vrot.lane.b32.xlu0 %v5820_v4, %s7850_s18 }
 0x2bd   : > { %1383 = vrot.lane.b32.xlu1 %v5806_v29, %s7850_s18 }
 0x2c0   : > { %1385 = vrot.lane.b32.xlu0 %v5827_v12, %s7850_s18 }
 0x2c1   : > { %1387 = vrot.lane.b32.xlu1 %v5837_v21, %s7850_s18 }
 0x2c4   : > { %1389 = vrot.lane.b32.xlu0 %v5833_v17, %s7850_s18 }
 0x2c5   : > { %1391 = vrot.lane.b32.xlu1 %v5848_v22, %s7850_s18 }
 0x2c8   : > { %1393 = vrot.lane.b32.xlu0 %v5852_v41, %s7850_s18 }
 0x2c9   : > { %1395 = vrot.lane.b32.xlu1 %v5812_v39, %s7850_s18 }
 0x2cc   : > { %1397 = vrot.lane.b32.xlu0 %v5859_v16, %s7850_s18 }
 0x2cd   : > { %1399 = vrot.lane.b32.xlu1 %v5869_v35, %s7850_s18 }
 0x2d0   : > { %1401 = vrot.lane.b32.xlu0 %v5865_v23, %s7850_s18 }
 0x2d1   : > { %1403 = vrot.lane.b32.xlu1 %v5876_v38, %s7850_s18 }
 0x2d4   : > { %1405 = vrot.lane.b32.xlu0 %v5880_v13, %s7850_s18 }
 0x2d5   : > { %1407 = vrot.lane.b32.xlu1 %v5839_v47, %s7850_s18 }
 0x2d8   : > { %1409 = vrot.lane.b32.xlu0 %v5889_v19, %s7850_s18 }
 0x2d9   : > { %1411 = vrot.lane.b32.xlu1 %v5899_v46, %s7850_s18 }
 0x2dc   : > { %1413 = vrot.lane.b32.xlu0 %v5895_v56, %s7850_s18 }
 0x2dd   : > { %1415 = vrot.lane.b32.xlu1 %v5906_v49, %s7850_s18 }
 0x2e0   : > { %1417 = vrot.lane.b32.xlu0 %v5910_v51, %s7850_s18 }
 0x2e1   : > { %1419 = vrot.lane.b32.xlu1 %v5884_v42, %s7850_s18 }
 0x2e4   : > { %1421 = vrot.lane.b32.xlu0 %v5917_v24, %s7850_s18 }
 0x2e5   : > { %1423 = vrot.lane.b32.xlu1 %v5929_v18, %s7850_s18 }
 0x2e8   : > { %1425 = vrot.lane.b32.xlu0 %v5923_v15, %s7850_s18 }
 0x2e9   : > { %1427 = vrot.lane.b32.xlu1 %v5936_v37, %s7850_s18 }
 0x2ea   : > { %v1212_v60 = vpop.permute.xlu1 %1211  ;;  %v1210_v45 = vpop.permute.xlu0 %1209 }
 0x2eb   : > { %v1269_v20 = vsel %vm253_vm1, %v1210_v45, %v1212_v60 }
 0x2ec   : > { %1429 = vrot.lane.b32.xlu0 %v5940_v55, %s7850_s18 }
 0x2ed   : > { %1431 = vrot.lane.b32.xlu1 %v5925_v30, %s7850_s18 }
 0x2ee   : > { %v1216_v61 = vpop.permute.xlu1 %1215  ;;  %v1214_v62 = vpop.permute.xlu0 %1213 }
 0x2ef   : > { %v1270_v33 = vsel %vm253_vm1, %v1212_v60, %v1214_v62 }
 0x2f0   : > { %1433 = vrot.lane.b32.xlu0 %v5947_v10, %s7850_s18  ;;  %1316 = vmatprep.subr.bf16.mxu0 %v1270_v33 }
 0x2f1   : > { %1435 = vrot.lane.b32.xlu1 %v5958_v40, %s7850_s18  ;;  %1317 = vmatpush1.bf16.msra.mxu0 %v1269_v20 }
 0x2f2   : > { %v1218_v36 = vpop.permute.xlu0 %1217 }
 0x2f3   : > { %v1220_v43 = vpop.permute.xlu1 %1219  ;;  %v1271_v48 = vsel %vm253_vm1, %v1216_v61, %v1218_v36 }
 0x2f4   : > { %1437 = vrot.lane.b32.xlu0 %v5954_v26, %s7850_s18  ;;  %v1272_v63 = vsel %vm253_vm1, %v1218_v36, %v1220_v43  ;;  %s5007_s18 = smov 48  }
 0x2f5   : > { %1546 = vrot.lane.b32.xlu1 %v5685_v54, %s7853_s22  ;;  %1318 = vmatprep.subr.bf16.mxu0 %v1272_v63 }
 0x2f6   : > { %1319 = vmatpush1.bf16.msra.mxu0 %v1271_v48  ;;  %v1222_v0 = vpop.permute.xlu0 %1221 }
 0x2f7   : > { %v1224_v1 = vpop.permute.xlu1 %1223 }
 0x2f8   : > { %1548 = vrot.lane.b32.xlu0 %v5704_v3, %s7853_s22  ;;  %v1273_v6 = vsel %vm253_vm1, %v1222_v0, %v1224_v1 }
 0x2f9   : > { %1550 = vrot.lane.b32.xlu1 %v5694_v44, %s7853_s22 }
 0x2fa   : > { %v1226_v52 = vpop.permute.xlu0 %1225 }
 0x2fb   : > { %v1228_v57 = vpop.permute.xlu1 %1227  ;;  %v1274_v14 = vsel %vm253_vm1, %v1224_v1, %v1226_v52 }
 0x2fc   : > { %1552 = vrot.lane.b32.xlu0 %v5816_v31, %s7853_s22  ;;  %1320 = vmatprep.subr.bf16.mxu0 %v1274_v14 }
 0x2fd   : > { %1554 = vrot.lane.b32.xlu1 %v5820_v4, %s7853_s22  ;;  %1321 = vmatpush1.bf16.msra.mxu0 %v1273_v6 }
 0x2fe   : > { %v1230_v25 = vpop.permute.xlu0 %1229 }
 0x2ff   : > { %v1232_v32 = vpop.permute.xlu1 %1231  ;;  %v1275_v53 = vsel %vm253_vm1, %v1228_v57, %v1230_v25 }
 0x300   : > { %1556 = vrot.lane.b32.xlu0 %v5806_v29, %s7853_s22  ;;  %v1276_v58 = vsel %vm253_vm1, %v1230_v25, %v1232_v32 }
 0x301   : > { %1558 = vrot.lane.b32.xlu1 %v5827_v12, %s7853_s22  ;;  %1322 = vmatprep.subr.bf16.mxu0 %v1276_v58 }
 0x302   : > { %1323 = vmatpush1.bf16.msra.mxu0 %v1275_v53  ;;  %v1234_v7 = vpop.permute.xlu0 %1233 }
 0x303   : > { %v1236_v2 = vpop.permute.xlu1 %1235 }
 0x304   : > { %1560 = vrot.lane.b32.xlu0 %v5837_v21, %s7853_s22  ;;  %v1277_v50 = vsel %vm253_vm1, %v1234_v7, %v1236_v2 }
 0x305   : > { %1562 = vrot.lane.b32.xlu1 %v5833_v17, %s7853_s22 }
 0x306   : > { %v1238_v27 = vpop.permute.xlu0 %1237 }
 0x307   : > { %v1240_v28 = vpop.permute.xlu1 %1239  ;;  %v1278_v5 = vsel %vm253_vm1, %v1236_v2, %v1238_v27  ;;  %v4784_v2 = vld [vmem:[#allocation5 + $0x50] ss:$8 sps:$4 sm:$0xff]  }
 0x308   : > { %1564 = vrot.lane.b32.xlu0 %v5848_v22, %s7853_s22  ;;  %1324 = vmatprep.subr.bf16.mxu0 %v1278_v5 }
 0x309   : > { %1566 = vrot.lane.b32.xlu1 %v5852_v41, %s7853_s22  ;;  %1325 = vmatpush1.bf16.msra.mxu0 %v1277_v50 }
 0x30a   : > { %v1242_v59 = vpop.permute.xlu0 %1241 }
 0x30b   : > { %v1244_v8 = vpop.permute.xlu1 %1243  ;;  %v1279_v34 = vsel %vm253_vm1, %v1240_v28, %v1242_v59  ;;  %v4785_v28 = vld [vmem:[#allocation5 + $0x64] ss:$8 sps:$4 sm:$0xff]  }
 0x30c   : > { %1568 = vrot.lane.b32.xlu0 %v5812_v39, %s7853_s22  ;;  %v1280_v60 = vsel %vm253_vm1, %v1242_v59, %v1244_v8 }
 0x30d   : > { %1570 = vrot.lane.b32.xlu1 %v5859_v16, %s7853_s22  ;;  %1326 = vmatprep.subr.bf16.mxu0 %v1280_v60 }
 0x30e   : > { %1327 = vmatpush1.bf16.msra.mxu0 %v1279_v34  ;;  %v1246_v45 = vpop.permute.xlu0 %1245 }
 0x30f   : > { %v1248_v61 = vpop.permute.xlu1 %1247 }
 0x310   : > { %1572 = vrot.lane.b32.xlu0 %v5869_v35, %s7853_s22  ;;  %v1281_v36 = vsel %vm253_vm1, %v1246_v45, %v1248_v61 }
 0x311   : > { %1574 = vrot.lane.b32.xlu1 %v5865_v23, %s7853_s22 }
 0x312   : > { %v1250_v62 = vpop.permute.xlu0 %1249 }
 0x313   : > { %v1252_v33 = vpop.permute.xlu1 %1251  ;;  %v1282_v20 = vsel %vm253_vm1, %v1248_v61, %v1250_v62 }
 0x314   : > { %1576 = vrot.lane.b32.xlu0 %v5876_v38, %s7853_s22  ;;  %1328 = vmatprep.subr.bf16.mxu0 %v1282_v20 }
 0x315   : > { %1578 = vrot.lane.b32.xlu1 %v5880_v13, %s7853_s22  ;;  %1329 = vmatpush1.bf16.msra.mxu0 %v1281_v36 }
 0x316   : > { %v1254_v43 = vpop.permute.xlu0 %1253 }
 0x317   : > { %v1256_v48 = vpop.permute.xlu1 %1255  ;;  %v1283_v63 = vsel %vm253_vm1, %v1252_v33, %v1254_v43 }
 0x318   : > { %1580 = vrot.lane.b32.xlu0 %v5839_v47, %s7853_s22  ;;  %v1284_v0 = vsel %vm253_vm1, %v1254_v43, %v1256_v48 }
 0x319   : > { %1582 = vrot.lane.b32.xlu1 %v5889_v19, %s7853_s22  ;;  %1330 = vmatprep.subr.bf16.mxu0 %v1284_v0 }
 0x31a   : > { %1331 = vmatpush1.bf16.msra.mxu0 %v1283_v63  ;;  %v1258_v1 = vpop.permute.xlu0 %1257 }
 0x31b   : > { %v1260_v52 = vpop.permute.xlu1 %1259 }
 0x31c   : > { %1584 = vrot.lane.b32.xlu0 %v5899_v46, %s7853_s22  ;;  %v1285_v25 = vsel %vm253_vm1, %v1258_v1, %v1260_v52 }
 0x31d   : > { %1586 = vrot.lane.b32.xlu1 %v5895_v56, %s7853_s22 }
 0x31e   : > { %v1262_v57 = vpop.permute.xlu0 %1261 }
 0x31f   : > { %v1264_v14 = vpop.permute.xlu1 %1263  ;;  %v1286_v6 = vsel %vm253_vm1, %v1260_v52, %v1262_v57 }
 0x320   : > { %1588 = vrot.lane.b32.xlu0 %v5906_v49, %s7853_s22  ;;  %1332 = vmatprep.subr.bf16.mxu0 %v1286_v6 }
 0x321   : > { %1590 = vrot.lane.b32.xlu1 %v5910_v51, %s7853_s22  ;;  %1333 = vmatpush1.bf16.msra.mxu0 %v1285_v25 }
 0x322   : > { %v1266_v32 = vpop.permute.xlu0 %1265 }
 0x323   : > { %v1268_v53 = vpop.permute.xlu1 %1267  ;;  %v1287_v58 = vsel %vm253_vm1, %v1264_v14, %v1266_v32  ;;  %v6132_v14 = vld [vmem:[%s5175_s9 + $0xc] ss:$28 sps:$4 sm:$0xff]  }
 0x324   : > { %1592 = vrot.lane.b32.xlu0 %v5884_v42, %s7853_s22  ;;  %v1288_v7 = vsel %vm253_vm1, %v1266_v32, %v1268_v53  ;;  %2451 = vmatprep.subr.bf16.mxu1 %v6132_v14 }
 0x325   : > { %1594 = vrot.lane.b32.xlu1 %v5917_v24, %s7853_s22  ;;  %1334 = vmatprep.subr.bf16.mxu0 %v1288_v7 }
 0x326   : > { %1335 = vmatpush1.bf16.msra.mxu0 %v1287_v58  ;;  %v1374_v27 = vpop.permute.xlu0 %1373 }
 0x327   : > { %v1376_v5 = vpop.permute.xlu1 %1375 }
 0x328   : > { %1596 = vrot.lane.b32.xlu0 %v5929_v18, %s7853_s22  ;;  %v1440_v34 = vsel %vm1439_vm15, %v1374_v27, %v1376_v5 }
 0x329   : > { %1598 = vrot.lane.b32.xlu1 %v5923_v15, %s7853_s22  ;;  %1347 = vmatmul.mubr.bf16.vlgmr.msra.gmra.mrb[0].mxu0 %v4784_v2 }
 0x32a   : > { %v1378_v50 = vpop.permute.xlu0 %1377  ;;  %4521 = vmatprep.mubr.msk.bf16.mxu0 %vm357_vm3, %v4785_v28 }
 0x32b   : > { %v1380_v59 = vpop.permute.xlu1 %1379  ;;  %v1441_v8 = vsel %vm1439_vm15, %v1376_v5, %v1378_v50 }
 0x32c   : > { %1600 = vrot.lane.b32.xlu0 %v5936_v37, %s7853_s22  ;;  %1487 = vmatprep.subr.bf16.mxu0 %v1441_v8 }
 0x32d   : > { %1602 = vrot.lane.b32.xlu1 %v5940_v55, %s7853_s22  ;;  %1488 = vmatpush1.bf16.msra.mxu0 %v1440_v34 }
 0x32e   : > { %v1382_v60 = vpop.permute.xlu0 %1381 }
 0x32f   : > { %v1384_v45 = vpop.permute.xlu1 %1383  ;;  %v1442_v61 = vsel %vm1439_vm15, %v1380_v59, %v1382_v60 }
 0x330   : > { %1604 = vrot.lane.b32.xlu0 %v5925_v30, %s7853_s22  ;;  %v1443_v62 = vsel %vm1439_vm15, %v1382_v60, %v1384_v45 }
 0x331   : > { %1606 = vrot.lane.b32.xlu1 %v5947_v10, %s7853_s22  ;;  %1489 = vmatprep.subr.bf16.mxu0 %v1443_v62 }
 0x332   : > { %1490 = vmatpush1.bf16.msra.mxu0 %v1442_v61  ;;  %v1386_v33 = vpop.permute.xlu0 %1385 }
 0x333   : > { %v1388_v20 = vpop.permute.xlu1 %1387 }
 0x334   : > { %1608 = vrot.lane.b32.xlu0 %v5958_v40, %s7853_s22  ;;  %v1444_v63 = vsel %vm1439_vm15, %v1386_v33, %v1388_v20 }
 0x335   : > { %1610 = vrot.lane.b32.xlu1 %v5954_v26, %s7853_s22  ;;  %s5008_s22 = smov 22  }
 0x336   : > { %v1390_v36 = vpop.permute.xlu0 %1389 }
 0x337   : > { %v1392_v43 = vpop.permute.xlu1 %1391  ;;  %v1445_v48 = vsel %vm1439_vm15, %v1388_v20, %v1390_v36 }
 0x338   : > { %1719 = vrot.lane.b32.xlu0 %v5685_v54, %s5007_s18  ;;  %1491 = vmatprep.subr.bf16.mxu0 %v1445_v48  ;;  %v6137_v54 = vld [vmem:[%s5175_s9 + $0x8] ss:$28 sps:$4 sm:$0xff]  }
 0x339   : > { %1721 = vrot.lane.b32.xlu1 %v5704_v3, %s5007_s18  ;;  %1492 = vmatpush1.bf16.msra.mxu0 %v1444_v63 }
 0x33a   : > { %v1394_v0 = vpop.permute.xlu0 %1393  ;;  %2452 = vmatpush1.bf16.msra.mxu1 %v6137_v54 }
 0x33b   : > { %v1396_v1 = vpop.permute.xlu1 %1395  ;;  %v1446_v52 = vsel %vm1439_vm15, %v1392_v43, %v1394_v0 }
 0x33c   : > { %1723 = vrot.lane.b32.xlu0 %v5694_v44, %s5007_s18  ;;  %v1447_v57 = vsel %vm1439_vm15, %v1394_v0, %v1396_v1 }
 0x33d   : > { %1725 = vrot.lane.b32.xlu1 %v5816_v31, %s5007_s18  ;;  %1493 = vmatprep.subr.bf16.mxu0 %v1447_v57 }
 0x33e   : > { %1494 = vmatpush1.bf16.msra.mxu0 %v1446_v52  ;;  %v1398_v3 = vpop.permute.xlu0 %1397 }
 0x33f   : > { %v1400_v6 = vpop.permute.xlu1 %1399 }
 0x340   : > { %1727 = vrot.lane.b32.xlu0 %v5820_v4, %s5007_s18  ;;  %v1448_v53 = vsel %vm1439_vm15, %v1398_v3, %v1400_v6 }
 0x341   : > { %1729 = vrot.lane.b32.xlu1 %v5806_v29, %s5007_s18 }
 0x342   : > { %v1402_v44 = vpop.permute.xlu0 %1401 }
 0x343   : > { %v1404_v25 = vpop.permute.xlu1 %1403  ;;  %v1449_v32 = vsel %vm1439_vm15, %v1400_v6, %v1402_v44 }
 0x344   : > { %1731 = vrot.lane.b32.xlu0 %v5827_v12, %s5007_s18  ;;  %1495 = vmatprep.subr.bf16.mxu0 %v1449_v32 }
 0x345   : > { %1733 = vrot.lane.b32.xlu1 %v5837_v21, %s5007_s18  ;;  %1496 = vmatpush1.bf16.msra.mxu0 %v1448_v53 }
 0x346   : > { %v1406_v58 = vpop.permute.xlu0 %1405 }
 0x347   : > { %v1408_v7 = vpop.permute.xlu1 %1407  ;;  %v1450_v2 = vsel %vm1439_vm15, %v1404_v25, %v1406_v58 }
 0x348   : > { %1735 = vrot.lane.b32.xlu0 %v5833_v17, %s5007_s18  ;;  %v1451_v27 = vsel %vm1439_vm15, %v1406_v58, %v1408_v7  ;;  %v4787_v58 = vld [vmem:[#allocation5 + $0x60] ss:$8 sps:$4 sm:$0xff]  }
 0x349   : > { %1737 = vrot.lane.b32.xlu1 %v5848_v22, %s5007_s18  ;;  %1497 = vmatprep.subr.bf16.mxu0 %v1451_v27 }
 0x34a   : > { %1498 = vmatpush1.bf16.msra.mxu0 %v1450_v2  ;;  %v1410_v28 = vpop.permute.xlu0 %1409  ;;  %v4788_v2 = vld [vmem:[#allocation5 + $0x74] ss:$8 sps:$4 sm:$0xff]  }
 0x34b   : > { %v1412_v5 = vpop.permute.xlu1 %1411 }
 0x34c   : > { %1739 = vrot.lane.b32.xlu0 %v5852_v41, %s5007_s18  ;;  %v1452_v34 = vsel %vm1439_vm15, %v1410_v28, %v1412_v5 }
 0x34d   : > { %1741 = vrot.lane.b32.xlu1 %v5812_v39, %s5007_s18 }
 0x34e   : > { %v1414_v50 = vpop.permute.xlu0 %1413 }
 0x34f   : > { %v1416_v59 = vpop.permute.xlu1 %1415  ;;  %v1453_v8 = vsel %vm1439_vm15, %v1412_v5, %v1414_v50 }
 0x350   : > { %1743 = vrot.lane.b32.xlu0 %v5859_v16, %s5007_s18  ;;  %1499 = vmatprep.subr.bf16.mxu0 %v1453_v8 }
 0x351   : > { %1745 = vrot.lane.b32.xlu1 %v5869_v35, %s5007_s18  ;;  %1500 = vmatpush1.bf16.msra.mxu0 %v1452_v34 }
 0x352   : > { %v1418_v60 = vpop.permute.xlu0 %1417 }
 0x353   : > { %v1420_v45 = vpop.permute.xlu1 %1419  ;;  %v1454_v61 = vsel %vm1439_vm15, %v1416_v59, %v1418_v60 }
 0x354   : > { %1747 = vrot.lane.b32.xlu0 %v5865_v23, %s5007_s18  ;;  %v1455_v62 = vsel %vm1439_vm15, %v1418_v60, %v1420_v45 }
 0x355   : > { %1749 = vrot.lane.b32.xlu1 %v5876_v38, %s5007_s18  ;;  %1501 = vmatprep.subr.bf16.mxu0 %v1455_v62 }
 0x356   : > { %1502 = vmatpush1.bf16.msra.mxu0 %v1454_v61  ;;  %v1422_v33 = vpop.permute.xlu0 %1421 }
 0x357   : > { %v1424_v20 = vpop.permute.xlu1 %1423 }
 0x358   : > { %1751 = vrot.lane.b32.xlu0 %v5880_v13, %s5007_s18  ;;  %v1456_v63 = vsel %vm1439_vm15, %v1422_v33, %v1424_v20 }
 0x359   : > { %1753 = vrot.lane.b32.xlu1 %v5839_v47, %s5007_s18 }
 0x35a   : > { %v1426_v36 = vpop.permute.xlu0 %1425 }
 0x35b   : > { %v1428_v43 = vpop.permute.xlu1 %1427  ;;  %v1457_v48 = vsel %vm1439_vm15, %v1424_v20, %v1426_v36  ;;  %v4846_v36 = vld [vmem:[%s5175_s9 + $0x4] ss:$28 sps:$4 sm:$0xff]  }
 0x35c   : > { %1755 = vrot.lane.b32.xlu0 %v5889_v19, %s5007_s18  ;;  %1503 = vmatprep.subr.bf16.mxu0 %v1457_v48 }
 0x35d   : > { %1757 = vrot.lane.b32.xlu1 %v5899_v46, %s5007_s18  ;;  %1504 = vmatpush1.bf16.msra.mxu0 %v1456_v63  ;;  %v4847_v63 = vld [vmem:[%s5175_s9 + $0x8] ss:$28 sps:$4 sm:$0xff]  }
 0x35e   : > { %v1430_v0 = vpop.permute.xlu0 %1429 }
 0x35f   : > { %v1432_v1 = vpop.permute.xlu1 %1431  ;;  %v1458_v52 = vsel %vm1439_vm15, %v1428_v43, %v1430_v0 }
 0x360   : > { %1759 = vrot.lane.b32.xlu0 %v5895_v56, %s5007_s18  ;;  %v1459_v57 = vsel %vm1439_vm15, %v1430_v0, %v1432_v1  ;;  %v4848_v0 = vld [vmem:[%s5175_s9 + $0xc] ss:$28 sps:$4 sm:$0xff]  }
 0x361   : > { %1761 = vrot.lane.b32.xlu1 %v5906_v49, %s5007_s18  ;;  %1505 = vmatprep.subr.bf16.mxu0 %v1459_v57 }
 0x362   : > { %1506 = vmatpush1.bf16.msra.mxu0 %v1458_v52  ;;  %v1434_v3 = vpop.permute.xlu0 %1433 }
 0x363   : > { %v1436_v6 = vpop.permute.xlu1 %1435 }
 0x364   : > { %1763 = vrot.lane.b32.xlu0 %v5910_v51, %s5007_s18  ;;  %v1460_v53 = vsel %vm1439_vm15, %v1434_v3, %v1436_v6 }
 0x365   : > { %1765 = vrot.lane.b32.xlu1 %v5884_v42, %s5007_s18 }
 0x366   : > { %v1438_v44 = vpop.permute.xlu0 %1437 }
 0x367   : > { %v1547_v25 = vpop.permute.xlu1 %1546  ;;  %v1461_v32 = vsel %vm1439_vm15, %v1436_v6, %v1438_v44 }
 0x368   : > { %1767 = vrot.lane.b32.xlu0 %v5917_v24, %s5007_s18  ;;  %1507 = vmatprep.subr.bf16.mxu0 %v1461_v32 }
 0x369   : > { %1769 = vrot.lane.b32.xlu1 %v5929_v18, %s5007_s18  ;;  %1508 = vmatpush1.bf16.msra.mxu0 %v1460_v53 }
 0x36a   : > { %v1549_v7 = vpop.permute.xlu0 %1548 }
 0x36b   : > { %v1551_v27 = vpop.permute.xlu1 %1550  ;;  %v1613_v28 = vsel %vm7855_vm14, %v1547_v25, %v1549_v7 }
 0x36c   : > { %1771 = vrot.lane.b32.xlu0 %v5923_v15, %s5007_s18  ;;  %v1614_v5 = vsel %vm7855_vm14, %v1549_v7, %v1551_v27  ;;  %1520 = vmatmul.mubr.bf16.vlgmr.msra.gmra.mrb[0].mxu0 %v4787_v58 }
 0x36d   : > { %1773 = vrot.lane.b32.xlu1 %v5936_v37, %s5007_s18  ;;  %1660 = vmatprep.subr.bf16.mxu0 %v1614_v5 }
 0x36e   : > { %1661 = vmatpush1.bf16.msra.mxu0 %v1613_v28  ;;  %v1553_v50 = vpop.permute.xlu0 %1552  ;;  %4524 = vmatprep.mubr.msk.bf16.mxu0 %vm357_vm3, %v4788_v2 }
 0x36f   : > { %v1555_v59 = vpop.permute.xlu1 %1554 }
 0x370   : > { %1775 = vrot.lane.b32.xlu0 %v5940_v55, %s5007_s18  ;;  %v1615_v45 = vsel %vm7855_vm14, %v1553_v50, %v1555_v59 }
 0x371   : > { %1777 = vrot.lane.b32.xlu1 %v5925_v30, %s5007_s18 }
 0x372   : > { %v1557_v8 = vpop.permute.xlu0 %1556 }
 0x373   : > { %v1559_v34 = vpop.permute.xlu1 %1558  ;;  %v1616_v60 = vsel %vm7855_vm14, %v1555_v59, %v1557_v8 }
 0x374   : > { %1779 = vrot.lane.b32.xlu0 %v5947_v10, %s5007_s18  ;;  %1662 = vmatprep.subr.bf16.mxu0 %v1616_v60 }
 0x375   : > { %1781 = vrot.lane.b32.xlu1 %v5958_v40, %s5007_s18  ;;  %1663 = vmatpush1.bf16.msra.mxu0 %v1615_v45  ;;  %v4790_v45 = vld [vmem:[#allocation5 + $0x70] ss:$8 sps:$4 sm:$0xff]  }
 0x376   : > { %v1561_v61 = vpop.permute.xlu0 %1560 }
 0x377   : > { %v1563_v62 = vpop.permute.xlu1 %1562  ;;  %v1617_v33 = vsel %vm7855_vm14, %v1559_v34, %v1561_v61 }
 0x378   : > { %1783 = vrot.lane.b32.xlu0 %v5954_v26, %s5007_s18  ;;  %v1618_v20 = vsel %vm7855_vm14, %v1561_v61, %v1563_v62  ;;  %v4795_v61 = vld [vmem:[#allocation5 + $0x84] ss:$8 sps:$4 sm:$0xff]  }
 0x379   : > { %1892 = vrot.lane.b32.xlu1 %v4846_v36, %s5008_s22  ;;  %1664 = vmatprep.subr.bf16.mxu0 %v1618_v20 }
 0x37a   : > { %1665 = vmatpush1.bf16.msra.mxu0 %v1617_v33  ;;  %v1565_v43 = vpop.permute.xlu0 %1564 }
 0x37b   : > { %v1567_v48 = vpop.permute.xlu1 %1566 }
 0x37c   : > { %1894 = vrot.lane.b32.xlu0 %v4847_v63, %s5008_s22  ;;  %v1619_v3 = vsel %vm7855_vm14, %v1565_v43, %v1567_v48 }
 0x37d   : > { %1896 = vrot.lane.b32.xlu1 %v4848_v0, %s5008_s22 }
 0x37e   : > { %v1569_v1 = vpop.permute.xlu0 %1568 }
 0x37f   : > { %v1571_v52 = vpop.permute.xlu1 %1570  ;;  %v1620_v57 = vsel %vm7855_vm14, %v1567_v48, %v1569_v1 }
 0x380   : > { %1898 = vrot.lane.b32.xlu0 %v5816_v31, %s5008_s22  ;;  %1666 = vmatprep.subr.bf16.mxu0 %v1620_v57 }
 0x381   : > { %1900 = vrot.lane.b32.xlu1 %v5820_v4, %s5008_s22  ;;  %1667 = vmatpush1.bf16.msra.mxu0 %v1619_v3 }
 0x382   : > { %v1573_v6 = vpop.permute.xlu0 %1572 }
 0x383   : > { %v1575_v44 = vpop.permute.xlu1 %1574  ;;  %v1621_v25 = vsel %vm7855_vm14, %v1571_v52, %v1573_v6 }
 0x384   : > { %1902 = vrot.lane.b32.xlu0 %v5806_v29, %s5008_s22  ;;  %v1622_v32 = vsel %vm7855_vm14, %v1573_v6, %v1575_v44 }
 0x385   : > { %1904 = vrot.lane.b32.xlu1 %v5827_v12, %s5008_s22  ;;  %1668 = vmatprep.subr.bf16.mxu0 %v1622_v32 }
 0x386   : > { %1669 = vmatpush1.bf16.msra.mxu0 %v1621_v25  ;;  %v1577_v31 = vpop.permute.xlu0 %1576 }
 0x387   : > { %v1579_v53 = vpop.permute.xlu1 %1578 }
 0x388   : > { %1906 = vrot.lane.b32.xlu0 %v5837_v21, %s5008_s22  ;;  %v1623_v29 = vsel %vm7855_vm14, %v1577_v31, %v1579_v53 }
 0x389   : > { %1908 = vrot.lane.b32.xlu1 %v5833_v17, %s5008_s22 }
 0x38a   : > { %v1581_v4 = vpop.permute.xlu0 %1580 }
 0x38b   : > { %v1583_v58 = vpop.permute.xlu1 %1582  ;;  %v1624_v7 = vsel %vm7855_vm14, %v1579_v53, %v1581_v4 }
 0x38c   : > { %1910 = vrot.lane.b32.xlu0 %v5848_v22, %s5008_s22  ;;  %1670 = vmatprep.subr.bf16.mxu0 %v1624_v7 }
 0x38d   : > { %1912 = vrot.lane.b32.xlu1 %v5852_v41, %s5008_s22  ;;  %1671 = vmatpush1.bf16.msra.mxu0 %v1623_v29 }
 0x38e   : > { %v1585_v12 = vpop.permute.xlu0 %1584 }
 0x38f   : > { %v1587_v2 = vpop.permute.xlu1 %1586  ;;  %v1625_v21 = vsel %vm7855_vm14, %v1583_v58, %v1585_v12 }
 0x390   : > { %1914 = vrot.lane.b32.xlu0 %v5812_v39, %s5008_s22  ;;  %v1626_v17 = vsel %vm7855_vm14, %v1585_v12, %v1587_v2 }
 0x391   : > { %1916 = vrot.lane.b32.xlu1 %v5859_v16, %s5008_s22  ;;  %1672 = vmatprep.subr.bf16.mxu0 %v1626_v17 }
 0x392   : > { %1673 = vmatpush1.bf16.msra.mxu0 %v1625_v21  ;;  %v1589_v22 = vpop.permute.xlu0 %1588 }
 0x393   : > { %v1591_v27 = vpop.permute.xlu1 %1590 }
 0x394   : > { %1918 = vrot.lane.b32.xlu0 %v5869_v35, %s5008_s22  ;;  %v1627_v39 = vsel %vm7855_vm14, %v1589_v22, %v1591_v27 }
 0x395   : > { %1920 = vrot.lane.b32.xlu1 %v5865_v23, %s5008_s22 }
 0x396   : > { %v1593_v41 = vpop.permute.xlu0 %1592 }
 0x397   : > { %v1595_v28 = vpop.permute.xlu1 %1594  ;;  %v1628_v5 = vsel %vm7855_vm14, %v1591_v27, %v1593_v41 }
 0x398   : > { %1922 = vrot.lane.b32.xlu0 %v5876_v38, %s5008_s22  ;;  %1674 = vmatprep.subr.bf16.mxu0 %v1628_v5 }
 0x399   : > { %1924 = vrot.lane.b32.xlu1 %v5880_v13, %s5008_s22  ;;  %1675 = vmatpush1.bf16.msra.mxu0 %v1627_v39 }
 0x39a   : > { %v1597_v16 = vpop.permute.xlu0 %1596 }
 0x39b   : > { %v1599_v50 = vpop.permute.xlu1 %1598  ;;  %v1629_v35 = vsel %vm7855_vm14, %v1595_v28, %v1597_v16 }
 0x39c   : > { %1926 = vrot.lane.b32.xlu0 %v5839_v47, %s5008_s22  ;;  %v1630_v23 = vsel %vm7855_vm14, %v1597_v16, %v1599_v50 }
 0x39d   : > { %1928 = vrot.lane.b32.xlu1 %v5889_v19, %s5008_s22  ;;  %1676 = vmatprep.subr.bf16.mxu0 %v1630_v23 }
 0x39e   : > { %1677 = vmatpush1.bf16.msra.mxu0 %v1629_v35  ;;  %v1601_v38 = vpop.permute.xlu0 %1600 }
 0x39f   : > { %v1603_v59 = vpop.permute.xlu1 %1602 }
 0x3a0   : > { %1930 = vrot.lane.b32.xlu0 %v5899_v46, %s5008_s22  ;;  %v1631_v47 = vsel %vm7855_vm14, %v1601_v38, %v1603_v59 }
 0x3a1   : > { %1932 = vrot.lane.b32.xlu1 %v5895_v56, %s5008_s22 }
 0x3a2   : > { %v1605_v13 = vpop.permute.xlu0 %1604 }
 0x3a3   : > { %v1607_v8 = vpop.permute.xlu1 %1606  ;;  %v1632_v34 = vsel %vm7855_vm14, %v1603_v59, %v1605_v13 }
 0x3a4   : > { %1934 = vrot.lane.b32.xlu0 %v5906_v49, %s5008_s22  ;;  %1678 = vmatprep.subr.bf16.mxu0 %v1632_v34 }
 0x3a5   : > { %1936 = vrot.lane.b32.xlu1 %v5910_v51, %s5008_s22  ;;  %1679 = vmatpush1.bf16.msra.mxu0 %v1631_v47 }
 0x3a6   : > { %v1609_v19 = vpop.permute.xlu0 %1608 }
 0x3a7   : > { %v1611_v60 = vpop.permute.xlu1 %1610  ;;  %v1633_v46 = vsel %vm7855_vm14, %v1607_v8, %v1609_v19 }
 0x3a8   : > { %1938 = vrot.lane.b32.xlu0 %v5884_v42, %s5008_s22  ;;  %v1634_v56 = vsel %vm7855_vm14, %v1609_v19, %v1611_v60  ;;  %vm1958_vm14 = vcmask 179200  }
 0x3a9   : > { %1940 = vrot.lane.b32.xlu1 %v5917_v24, %s5008_s22  ;;  %1680 = vmatprep.subr.bf16.mxu0 %v1634_v56  ;;  %v4797_v56 = vld [vmem:[#allocation5 + $0x80] ss:$8 sps:$4 sm:$0xff]  }
 0x3aa   : > { %1681 = vmatpush1.bf16.msra.mxu0 %v1633_v46  ;;  %v1720_v49 = vpop.permute.xlu0 %1719 }
 0x3ab   : > { %v1722_v62 = vpop.permute.xlu1 %1721 }
 0x3ac   : > { %1942 = vrot.lane.b32.xlu0 %v5929_v18, %s5008_s22  ;;  %v1786_v24 = vsel %vm357_vm3, %v1720_v49, %v1722_v62  ;;  %v4798_v49 = vld [vmem:[#allocation5 + $0x94] ss:$8 sps:$4 sm:$0xff]  }
 0x3ad   : > { %1944 = vrot.lane.b32.xlu1 %v5923_v15, %s5008_s22  ;;  %1693 = vmatmul.mubr.bf16.vlgmr.msra.gmra.mrb[0].mxu0 %v4790_v45 }
 0x3ae   : > { %v1724_v51 = vpop.permute.xlu0 %1723  ;;  %4527 = vmatprep.mubr.msk.bf16.mxu0 %vm357_vm3, %v4795_v61 }
 0x3af   : > { %v1726_v42 = vpop.permute.xlu1 %1725  ;;  %v1787_v33 = vsel %vm357_vm3, %v1722_v62, %v1724_v51 }
 0x3b0   : > { %1946 = vrot.lane.b32.xlu0 %v5936_v37, %s5008_s22  ;;  %1833 = vmatprep.subr.bf16.mxu0 %v1787_v33 }
 0x3b1   : > { %1948 = vrot.lane.b32.xlu1 %v5940_v55, %s5008_s22  ;;  %1834 = vmatpush1.bf16.msra.mxu0 %v1786_v24 }
 0x3b2   : > { %v1728_v18 = vpop.permute.xlu0 %1727 }
 0x3b3   : > { %v1730_v20 = vpop.permute.xlu1 %1729  ;;  %v1788_v15 = vsel %vm357_vm3, %v1726_v42, %v1728_v18 }
 0x3b4   : > { %1950 = vrot.lane.b32.xlu0 %v5925_v30, %s5008_s22  ;;  %v1789_v36 = vsel %vm357_vm3, %v1728_v18, %v1730_v20 }
 0x3b5   : > { %1952 = vrot.lane.b32.xlu1 %v5947_v10, %s5008_s22  ;;  %1835 = vmatprep.subr.bf16.mxu0 %v1789_v36  ;;  %v6312_v10 = vld [vmem:[%s5175_s9 + $0x10] ss:$28 sps:$4 sm:$0xff]  }
 0x3b6   : > { %1836 = vmatpush1.bf16.msra.mxu0 %v1788_v15  ;;  %v1732_v37 = vpop.permute.xlu0 %1731 }
 0x3b7   : > { %v1734_v43 = vpop.permute.xlu1 %1733 }
 0x3b8   : > { %1954 = vrot.lane.b32.xlu0 %v5958_v40, %s5008_s22  ;;  %v1790_v30 = vsel %vm357_vm3, %v1732_v37, %v1734_v43 }
 0x3b9   : > { %1956 = vrot.lane.b32.xlu1 %v5954_v26, %s5008_s22 }
 0x3ba   : > { %v1736_v55 = vpop.permute.xlu0 %1735 }
 0x3bb   : > { %v1738_v48 = vpop.permute.xlu1 %1737  ;;  %v1791_v63 = vsel %vm357_vm3, %v1734_v43, %v1736_v55 }
 0x3bc   : > { %2070 = vrot.lane.b32.xlu0 %v6137_v54, %s4991_s26  ;;  %1837 = vmatprep.subr.bf16.mxu0 %v1791_v63 }
 0x3bd   : > { %2072 = vrot.lane.b32.xlu1 %v6132_v14, %s4991_s26  ;;  %1838 = vmatpush1.bf16.msra.mxu0 %v1790_v30 }
 0x3be   : > { %v1740_v40 = vpop.permute.xlu0 %1739 }
 0x3bf   : > { %v1742_v0 = vpop.permute.xlu1 %1741  ;;  %v1792_v26 = vsel %vm357_vm3, %v1738_v48, %v1740_v40 }
 0x3c0   : > { %2074 = vrot.lane.b32.xlu0 %v6312_v10, %s4991_s26  ;;  %v1793_v1 = vsel %vm357_vm3, %v1740_v40, %v1742_v0 }
 0x3c1   : > { %2078 = vrot.lane.b32.xlu1 %v6137_v54, %s4992_s5  ;;  %1839 = vmatprep.subr.bf16.mxu0 %v1793_v1 }
 0x3c2   : > { %1840 = vmatpush1.bf16.msra.mxu0 %v1792_v26  ;;  %v1744_v52 = vpop.permute.xlu0 %1743 }
 0x3c3   : > { %v1746_v57 = vpop.permute.xlu1 %1745 }
 0x3c4   : > { %2080 = vrot.lane.b32.xlu0 %v6132_v14, %s4992_s5  ;;  %v1794_v25 = vsel %vm357_vm3, %v1744_v52, %v1746_v57 }
 0x3c5   : > { %2082 = vrot.lane.b32.xlu1 %v6312_v10, %s4992_s5 }
 0x3c6   : > { %v1748_v3 = vpop.permute.xlu0 %1747 }
 0x3c7   : > { %v1750_v6 = vpop.permute.xlu1 %1749  ;;  %v1795_v44 = vsel %vm357_vm3, %v1746_v57, %v1748_v3 }
 0x3c8   : > { %2086 = vrot.lane.b32.xlu0 %v6137_v54, %s4993_s10  ;;  %1841 = vmatprep.subr.bf16.mxu0 %v1795_v44 }
 0x3c9   : > { %2088 = vrot.lane.b32.xlu1 %v6132_v14, %s4993_s10  ;;  %1842 = vmatpush1.bf16.msra.mxu0 %v1794_v25 }
 0x3ca   : > { %v1752_v32 = vpop.permute.xlu0 %1751 }
 0x3cb   : > { %v1754_v31 = vpop.permute.xlu1 %1753  ;;  %v1796_v53 = vsel %vm357_vm3, %v1750_v6, %v1752_v32 }
 0x3cc   : > { %2090 = vrot.lane.b32.xlu0 %v6312_v10, %s4993_s10  ;;  %v1797_v4 = vsel %vm357_vm3, %v1752_v32, %v1754_v31 }
 0x3cd   : > { %2094 = vrot.lane.b32.xlu1 %v6137_v54, %s4994_s11  ;;  %1843 = vmatprep.subr.bf16.mxu0 %v1797_v4 }
 0x3ce   : > { %1844 = vmatpush1.bf16.msra.mxu0 %v1796_v53  ;;  %v1756_v58 = vpop.permute.xlu0 %1755 }
 0x3cf   : > { %v1758_v7 = vpop.permute.xlu1 %1757 }
 0x3d0   : > { %2096 = vrot.lane.b32.xlu0 %v6132_v14, %s4994_s11  ;;  %v1798_v21 = vsel %vm357_vm3, %v1756_v58, %v1758_v7 }
 0x3d1   : > { %2098 = vrot.lane.b32.xlu1 %v6312_v10, %s4994_s11 }
 0x3d2   : > { %v1760_v29 = vpop.permute.xlu0 %1759 }
 0x3d3   : > { %v1762_v12 = vpop.permute.xlu1 %1761  ;;  %v1799_v2 = vsel %vm357_vm3, %v1758_v7, %v1760_v29 }
 0x3d4   : > { %2102 = vrot.lane.b32.xlu0 %v6137_v54, %s4995_s27  ;;  %1845 = vmatprep.subr.bf16.mxu0 %v1799_v2 }
 0x3d5   : > { %2104 = vrot.lane.b32.xlu1 %v6132_v14, %s4995_s27  ;;  %1846 = vmatpush1.bf16.msra.mxu0 %v1798_v21 }
 0x3d6   : > { %v1764_v17 = vpop.permute.xlu0 %1763 }
 0x3d7   : > { %v1766_v22 = vpop.permute.xlu1 %1765  ;;  %v1800_v27 = vsel %vm357_vm3, %v1762_v12, %v1764_v17 }
 0x3d8   : > { %2106 = vrot.lane.b32.xlu0 %v6312_v10, %s4995_s27  ;;  %v1801_v41 = vsel %vm357_vm3, %v1764_v17, %v1766_v22 }
 0x3d9   : > { %2110 = vrot.lane.b32.xlu1 %v6137_v54, %s4996_s28  ;;  %1847 = vmatprep.subr.bf16.mxu0 %v1801_v41 }
 0x3da   : > { %1848 = vmatpush1.bf16.msra.mxu0 %v1800_v27  ;;  %v1768_v28 = vpop.permute.xlu0 %1767 }
 0x3db   : > { %v1770_v5 = vpop.permute.xlu1 %1769 }
 0x3dc   : > { %2112 = vrot.lane.b32.xlu0 %v6132_v14, %s4996_s28  ;;  %v1802_v35 = vsel %vm357_vm3, %v1768_v28, %v1770_v5 }
 0x3dd   : > { %2114 = vrot.lane.b32.xlu1 %v6312_v10, %s4996_s28 }
 0x3de   : > { %v1772_v39 = vpop.permute.xlu0 %1771 }
 0x3df   : > { %v1774_v16 = vpop.permute.xlu1 %1773  ;;  %v1803_v50 = vsel %vm357_vm3, %v1770_v5, %v1772_v39 }
 0x3e0   : > { %2118 = vrot.lane.b32.xlu0 %v6137_v54, %s4997_s29  ;;  %1849 = vmatprep.subr.bf16.mxu0 %v1803_v50 }
 0x3e1   : > { %2120 = vrot.lane.b32.xlu1 %v6132_v14, %s4997_s29  ;;  %1850 = vmatpush1.bf16.msra.mxu0 %v1802_v35 }
 0x3e2   : > { %v1776_v23 = vpop.permute.xlu0 %1775 }
 0x3e3   : > { %v1778_v38 = vpop.permute.xlu1 %1777  ;;  %v1804_v59 = vsel %vm357_vm3, %v1774_v16, %v1776_v23 }
 0x3e4   : > { %2122 = vrot.lane.b32.xlu0 %v6312_v10, %s4997_s29  ;;  %v1805_v13 = vsel %vm357_vm3, %v1776_v23, %v1778_v38 }
 0x3e5   : > { %2126 = vrot.lane.b32.xlu1 %v6137_v54, %s4998_s23  ;;  %1851 = vmatprep.subr.bf16.mxu0 %v1805_v13 }
 0x3e6   : > { %1852 = vmatpush1.bf16.msra.mxu0 %v1804_v59  ;;  %v1780_v8 = vpop.permute.xlu0 %1779 }
 0x3e7   : > { %v1782_v34 = vpop.permute.xlu1 %1781 }
 0x3e8   : > { %2128 = vrot.lane.b32.xlu0 %v6132_v14, %s4998_s23  ;;  %v1806_v46 = vsel %vm357_vm3, %v1780_v8, %v1782_v34 }
 0x3e9   : > { %2130 = vrot.lane.b32.xlu1 %v6312_v10, %s4998_s23 }
 0x3ea   : > { %v1784_v47 = vpop.permute.xlu0 %1783 }
 0x3eb   : > { %v1893_v19 = vpop.permute.xlu1 %1892  ;;  %v1807_v60 = vsel %vm357_vm3, %v1782_v34, %v1784_v47  ;;  %v4800_v47 = vld [vmem:[#allocation5 + $0x90] ss:$8 sps:$4 sm:$0xff]  }
 0x3ec   : > { %2134 = vrot.lane.b32.xlu0 %v6137_v54, %s4999_s30  ;;  %1853 = vmatprep.subr.bf16.mxu0 %v1807_v60 }
 0x3ed   : > { %2136 = vrot.lane.b32.xlu1 %v6132_v14, %s4999_s30  ;;  %1854 = vmatpush1.bf16.msra.mxu0 %v1806_v46 }
 0x3ee   : > { %v1895_v45 = vpop.permute.xlu0 %1894 }
 0x3ef   : > { %v1897_v61 = vpop.permute.xlu1 %1896  ;;  %v1959_v62 = vsel %vm1958_vm14, %v1893_v19, %v1895_v45 }
 0x3f0   : > { %2138 = vrot.lane.b32.xlu0 %v6312_v10, %s4999_s30  ;;  %v1960_v51 = vsel %vm1958_vm14, %v1895_v45, %v1897_v61  ;;  %1866 = vmatmul.mubr.bf16.vlgmr.msra.gmra.mrb[0].mxu0 %v4797_v56 }
 0x3f1   : > { %2142 = vrot.lane.b32.xlu1 %v6137_v54, %s5000_s25  ;;  %2006 = vmatprep.subr.bf16.mxu0 %v1960_v51 }
 0x3f2   : > { %2007 = vmatpush1.bf16.msra.mxu0 %v1959_v62  ;;  %v1899_v42 = vpop.permute.xlu0 %1898  ;;  %4530 = vmatprep.mubr.msk.bf16.mxu0 %vm357_vm3, %v4798_v49 }
 0x3f3   : > { %v1901_v33 = vpop.permute.xlu1 %1900 }
 0x3f4   : > { %2144 = vrot.lane.b32.xlu0 %v6132_v14, %s5000_s25  ;;  %v1961_v15 = vsel %vm1958_vm14, %v1899_v42, %v1901_v33 }
 0x3f5   : > { %2146 = vrot.lane.b32.xlu1 %v6312_v10, %s5000_s25 }
 0x3f6   : > { %v1903_v24 = vpop.permute.xlu0 %1902 }
 0x3f7   : > { %v1905_v18 = vpop.permute.xlu1 %1904  ;;  %v1962_v20 = vsel %vm1958_vm14, %v1901_v33, %v1903_v24 }
 0x3f8   : > { %2008 = vmatprep.subr.bf16.mxu0 %v1962_v20 }
 0x3f9   : > { %2009 = vmatpush1.bf16.msra.mxu0 %v1961_v15 }
 0x3fa   : > { %v1907_v36 = vpop.permute.xlu0 %1906 }
 0x3fb   : > { %v1909_v37 = vpop.permute.xlu1 %1908  ;;  %v1963_v43 = vsel %vm1958_vm14, %v1905_v18, %v1907_v36 }
 0x3fc   : > { %v1964_v55 = vsel %vm1958_vm14, %v1907_v36, %v1909_v37 }
 0x3fd   : > { %2010 = vmatprep.subr.bf16.mxu0 %v1964_v55 }
 0x3fe   : > { %2011 = vmatpush1.bf16.msra.mxu0 %v1963_v43  ;;  %v1911_v48 = vpop.permute.xlu0 %1910 }
 0x3ff   : > { %v1913_v63 = vpop.permute.xlu1 %1912 }
 0x400   : > { %v1965_v0 = vsel %vm1958_vm14, %v1911_v48, %v1913_v63 }
 0x402   : > { %v1915_v30 = vpop.permute.xlu0 %1914 }
 0x403   : > { %v1917_v10 = vpop.permute.xlu1 %1916  ;;  %v1966_v40 = vsel %vm1958_vm14, %v1913_v63, %v1915_v30 }
 0x404   : > { %2012 = vmatprep.subr.bf16.mxu0 %v1966_v40 }
 0x405   : > { %2013 = vmatpush1.bf16.msra.mxu0 %v1965_v0 }
 0x406   : > { %v1919_v26 = vpop.permute.xlu0 %1918 }
 0x407   : > { %v1921_v1 = vpop.permute.xlu1 %1920  ;;  %v1967_v52 = vsel %vm1958_vm14, %v1917_v10, %v1919_v26 }
 0x408   : > { %v1968_v57 = vsel %vm1958_vm14, %v1919_v26, %v1921_v1 }
 0x409   : > { %2014 = vmatprep.subr.bf16.mxu0 %v1968_v57 }
 0x40a   : > { %2015 = vmatpush1.bf16.msra.mxu0 %v1967_v52  ;;  %v1923_v3 = vpop.permute.xlu0 %1922 }
 0x40b   : > { %v1925_v6 = vpop.permute.xlu1 %1924 }
 0x40c   : > { %v1969_v31 = vsel %vm1958_vm14, %v1923_v3, %v1925_v6 }
 0x40e   : > { %v1927_v44 = vpop.permute.xlu0 %1926 }
 0x40f   : > { %v1929_v25 = vpop.permute.xlu1 %1928  ;;  %v1970_v32 = vsel %vm1958_vm14, %v1925_v6, %v1927_v44 }
 0x410   : > { %2016 = vmatprep.subr.bf16.mxu0 %v1970_v32 }
 0x411   : > { %2017 = vmatpush1.bf16.msra.mxu0 %v1969_v31 }
 0x412   : > { %v1931_v53 = vpop.permute.xlu0 %1930 }
 0x413   : > { %v1933_v4 = vpop.permute.xlu1 %1932  ;;  %v1971_v58 = vsel %vm1958_vm14, %v1929_v25, %v1931_v53 }
 0x414   : > { %v1972_v7 = vsel %vm1958_vm14, %v1931_v53, %v1933_v4 }
 0x415   : > { %2018 = vmatprep.subr.bf16.mxu0 %v1972_v7 }
 0x416   : > { %2019 = vmatpush1.bf16.msra.mxu0 %v1971_v58  ;;  %v1935_v29 = vpop.permute.xlu0 %1934 }
 0x417   : > { %v1937_v12 = vpop.permute.xlu1 %1936 }
 0x418   : > { %v1973_v22 = vsel %vm1958_vm14, %v1935_v29, %v1937_v12 }
 0x41a   : > { %v1939_v2 = vpop.permute.xlu0 %1938 }
 0x41b   : > { %v1941_v21 = vpop.permute.xlu1 %1940  ;;  %v1974_v17 = vsel %vm1958_vm14, %v1937_v12, %v1939_v2 }
 0x41c   : > { %2020 = vmatprep.subr.bf16.mxu0 %v1974_v17 }
 0x41d   : > { %2021 = vmatpush1.bf16.msra.mxu0 %v1973_v22  ;;  %v4802_v22 = vld [vmem:[#allocation5 + $0xa4] ss:$8 sps:$4 sm:$0xff]  }
 0x41e   : > { %v1943_v27 = vpop.permute.xlu0 %1942 }
 0x41f   : > { %v1945_v41 = vpop.permute.xlu1 %1944  ;;  %v1975_v28 = vsel %vm1958_vm14, %v1941_v21, %v1943_v27 }
 0x420   : > { %v1976_v5 = vsel %vm1958_vm14, %v1943_v27, %v1945_v41 }
 0x421   : > { %2022 = vmatprep.subr.bf16.mxu0 %v1976_v5 }
 0x422   : > { %2023 = vmatpush1.bf16.msra.mxu0 %v1975_v28  ;;  %v1947_v39 = vpop.permute.xlu0 %1946 }
 0x423   : > { %v1949_v16 = vpop.permute.xlu1 %1948 }
 0x424   : > { %v1977_v38 = vsel %vm1958_vm14, %v1947_v39, %v1949_v16 }
 0x426   : > { %v1951_v50 = vpop.permute.xlu0 %1950 }
 0x427   : > { %v1953_v35 = vpop.permute.xlu1 %1952  ;;  %v1978_v23 = vsel %vm1958_vm14, %v1949_v16, %v1951_v50  ;;  %v6465_v50 = vld [vmem:[%s5175_s9 + $0x10] ss:$28 sps:$4 sm:$0xff]  }
 0x428   : > { %2024 = vmatprep.subr.bf16.mxu0 %v1978_v23 }
 0x429   : > { %2025 = vmatpush1.bf16.msra.mxu0 %v1977_v38 }
 0x42a   : > { %v1955_v59 = vpop.permute.xlu0 %1954 }
 0x42b   : > { %v1957_v13 = vpop.permute.xlu1 %1956  ;;  %v1979_v8 = vsel %vm1958_vm14, %v1953_v35, %v1955_v59 }
 0x42c   : > { %v1980_v34 = vsel %vm1958_vm14, %v1955_v59, %v1957_v13 }
 0x42d   : > { %2026 = vmatprep.subr.bf16.mxu0 %v1980_v34 }
 0x42e   : > { %2027 = vmatpush1.bf16.msra.mxu0 %v1979_v8  ;;  %v2071_v19 = vpop.permute.xlu0 %2070  ;;  %v6528_v8 = vld [vmem:[%s5175_s9 + $0x8] ss:$28 sps:$4 sm:$0xff]  }
 0x42f   : > { %v2073_v60 = vpop.permute.xlu1 %2072 }
 0x430   : > { %v2076_v46 = vsel %vm242_vm0, %v2071_v19, %v2073_v60 }
 0x431   : > { %2162 = vrot.lane.b32.xlu0 %v2076_v46, %s4994_s11  ;;  %2039 = vmatmul.mubr.bf16.vlgmr.msra.gmra.mrb[0].mxu0 %v4800_v47  ;;  %v6533_v47 = vld [vmem:[%s5175_s9 + $0xc] ss:$28 sps:$4 sm:$0xff]  }
 0x432   : > { %v2075_v56 = vpop.permute.xlu0 %2074  ;;  %4536 = vmatprep.mubr.msk.bf16.mxu0 %vm357_vm3, %v4802_v22  ;;  %v4804_v22 = vld [vmem:[#allocation5 + $0xa0] ss:$8 sps:$4 sm:$0xff]  }
 0x433   : > { %v2079_v45 = vpop.permute.xlu1 %2078  ;;  %v2077_v49 = vsel %vm242_vm0, %v2073_v60, %v2075_v56 }
 0x434   : > { %2164 = vrot.lane.b32.xlu1 %v2077_v49, %s4994_s11 }
 0x435   : > { %2166 = vrot.lane.b32.xlu0 %v2075_v56, %s4994_s11 }
 0x436   : > { %v2081_v61 = vpop.permute.xlu0 %2080 }
 0x437   : > { %v2083_v62 = vpop.permute.xlu1 %2082  ;;  %v2084_v51 = vsel %vm253_vm1, %v2079_v45, %v2081_v61 }
 0x438   : > { %v2085_v42 = vsel %vm253_vm1, %v2081_v61, %v2083_v62  ;;  %2168 = vrot.lane.b32.xlu1 %v2084_v51, %s4994_s11 }
 0x439   : > { %2170 = vrot.lane.b32.xlu0 %v2085_v42, %s4994_s11 }
 0x43a   : > { %v2087_v33 = vpop.permute.xlu0 %2086 }
 0x43b   : > { %v2089_v24 = vpop.permute.xlu1 %2088 }
 0x43c   : > { %v2092_v18 = vsel %vm264_vm2, %v2087_v33, %v2089_v24  ;;  %2172 = vrot.lane.b32.xlu1 %v2083_v62, %s4994_s11 }
 0x43d   : > { %2174 = vrot.lane.b32.xlu0 %v2092_v18, %s4994_s11 }
 0x43e   : > { %v2091_v20 = vpop.permute.xlu0 %2090 }
 0x43f   : > { %v2095_v15 = vpop.permute.xlu1 %2094  ;;  %v2093_v36 = vsel %vm264_vm2, %v2089_v24, %v2091_v20 }
 0x440   : > { %2176 = vrot.lane.b32.xlu1 %v2093_v36, %s4994_s11 }
 0x441   : > { %2178 = vrot.lane.b32.xlu0 %v2091_v20, %s4994_s11 }
 0x442   : > { %v2097_v37 = vpop.permute.xlu0 %2096 }
 0x443   : > { %v2099_v43 = vpop.permute.xlu1 %2098  ;;  %v2100_v55 = vsel %vm275_vm4, %v2095_v15, %v2097_v37 }
 0x444   : > { %v2101_v48 = vsel %vm275_vm4, %v2097_v37, %v2099_v43  ;;  %2180 = vrot.lane.b32.xlu1 %v2100_v55, %s4994_s11 }
 0x445   : > { %2182 = vrot.lane.b32.xlu0 %v2101_v48, %s4994_s11  ;;  %2267 = vmatprep.subr.bf16.mxu0 %v2101_v48 }
 0x446   : > { %2268 = vmatpush1.bf16.msra.mxu0 %v2100_v55  ;;  %v2103_v63 = vpop.permute.xlu0 %2102 }
 0x447   : > { %v2105_v30 = vpop.permute.xlu1 %2104 }
 0x448   : > { %v2108_v10 = vsel %vm286_vm5, %v2103_v63, %v2105_v30  ;;  %2184 = vrot.lane.b32.xlu1 %v2099_v43, %s4994_s11 }
 0x449   : > { %2186 = vrot.lane.b32.xlu0 %v2108_v10, %s4994_s11 }
 0x44a   : > { %v2107_v40 = vpop.permute.xlu0 %2106 }
 0x44b   : > { %v2111_v0 = vpop.permute.xlu1 %2110  ;;  %v2109_v26 = vsel %vm286_vm5, %v2105_v30, %v2107_v40 }
 0x44c   : > { %2188 = vrot.lane.b32.xlu1 %v2109_v26, %s4994_s11 }
 0x44d   : > { %2190 = vrot.lane.b32.xlu0 %v2107_v40, %s4994_s11 }
 0x44e   : > { %v2113_v1 = vpop.permute.xlu0 %2112 }
 0x44f   : > { %v2115_v52 = vpop.permute.xlu1 %2114  ;;  %v2116_v57 = vsel %vm297_vm6, %v2111_v0, %v2113_v1 }
 0x450   : > { %v2117_v3 = vsel %vm297_vm6, %v2113_v1, %v2115_v52  ;;  %2192 = vrot.lane.b32.xlu1 %v2116_v57, %s4994_s11 }
 0x451   : > { %2194 = vrot.lane.b32.xlu0 %v2117_v3, %s4994_s11 }
 0x452   : > { %v2119_v6 = vpop.permute.xlu0 %2118 }
 0x453   : > { %v2121_v44 = vpop.permute.xlu1 %2120 }
 0x454   : > { %v2124_v25 = vsel %vm308_vm7, %v2119_v6, %v2121_v44  ;;  %2196 = vrot.lane.b32.xlu1 %v2115_v52, %s4994_s11  ;;  %v4807_v52 = vld [vmem:[#allocation5 + $0x4] ss:$8 sps:$4 sm:$0xff]  }
 0x455   : > { %2198 = vrot.lane.b32.xlu0 %v2124_v25, %s4994_s11  ;;  %4542 = vmatprep.mubr.msk.bf16.mxu1 %vm357_vm3, %v4807_v52 }
 0x456   : > { %v2123_v32 = vpop.permute.xlu0 %2122 }
 0x457   : > { %v2127_v31 = vpop.permute.xlu1 %2126  ;;  %v2125_v53 = vsel %vm308_vm7, %v2121_v44, %v2123_v32 }
 0x458   : > { %2200 = vrot.lane.b32.xlu1 %v2125_v53, %s4994_s11 }
 0x459   : > { %2202 = vrot.lane.b32.xlu0 %v2123_v32, %s4994_s11 }
 0x45a   : > { %v2129_v4 = vpop.permute.xlu0 %2128 }
 0x45b   : > { %v2131_v58 = vpop.permute.xlu1 %2130  ;;  %v2132_v7 = vsel %vm319_vm8, %v2127_v31, %v2129_v4 }
 0x45c   : > { %v2133_v29 = vsel %vm319_vm8, %v2129_v4, %v2131_v58  ;;  %2204 = vrot.lane.b32.xlu1 %v2132_v7, %s4994_s11 }
 0x45d   : > { %2206 = vrot.lane.b32.xlu0 %v2133_v29, %s4994_s11 }
 0x45e   : > { %v2135_v12 = vpop.permute.xlu0 %2134 }
 0x45f   : > { %v2137_v2 = vpop.permute.xlu1 %2136 }
 0x460   : > { %v2140_v21 = vsel %vm330_vm9, %v2135_v12, %v2137_v2  ;;  %2208 = vrot.lane.b32.xlu1 %v2131_v58, %s4994_s11 }
 0x461   : > { %2210 = vrot.lane.b32.xlu0 %v2140_v21, %s4994_s11 }
 0x462   : > { %v2139_v17 = vpop.permute.xlu0 %2138 }
 0x463   : > { %v2143_v27 = vpop.permute.xlu1 %2142  ;;  %v2141_v41 = vsel %vm330_vm9, %v2137_v2, %v2139_v17 }
 0x464   : > { %2212 = vrot.lane.b32.xlu1 %v2141_v41, %s4994_s11 }
 0x465   : > { %2214 = vrot.lane.b32.xlu0 %v2139_v17, %s4994_s11 }
 0x466   : > { %v2145_v28 = vpop.permute.xlu0 %2144 }
 0x467   : > { %v2147_v5 = vpop.permute.xlu1 %2146  ;;  %v2148_v39 = vsel %vm341_vm10, %v2143_v27, %v2145_v28 }
 0x468   : > { %v2149_v16 = vsel %vm341_vm10, %v2145_v28, %v2147_v5  ;;  %2216 = vrot.lane.b32.xlu1 %v2148_v39, %s4994_s11 }
 0x469   : > { %2218 = vrot.lane.b32.xlu0 %v2149_v16, %s4994_s11 }
 0x46c   : > { %2220 = vrot.lane.b32.xlu1 %v2147_v5, %s4994_s11 }
 0x46d   : > { %2337 = vrot.lane.b32.xlu0 %v6137_v54, %s4991_s26 }
 0x470   : > { %2339 = vrot.lane.b32.xlu1 %v6132_v14, %s4991_s26 }
 0x471   : > { %2341 = vrot.lane.b32.xlu0 %v6465_v50, %s4991_s26 }
 0x474   : > { %2347 = vrot.lane.b32.xlu1 %v6137_v54, %s4992_s5 }
 0x475   : > { %2349 = vrot.lane.b32.xlu0 %v6132_v14, %s4992_s5 }
 0x478   : > { %2351 = vrot.lane.b32.xlu1 %v6465_v50, %s4992_s5 }
 0x479   : > { %2357 = vrot.lane.b32.xlu0 %v6137_v54, %s4993_s10 }
 0x47c   : > { %2359 = vrot.lane.b32.xlu1 %v6132_v14, %s4993_s10 }
 0x47d   : > { %2361 = vrot.lane.b32.xlu0 %v6465_v50, %s4993_s10 }
 0x480   : > { %2367 = vrot.lane.b32.xlu1 %v6137_v54, %s4994_s11 }
 0x481   : > { %2369 = vrot.lane.b32.xlu0 %v6132_v14, %s4994_s11 }
 0x484   : > { %2371 = vrot.lane.b32.xlu1 %v6465_v50, %s4994_s11 }
 0x485   : > { %2377 = vrot.lane.b32.xlu0 %v6137_v54, %s4995_s27 }
 0x488   : > { %2379 = vrot.lane.b32.xlu1 %v6132_v14, %s4995_s27 }
 0x489   : > { %2381 = vrot.lane.b32.xlu0 %v6465_v50, %s4995_s27 }
 0x48c   : > { %2387 = vrot.lane.b32.xlu1 %v6137_v54, %s4996_s28 }
 0x48d   : > { %2389 = vrot.lane.b32.xlu0 %v6132_v14, %s4996_s28 }
 0x490   : > { %2391 = vrot.lane.b32.xlu1 %v6465_v50, %s4996_s28 }
 0x491   : > { %2397 = vrot.lane.b32.xlu0 %v6137_v54, %s4997_s29 }
 0x494   : > { %2399 = vrot.lane.b32.xlu1 %v6132_v14, %s4997_s29 }
 0x495   : > { %2401 = vrot.lane.b32.xlu0 %v6465_v50, %s4997_s29 }
 0x498   : > { %2407 = vrot.lane.b32.xlu1 %v6137_v54, %s4998_s23 }
 0x499   : > { %2409 = vrot.lane.b32.xlu0 %v6132_v14, %s4998_s23 }
 0x49c   : > { %2411 = vrot.lane.b32.xlu1 %v6465_v50, %s4998_s23 }
 0x49d   : > { %2417 = vrot.lane.b32.xlu0 %v6137_v54, %s4999_s30 }
 0x4a0   : > { %2419 = vrot.lane.b32.xlu1 %v6132_v14, %s4999_s30 }
 0x4a1   : > { %2421 = vrot.lane.b32.xlu0 %v6465_v50, %s4999_s30 }
 0x4a3   : > { %v2163_v35 = vpop.permute.xlu0 %2162 }
 0x4a4   : > { %2427 = vrot.lane.b32.xlu1 %v6137_v54, %s5000_s25 }
 0x4a5   : > { %2429 = vrot.lane.b32.xlu0 %v6132_v14, %s5000_s25 }
 0x4a6   : > { %v2165_v23 = vpop.permute.xlu1 %2164 }
 0x4a7   : > { %v2167_v38 = vpop.permute.xlu0 %2166  ;;  %v2222_v59 = vsel %vm275_vm4, %v2163_v35, %v2165_v23 }
 0x4a8   : > { %2431 = vrot.lane.b32.xlu1 %v6465_v50, %s5000_s25  ;;  %v2223_v13 = vsel %vm275_vm4, %v2165_v23, %v2167_v38 }
 0x4a9   : > { %2269 = vmatprep.subr.bf16.mxu0 %v2223_v13  ;;  %2509 = vrot.lane.b32.xlu0 %v6528_v8, %s5001_s7 }
 0x4aa   : > { %2270 = vmatpush1.bf16.msra.mxu0 %v2222_v59  ;;  %v2169_v54 = vpop.permute.xlu1 %2168 }
 0x4ab   : > { %v2171_v34 = vpop.permute.xlu0 %2170 }
 0x4ac   : > { %2511 = vrot.lane.b32.xlu1 %v6533_v47, %s5001_s7  ;;  %v2224_v46 = vsel %vm275_vm4, %v2169_v54, %v2171_v34 }
 0x4ad   : > { %2513 = vrot.lane.b32.xlu0 %v6465_v50, %s5001_s7 }
 0x4ae   : > { %v2173_v14 = vpop.permute.xlu1 %2172 }
 0x4af   : > { %v2175_v19 = vpop.permute.xlu0 %2174  ;;  %v2225_v60 = vsel %vm275_vm4, %v2171_v34, %v2173_v14 }
 0x4b0   : > { %2271 = vmatprep.subr.bf16.mxu0 %v2225_v60 }
 0x4b1   : > { %2272 = vmatpush1.bf16.msra.mxu0 %v2224_v46 }
 0x4b2   : > { %v2177_v56 = vpop.permute.xlu1 %2176 }
 0x4b3   : > { %v2179_v45 = vpop.permute.xlu0 %2178  ;;  %v2226_v49 = vsel %vm275_vm4, %v2175_v19, %v2177_v56 }
 0x4b4   : > { %v2227_v61 = vsel %vm275_vm4, %v2177_v56, %v2179_v45 }
 0x4b5   : > { %2273 = vmatprep.subr.bf16.mxu0 %v2227_v61 }
 0x4b6   : > { %2274 = vmatpush1.bf16.msra.mxu0 %v2226_v49  ;;  %v2181_v62 = vpop.permute.xlu1 %2180 }
 0x4b7   : > { %v2183_v51 = vpop.permute.xlu0 %2182 }
 0x4b8   : > { %v2228_v18 = vsel %vm275_vm4, %v2181_v62, %v2183_v51 }
 0x4ba   : > { %v2185_v42 = vpop.permute.xlu1 %2184 }
 0x4bb   : > { %v2187_v33 = vpop.permute.xlu0 %2186  ;;  %v2229_v24 = vsel %vm275_vm4, %v2183_v51, %v2185_v42 }
 0x4bc   : > { %2275 = vmatprep.subr.bf16.mxu0 %v2229_v24 }
 0x4bd   : > { %2276 = vmatpush1.bf16.msra.mxu0 %v2228_v18 }
 0x4be   : > { %v2189_v20 = vpop.permute.xlu1 %2188 }
 0x4bf   : > { %v2191_v15 = vpop.permute.xlu0 %2190  ;;  %v2230_v36 = vsel %vm275_vm4, %v2187_v33, %v2189_v20 }
 0x4c0   : > { %v2231_v37 = vsel %vm275_vm4, %v2189_v20, %v2191_v15 }
 0x4c1   : > { %2277 = vmatprep.subr.bf16.mxu0 %v2231_v37 }
 0x4c2   : > { %2278 = vmatpush1.bf16.msra.mxu0 %v2230_v36  ;;  %v2193_v43 = vpop.permute.xlu1 %2192 }
 0x4c3   : > { %v2195_v55 = vpop.permute.xlu0 %2194 }
 0x4c4   : > { %v2232_v10 = vsel %vm275_vm4, %v2193_v43, %v2195_v55 }
 0x4c6   : > { %v2197_v48 = vpop.permute.xlu1 %2196 }
 0x4c7   : > { %v2199_v63 = vpop.permute.xlu0 %2198  ;;  %v2233_v30 = vsel %vm275_vm4, %v2195_v55, %v2197_v48 }
 0x4c8   : > { %2279 = vmatprep.subr.bf16.mxu0 %v2233_v30 }
 0x4c9   : > { %2280 = vmatpush1.bf16.msra.mxu0 %v2232_v10 }
 0x4ca   : > { %v2201_v40 = vpop.permute.xlu1 %2200 }
 0x4cb   : > { %v2203_v0 = vpop.permute.xlu0 %2202  ;;  %v2234_v26 = vsel %vm275_vm4, %v2199_v63, %v2201_v40 }
 0x4cc   : > { %v2235_v1 = vsel %vm275_vm4, %v2201_v40, %v2203_v0 }
 0x4cd   : > { %2281 = vmatprep.subr.bf16.mxu0 %v2235_v1 }
 0x4ce   : > { %2282 = vmatpush1.bf16.msra.mxu0 %v2234_v26  ;;  %v2205_v57 = vpop.permute.xlu1 %2204 }
 0x4cf   : > { %v2207_v3 = vpop.permute.xlu0 %2206 }
 0x4d0   : > { %v2236_v32 = vsel %vm275_vm4, %v2205_v57, %v2207_v3 }
 0x4d2   : > { %v2209_v6 = vpop.permute.xlu1 %2208 }
 0x4d3   : > { %v2211_v44 = vpop.permute.xlu0 %2210  ;;  %v2237_v25 = vsel %vm275_vm4, %v2207_v3, %v2209_v6 }
 0x4d4   : > { %2283 = vmatprep.subr.bf16.mxu0 %v2237_v25 }
 0x4d5   : > { %2284 = vmatpush1.bf16.msra.mxu0 %v2236_v32 }
 0x4d6   : > { %v2213_v31 = vpop.permute.xlu1 %2212 }
 0x4d7   : > { %v2215_v53 = vpop.permute.xlu0 %2214  ;;  %v2238_v4 = vsel %vm275_vm4, %v2211_v44, %v2213_v31 }
 0x4d8   : > { %v2239_v58 = vsel %vm275_vm4, %v2213_v31, %v2215_v53 }
 0x4d9   : > { %2285 = vmatprep.subr.bf16.mxu0 %v2239_v58 }
 0x4da   : > { %2286 = vmatpush1.bf16.msra.mxu0 %v2238_v4  ;;  %v2217_v7 = vpop.permute.xlu1 %2216  ;;  %v4805_v4 = vld [vmem:[#allocation5] ss:$8 sps:$4 sm:$0xff]  }
 0x4db   : > { %v2219_v29 = vpop.permute.xlu0 %2218 }
 0x4dc   : > { %v2240_v17 = vsel %vm275_vm4, %v2217_v7, %v2219_v29  ;;  %v4811_v7 = vld [vmem:[#allocation5 + $0x14] ss:$8 sps:$4 sm:$0xff]  }
 0x4de   : > { %v2221_v12 = vpop.permute.xlu1 %2220 }
 0x4df   : > { %v2338_v2 = vpop.permute.xlu0 %2337  ;;  %v2241_v21 = vsel %vm275_vm4, %v2219_v29, %v2221_v12 }
 0x4e0   : > { %2287 = vmatprep.subr.bf16.mxu0 %v2241_v21 }
 0x4e1   : > { %2288 = vmatpush1.bf16.msra.mxu0 %v2240_v17 }
 0x4e2   : > { %v2340_v27 = vpop.permute.xlu1 %2339 }
 0x4e3   : > { %v6559_v41 = vsel %vm242_vm0, %v2338_v2, %v2340_v27  ;;  %v6561_v28 = vpop.permute.xlu0 %2341 }
 0x4e4   : > { %2300 = vmatmul.mubr.bf16.vlgmr.msra.gmra.mrb[0].mxu0 %v4804_v22  ;;  %2515 = vrot.lane.b32.xlu1 %v6559_v41, %s5001_s7  ;;  %v6567_v5 = vsel %vm242_vm0, %v2340_v27, %v6561_v28 }
 0x4e5   : > { %2517 = vrot.lane.b32.xlu0 %v6567_v5, %s5001_s7  ;;  %2453 = vmatprep.subr.bf16.mxu1 %v6567_v5 }
 0x4e6   : > { %2454 = vmatpush1.bf16.msra.mxu1 %v6559_v41  ;;  %v2348_v39 = vpop.permute.xlu1 %2347 }
 0x4e7   : > { %v2350_v16 = vpop.permute.xlu0 %2349 }
 0x4e8   : > { %v6574_v35 = vsel %vm253_vm1, %v2348_v39, %v2350_v16  ;;  %2519 = vrot.lane.b32.xlu1 %v6561_v28, %s5001_s7 }
 0x4e9   : > { %2521 = vrot.lane.b32.xlu0 %v6574_v35, %s5001_s7 }
 0x4ea   : > { %v6580_v23 = vpop.permute.xlu1 %2351 }
 0x4eb   : > { %v2358_v38 = vpop.permute.xlu0 %2357  ;;  %v6584_v59 = vsel %vm253_vm1, %v2350_v16, %v6580_v23 }
 0x4ec   : > { %2523 = vrot.lane.b32.xlu1 %v6584_v59, %s5001_s7  ;;  %2455 = vmatprep.subr.bf16.mxu1 %v6584_v59 }
 0x4ed   : > { %2525 = vrot.lane.b32.xlu0 %v6580_v23, %s5001_s7  ;;  %2456 = vmatpush1.bf16.msra.mxu1 %v6574_v35 }
 0x4ee   : > { %v2360_v13 = vpop.permute.xlu1 %2359 }
 0x4ef   : > { %v6593_v54 = vsel %vm264_vm2, %v2358_v38, %v2360_v13  ;;  %v6595_v34 = vpop.permute.xlu0 %2361 }
 0x4f0   : > { %2527 = vrot.lane.b32.xlu1 %v6593_v54, %s5001_s7  ;;  %v6601_v14 = vsel %vm264_vm2, %v2360_v13, %v6595_v34 }
 0x4f1   : > { %2529 = vrot.lane.b32.xlu0 %v6601_v14, %s5001_s7  ;;  %2457 = vmatprep.subr.bf16.mxu1 %v6601_v14 }
 0x4f2   : > { %2458 = vmatpush1.bf16.msra.mxu1 %v6593_v54  ;;  %v2368_v19 = vpop.permute.xlu1 %2367 }
 0x4f3   : > { %v2370_v60 = vpop.permute.xlu0 %2369 }
 0x4f4   : > { %v6608_v46 = vsel %vm275_vm4, %v2368_v19, %v2370_v60  ;;  %2531 = vrot.lane.b32.xlu1 %v6595_v34, %s5001_s7 }
 0x4f5   : > { %2533 = vrot.lane.b32.xlu0 %v6608_v46, %s5001_s7 }
 0x4f6   : > { %v6614_v56 = vpop.permute.xlu1 %2371 }
 0x4f7   : > { %v2378_v45 = vpop.permute.xlu0 %2377  ;;  %v6618_v49 = vsel %vm275_vm4, %v2370_v60, %v6614_v56 }
 0x4f8   : > { %2535 = vrot.lane.b32.xlu1 %v6618_v49, %s5001_s7  ;;  %2459 = vmatprep.subr.bf16.mxu1 %v6618_v49 }
 0x4f9   : > { %2537 = vrot.lane.b32.xlu0 %v6614_v56, %s5001_s7  ;;  %2460 = vmatpush1.bf16.msra.mxu1 %v6608_v46 }
 0x4fa   : > { %v2380_v61 = vpop.permute.xlu1 %2379 }
 0x4fb   : > { %v6627_v62 = vsel %vm286_vm5, %v2378_v45, %v2380_v61  ;;  %v6629_v51 = vpop.permute.xlu0 %2381 }
 0x4fc   : > { %2539 = vrot.lane.b32.xlu1 %v6627_v62, %s5001_s7  ;;  %v6635_v42 = vsel %vm286_vm5, %v2380_v61, %v6629_v51 }
 0x4fd   : > { %2541 = vrot.lane.b32.xlu0 %v6635_v42, %s5001_s7  ;;  %2461 = vmatprep.subr.bf16.mxu1 %v6635_v42 }
 0x4fe   : > { %2462 = vmatpush1.bf16.msra.mxu1 %v6627_v62  ;;  %v2388_v33 = vpop.permute.xlu1 %2387 }
 0x4ff   : > { %v2390_v24 = vpop.permute.xlu0 %2389 }
 0x500   : > { %v6642_v18 = vsel %vm297_vm6, %v2388_v33, %v2390_v24  ;;  %2543 = vrot.lane.b32.xlu1 %v6629_v51, %s5001_s7 }
 0x501   : > { %2545 = vrot.lane.b32.xlu0 %v6642_v18, %s5001_s7 }
 0x502   : > { %v6648_v20 = vpop.permute.xlu1 %2391 }
 0x503   : > { %v2398_v15 = vpop.permute.xlu0 %2397  ;;  %v6652_v36 = vsel %vm297_vm6, %v2390_v24, %v6648_v20 }
 0x504   : > { %2547 = vrot.lane.b32.xlu1 %v6652_v36, %s5001_s7  ;;  %2463 = vmatprep.subr.bf16.mxu1 %v6652_v36 }
 0x505   : > { %2549 = vrot.lane.b32.xlu0 %v6648_v20, %s5001_s7  ;;  %2464 = vmatpush1.bf16.msra.mxu1 %v6642_v18 }
 0x506   : > { %v2400_v37 = vpop.permute.xlu1 %2399 }
 0x507   : > { %v6661_v43 = vsel %vm308_vm7, %v2398_v15, %v2400_v37  ;;  %v6663_v55 = vpop.permute.xlu0 %2401 }
 0x508   : > { %2551 = vrot.lane.b32.xlu1 %v6661_v43, %s5001_s7  ;;  %v6669_v48 = vsel %vm308_vm7, %v2400_v37, %v6663_v55 }
 0x509   : > { %2553 = vrot.lane.b32.xlu0 %v6669_v48, %s5001_s7  ;;  %2465 = vmatprep.subr.bf16.mxu1 %v6669_v48 }
 0x50a   : > { %2466 = vmatpush1.bf16.msra.mxu1 %v6661_v43  ;;  %v2408_v63 = vpop.permute.xlu1 %2407 }
 0x50b   : > { %v2410_v30 = vpop.permute.xlu0 %2409 }
 0x50c   : > { %v6676_v10 = vsel %vm319_vm8, %v2408_v63, %v2410_v30  ;;  %2555 = vrot.lane.b32.xlu1 %v6663_v55, %s5001_s7 }
 0x50d   : > { %2557 = vrot.lane.b32.xlu0 %v6676_v10, %s5001_s7 }
 0x50e   : > { %v6682_v40 = vpop.permute.xlu1 %2411 }
 0x50f   : > { %v2418_v0 = vpop.permute.xlu0 %2417  ;;  %v6686_v26 = vsel %vm319_vm8, %v2410_v30, %v6682_v40 }
 0x510   : > { %2559 = vrot.lane.b32.xlu1 %v6686_v26, %s5001_s7  ;;  %2467 = vmatprep.subr.bf16.mxu1 %v6686_v26 }
 0x511   : > { %2561 = vrot.lane.b32.xlu0 %v6682_v40, %s5001_s7  ;;  %2468 = vmatpush1.bf16.msra.mxu1 %v6676_v10 }
 0x512   : > { %v2420_v1 = vpop.permute.xlu1 %2419 }
 0x513   : > { %v6695_v52 = vsel %vm330_vm9, %v2418_v0, %v2420_v1  ;;  %v6697_v57 = vpop.permute.xlu0 %2421 }
 0x514   : > { %2563 = vrot.lane.b32.xlu1 %v6695_v52, %s5001_s7  ;;  %v6703_v3 = vsel %vm330_vm9, %v2420_v1, %v6697_v57 }
 0x515   : > { %2565 = vrot.lane.b32.xlu0 %v6703_v3, %s5001_s7  ;;  %2469 = vmatprep.subr.bf16.mxu1 %v6703_v3 }
 0x516   : > { %2470 = vmatpush1.bf16.msra.mxu1 %v6695_v52  ;;  %v2428_v6 = vpop.permute.xlu1 %2427 }
 0x517   : > { %v2430_v44 = vpop.permute.xlu0 %2429 }
 0x518   : > { %v6710_v25 = vsel %vm341_vm10, %v2428_v6, %v2430_v44  ;;  %2567 = vrot.lane.b32.xlu1 %v6697_v57, %s5001_s7 }
 0x519   : > { %2569 = vrot.lane.b32.xlu0 %v6710_v25, %s5001_s7 }
 0x51a   : > { %v6716_v32 = vpop.permute.xlu1 %2431 }
 0x51b   : > { %v6720_v31 = vsel %vm341_vm10, %v2430_v44, %v6716_v32  ;;  %v2510_v53 = vpop.permute.xlu0 %2509 }
 0x51c   : > { %2571 = vrot.lane.b32.xlu1 %v6720_v31, %s5001_s7  ;;  %2471 = vmatprep.subr.bf16.mxu1 %v6720_v31 }
 0x51d   : > { %2573 = vrot.lane.b32.xlu0 %v6716_v32, %s5001_s7  ;;  %2472 = vmatpush1.bf16.msra.mxu1 %v6710_v25  ;;  %s4494_s7 = sshll.u32 %s5171_s6, 6 }
 0x51e   : > { %v2512_v58 = vpop.permute.xlu1 %2511 }
 0x51f   : > { %v2514_v29 = vpop.permute.xlu0 %2513  ;;  %v2575_v12 = vsel %vm486_vm11, %v2510_v53, %v2512_v58 }
 0x520   : > { %2680 = vrot.lane.b32.xlu1 %v6528_v8, %s5002_s8  ;;  %v2576_v2 = vsel %vm486_vm11, %v2512_v58, %v2514_v29  ;;  %2484 = vmatmul.mubr.bf16.vlgmr.msra.gmra.mrb[0].mxu1 %v4805_v4 }
 0x521   : > { %2682 = vrot.lane.b32.xlu0 %v6533_v47, %s5002_s8  ;;  %2622 = vmatprep.subr.bf16.mxu1 %v2576_v2 }
 0x522   : > { %2623 = vmatpush1.bf16.msra.mxu1 %v2575_v12  ;;  %4545 = vmatprep.mubr.msk.bf16.mxu1 %vm357_vm3, %v4811_v7 }
 0x524   : > { %2684 = vrot.lane.b32.xlu1 %v6465_v50, %s5002_s8 }
 0x525   : > { %2686 = vrot.lane.b32.xlu0 %v6559_v41, %s5002_s8 }
 0x528   : > { %2688 = vrot.lane.b32.xlu1 %v6567_v5, %s5002_s8 }
 0x529   : > { %2690 = vrot.lane.b32.xlu0 %v6561_v28, %s5002_s8 }
 0x52c   : > { %2692 = vrot.lane.b32.xlu1 %v6574_v35, %s5002_s8 }
 0x52d   : > { %2694 = vrot.lane.b32.xlu0 %v6584_v59, %s5002_s8 }
 0x530   : > { %2696 = vrot.lane.b32.xlu1 %v6580_v23, %s5002_s8 }
 0x531   : > { %2698 = vrot.lane.b32.xlu0 %v6593_v54, %s5002_s8 }
 0x534   : > { %2700 = vrot.lane.b32.xlu1 %v6601_v14, %s5002_s8 }
 0x535   : > { %2702 = vrot.lane.b32.xlu0 %v6595_v34, %s5002_s8 }
 0x538   : > { %2704 = vrot.lane.b32.xlu1 %v6608_v46, %s5002_s8 }
 0x539   : > { %2706 = vrot.lane.b32.xlu0 %v6618_v49, %s5002_s8 }
 0x53c   : > { %2708 = vrot.lane.b32.xlu1 %v6614_v56, %s5002_s8 }
 0x53d   : > { %2710 = vrot.lane.b32.xlu0 %v6627_v62, %s5002_s8 }
 0x540   : > { %2712 = vrot.lane.b32.xlu1 %v6635_v42, %s5002_s8 }
 0x541   : > { %2714 = vrot.lane.b32.xlu0 %v6629_v51, %s5002_s8 }
 0x544   : > { %2716 = vrot.lane.b32.xlu1 %v6642_v18, %s5002_s8 }
 0x545   : > { %2718 = vrot.lane.b32.xlu0 %v6652_v36, %s5002_s8 }
 0x548   : > { %2720 = vrot.lane.b32.xlu1 %v6648_v20, %s5002_s8 }
 0x549   : > { %2722 = vrot.lane.b32.xlu0 %v6661_v43, %s5002_s8 }
 0x54c   : > { %2724 = vrot.lane.b32.xlu1 %v6669_v48, %s5002_s8 }
 0x54d   : > { %2726 = vrot.lane.b32.xlu0 %v6663_v55, %s5002_s8 }
 0x550   : > { %2728 = vrot.lane.b32.xlu1 %v6676_v10, %s5002_s8 }
 0x551   : > { %2730 = vrot.lane.b32.xlu0 %v6686_v26, %s5002_s8 }
 0x554   : > { %2732 = vrot.lane.b32.xlu1 %v6682_v40, %s5002_s8 }
 0x555   : > { %2734 = vrot.lane.b32.xlu0 %v6695_v52, %s5002_s8 }
 0x556   : > { %v2516_v21 = vpop.permute.xlu1 %2515 }
 0x557   : > { %v2518_v17 = vpop.permute.xlu0 %2517 }
 0x558   : > { %2736 = vrot.lane.b32.xlu1 %v6703_v3, %s5002_s8  ;;  %v2577_v16 = vsel %vm486_vm11, %v2516_v21, %v2518_v17 }
 0x559   : > { %2738 = vrot.lane.b32.xlu0 %v6697_v57, %s5002_s8 }
 0x55a   : > { %v2520_v22 = vpop.permute.xlu1 %2519 }
 0x55b   : > { %v2522_v27 = vpop.permute.xlu0 %2521  ;;  %v2578_v39 = vsel %vm486_vm11, %v2518_v17, %v2520_v22 }
 0x55c   : > { %2740 = vrot.lane.b32.xlu1 %v6710_v25, %s5002_s8  ;;  %2624 = vmatprep.subr.bf16.mxu1 %v2578_v39 }
 0x55d   : > { %2742 = vrot.lane.b32.xlu0 %v6720_v31, %s5002_s8  ;;  %2625 = vmatpush1.bf16.msra.mxu1 %v2577_v16 }
 0x55e   : > { %v2524_v38 = vpop.permute.xlu1 %2523 }
 0x55f   : > { %v2526_v13 = vpop.permute.xlu0 %2525  ;;  %v2579_v19 = vsel %vm486_vm11, %v2522_v27, %v2524_v38 }
 0x560   : > { %2744 = vrot.lane.b32.xlu1 %v6716_v32, %s5002_s8  ;;  %v2580_v60 = vsel %vm486_vm11, %v2524_v38, %v2526_v13  ;;  %s6932_s8 = scalar_lea.vmem [#allocation7], %s4494_s7 }
 0x561   : > { %2851 = vrot.lane.b32.xlu0 %v6528_v8, %s5003_s20  ;;  %2626 = vmatprep.subr.bf16.mxu1 %v2580_v60 }
 0x562   : > { %2627 = vmatpush1.bf16.msra.mxu1 %v2579_v19  ;;  %v2528_v45 = vpop.permute.xlu1 %2527 }
 0x563   : > { %v2530_v61 = vpop.permute.xlu0 %2529 }
 0x564   : > { %2853 = vrot.lane.b32.xlu1 %v6533_v47, %s5003_s20  ;;  %v2581_v37 = vsel %vm486_vm11, %v2528_v45, %v2530_v61 }
 0x565   : > { %2855 = vrot.lane.b32.xlu0 %v6465_v50, %s5003_s20 }
 0x566   : > { %v2532_v33 = vpop.permute.xlu1 %2531 }
 0x567   : > { %v2534_v24 = vpop.permute.xlu0 %2533  ;;  %v2582_v15 = vsel %vm486_vm11, %v2530_v61, %v2532_v33 }
 0x568   : > { %2857 = vrot.lane.b32.xlu1 %v6559_v41, %s5003_s20  ;;  %2628 = vmatprep.subr.bf16.mxu1 %v2582_v15 }
 0x569   : > { %2859 = vrot.lane.b32.xlu0 %v6567_v5, %s5003_s20  ;;  %2629 = vmatpush1.bf16.msra.mxu1 %v2581_v37 }
 0x56a   : > { %v2536_v63 = vpop.permute.xlu1 %2535 }
 0x56b   : > { %v2538_v30 = vpop.permute.xlu0 %2537  ;;  %v2583_v0 = vsel %vm486_vm11, %v2534_v24, %v2536_v63 }
 0x56c   : > { %2861 = vrot.lane.b32.xlu1 %v6561_v28, %s5003_s20  ;;  %v2584_v1 = vsel %vm486_vm11, %v2536_v63, %v2538_v30 }
 0x56d   : > { %2863 = vrot.lane.b32.xlu0 %v6574_v35, %s5003_s20  ;;  %2630 = vmatprep.subr.bf16.mxu1 %v2584_v1 }
 0x56e   : > { %2631 = vmatpush1.bf16.msra.mxu1 %v2583_v0  ;;  %v2540_v6 = vpop.permute.xlu1 %2539 }
 0x56f   : > { %v2542_v44 = vpop.permute.xlu0 %2541 }
 0x570   : > { %2865 = vrot.lane.b32.xlu1 %v6584_v59, %s5003_s20  ;;  %v2585_v7 = vsel %vm486_vm11, %v2540_v6, %v2542_v44 }
 0x571   : > { %2867 = vrot.lane.b32.xlu0 %v6580_v23, %s5003_s20 }
 0x572   : > { %v2544_v53 = vpop.permute.xlu1 %2543 }
 0x573   : > { %v2546_v4 = vpop.permute.xlu0 %2545  ;;  %v2586_v58 = vsel %vm486_vm11, %v2542_v44, %v2544_v53  ;;  %v4813_v44 = vld [vmem:[#allocation5 + $0x10] ss:$8 sps:$4 sm:$0xff]  }
 0x574   : > { %2869 = vrot.lane.b32.xlu1 %v6593_v54, %s5003_s20  ;;  %2632 = vmatprep.subr.bf16.mxu1 %v2586_v58 }
 0x575   : > { %2871 = vrot.lane.b32.xlu0 %v6601_v14, %s5003_s20  ;;  %2633 = vmatpush1.bf16.msra.mxu1 %v2585_v7  ;;  %v6870_v7 = vld [vmem:[%s5175_s9 + $0x10] ss:$28 sps:$4 sm:$0xff]  }
 0x576   : > { %v2548_v29 = vpop.permute.xlu1 %2547 }
 0x577   : > { %v2550_v12 = vpop.permute.xlu0 %2549  ;;  %v2587_v2 = vsel %vm486_vm11, %v2546_v4, %v2548_v29  ;;  %v4815_v4 = vld [vmem:[#allocation5 + $0x24] ss:$8 sps:$4 sm:$0xff]  }
 0x578   : > { %2873 = vrot.lane.b32.xlu1 %v6595_v34, %s5003_s20  ;;  %v2588_v21 = vsel %vm486_vm11, %v2548_v29, %v2550_v12  ;;  %v6875_v29 = vld [vmem:[%s5175_s9 + $0x14] ss:$28 sps:$4 sm:$0xff]  }
 0x579   : > { %2877 = vrot.lane.b32.xlu0 %v6618_v49, %s5003_s20  ;;  %2634 = vmatprep.subr.bf16.mxu1 %v2588_v21 }
 0x57a   : > { %2635 = vmatpush1.bf16.msra.mxu1 %v2587_v2  ;;  %v2552_v17 = vpop.permute.xlu1 %2551 }
 0x57b   : > { %v2554_v22 = vpop.permute.xlu0 %2553 }
 0x57c   : > { %2879 = vrot.lane.b32.xlu1 %v6614_v56, %s5003_s20  ;;  %v2589_v38 = vsel %vm486_vm11, %v2552_v17, %v2554_v22 }
 0x57d   : > { %2875 = vrot.lane.b32.xlu0 %v6608_v46, %s5003_s20 }
 0x57e   : > { %v2556_v27 = vpop.permute.xlu1 %2555 }
 0x57f   : > { %v2558_v39 = vpop.permute.xlu0 %2557  ;;  %v2590_v16 = vsel %vm486_vm11, %v2554_v22, %v2556_v27  ;;  %v6883_v22 = vld [vmem:[%s5175_s9 + $0xc] ss:$28 sps:$4 sm:$0xff]  }
 0x580   : > { %2883 = vrot.lane.b32.xlu1 %v6635_v42, %s5003_s20  ;;  %2636 = vmatprep.subr.bf16.mxu1 %v2590_v16 }
 0x581   : > { %2885 = vrot.lane.b32.xlu0 %v6629_v51, %s5003_s20  ;;  %2637 = vmatpush1.bf16.msra.mxu1 %v2589_v38 }
 0x582   : > { %v2560_v13 = vpop.permute.xlu1 %2559 }
 0x583   : > { %v2562_v19 = vpop.permute.xlu0 %2561  ;;  %v2591_v60 = vsel %vm486_vm11, %v2558_v39, %v2560_v13 }
 0x584   : > { %2881 = vrot.lane.b32.xlu1 %v6627_v62, %s5003_s20  ;;  %v2592_v45 = vsel %vm486_vm11, %v2560_v13, %v2562_v19 }
 0x585   : > { %2889 = vrot.lane.b32.xlu0 %v6652_v36, %s5003_s20  ;;  %2638 = vmatprep.subr.bf16.mxu1 %v2592_v45 }
 0x586   : > { %2639 = vmatpush1.bf16.msra.mxu1 %v2591_v60  ;;  %v2564_v61 = vpop.permute.xlu1 %2563 }
 0x587   : > { %v2566_v33 = vpop.permute.xlu0 %2565 }
 0x588   : > { %2891 = vrot.lane.b32.xlu1 %v6648_v20, %s5003_s20  ;;  %v2593_v63 = vsel %vm486_vm11, %v2564_v61, %v2566_v33 }
 0x589   : > { %2887 = vrot.lane.b32.xlu0 %v6642_v18, %s5003_s20 }
 0x58a   : > { %v2568_v24 = vpop.permute.xlu1 %2567 }
 0x58b   : > { %v2570_v15 = vpop.permute.xlu0 %2569  ;;  %v2594_v37 = vsel %vm486_vm11, %v2566_v33, %v2568_v24 }
 0x58c   : > { %2895 = vrot.lane.b32.xlu1 %v6669_v48, %s5003_s20  ;;  %2640 = vmatprep.subr.bf16.mxu1 %v2594_v37 }
 0x58d   : > { %2897 = vrot.lane.b32.xlu0 %v6663_v55, %s5003_s20  ;;  %2641 = vmatpush1.bf16.msra.mxu1 %v2593_v63 }
 0x58e   : > { %v2572_v30 = vpop.permute.xlu1 %2571 }
 0x58f   : > { %v2574_v0 = vpop.permute.xlu0 %2573  ;;  %v2595_v1 = vsel %vm486_vm11, %v2570_v15, %v2572_v30 }
 0x590   : > { %2893 = vrot.lane.b32.xlu1 %v6661_v43, %s5003_s20  ;;  %v2596_v6 = vsel %vm486_vm11, %v2572_v30, %v2574_v0  ;;  %vm7867_vm11 = vcmask 195584  }
 0x591   : > { %2901 = vrot.lane.b32.xlu0 %v6686_v26, %s5003_s20  ;;  %2642 = vmatprep.subr.bf16.mxu1 %v2596_v6 }
 0x592   : > { %2643 = vmatpush1.bf16.msra.mxu1 %v2595_v1  ;;  %v2681_v53 = vpop.permute.xlu1 %2680 }
 0x593   : > { %v2683_v58 = vpop.permute.xlu0 %2682 }
 0x594   : > { %2903 = vrot.lane.b32.xlu1 %v6682_v40, %s5003_s20  ;;  %v2746_v17 = vsel %vm659_vm12, %v2681_v53, %v2683_v58 }
 0x595   : > { %2899 = vrot.lane.b32.xlu0 %v6676_v10, %s5003_s20  ;;  %2655 = vmatmul.mubr.bf16.vlgmr.msra.gmra.mrb[0].mxu1 %v4813_v44 }
 0x596   : > { %v2685_v12 = vpop.permute.xlu1 %2684  ;;  %4548 = vmatprep.mubr.msk.bf16.mxu1 %vm357_vm3, %v4815_v4 }
 0x597   : > { %v2687_v2 = vpop.permute.xlu0 %2686  ;;  %v2747_v21 = vsel %vm659_vm12, %v2683_v58, %v2685_v12 }
 0x598   : > { %3201 = vrot.lane.b32.xlu1 %v6870_v7, %s4991_s26  ;;  %2793 = vmatprep.subr.bf16.mxu1 %v2747_v21 }
 0x599   : > { %3203 = vrot.lane.b32.xlu0 %v6875_v29, %s4991_s26  ;;  %2794 = vmatpush1.bf16.msra.mxu1 %v2746_v17 }
 0x59a   : > { %v2689_v27 = vpop.permute.xlu1 %2688 }
 0x59b   : > { %v2691_v39 = vpop.permute.xlu0 %2690  ;;  %v2748_v16 = vsel %vm659_vm12, %v2687_v2, %v2689_v27 }
 0x59c   : > { %3199 = vrot.lane.b32.xlu1 %v6883_v22, %s4991_s26  ;;  %v2749_v38 = vsel %vm659_vm12, %v2689_v27, %v2691_v39 }
 0x59d   : > { %2907 = vrot.lane.b32.xlu0 %v6703_v3, %s5003_s20  ;;  %2795 = vmatprep.subr.bf16.mxu1 %v2749_v38 }
 0x59e   : > { %2796 = vmatpush1.bf16.msra.mxu1 %v2748_v16  ;;  %v2693_v13 = vpop.permute.xlu1 %2692 }
 0x59f   : > { %v2695_v19 = vpop.permute.xlu0 %2694 }
 0x5a0   : > { %2909 = vrot.lane.b32.xlu1 %v6697_v57, %s5003_s20  ;;  %v2750_v33 = vsel %vm659_vm12, %v2693_v13, %v2695_v19 }
 0x5a1   : > { %2905 = vrot.lane.b32.xlu0 %v6695_v52, %s5003_s20 }
 0x5a2   : > { %v2697_v60 = vpop.permute.xlu1 %2696 }
 0x5a3   : > { %v2699_v45 = vpop.permute.xlu0 %2698  ;;  %v2751_v61 = vsel %vm659_vm12, %v2695_v19, %v2697_v60 }
 0x5a4   : > { %3209 = vrot.lane.b32.xlu1 %v6870_v7, %s4992_s5  ;;  %2797 = vmatprep.subr.bf16.mxu1 %v2751_v61 }
 0x5a5   : > { %3211 = vrot.lane.b32.xlu0 %v6875_v29, %s4992_s5  ;;  %2798 = vmatpush1.bf16.msra.mxu1 %v2750_v33 }
 0x5a6   : > { %v2701_v24 = vpop.permute.xlu1 %2700 }
 0x5a7   : > { %v2703_v15 = vpop.permute.xlu0 %2702  ;;  %v2752_v37 = vsel %vm659_vm12, %v2699_v45, %v2701_v24 }
 0x5a8   : > { %3207 = vrot.lane.b32.xlu1 %v6883_v22, %s4992_s5  ;;  %v2753_v63 = vsel %vm659_vm12, %v2701_v24, %v2703_v15 }
 0x5a9   : > { %2913 = vrot.lane.b32.xlu0 %v6720_v31, %s5003_s20  ;;  %2799 = vmatprep.subr.bf16.mxu1 %v2753_v63 }
 0x5aa   : > { %2800 = vmatpush1.bf16.msra.mxu1 %v2752_v37  ;;  %v2705_v30 = vpop.permute.xlu1 %2704 }
 0x5ab   : > { %v2707_v0 = vpop.permute.xlu0 %2706 }
 0x5ac   : > { %2915 = vrot.lane.b32.xlu1 %v6716_v32, %s5003_s20  ;;  %v2754_v53 = vsel %vm659_vm12, %v2705_v30, %v2707_v0 }
 0x5ad   : > { %2911 = vrot.lane.b32.xlu0 %v6710_v25, %s5003_s20  ;;  %s7877_s20 = smov 100  }
 0x5ae   : > { %v2709_v1 = vpop.permute.xlu1 %2708 }
 0x5af   : > { %v2711_v6 = vpop.permute.xlu0 %2710  ;;  %v2755_v44 = vsel %vm659_vm12, %v2707_v0, %v2709_v1 }
 0x5b0   : > { %3217 = vrot.lane.b32.xlu1 %v6870_v7, %s4993_s10  ;;  %2801 = vmatprep.subr.bf16.mxu1 %v2755_v44 }
 0x5b1   : > { %3219 = vrot.lane.b32.xlu0 %v6875_v29, %s4993_s10  ;;  %2802 = vmatpush1.bf16.msra.mxu1 %v2754_v53 }
 0x5b2   : > { %v2713_v4 = vpop.permute.xlu1 %2712 }
 0x5b3   : > { %v2715_v58 = vpop.permute.xlu0 %2714  ;;  %v2756_v12 = vsel %vm659_vm12, %v2711_v6, %v2713_v4 }
 0x5b4   : > { %3215 = vrot.lane.b32.xlu1 %v6883_v22, %s4993_s10  ;;  %v2757_v2 = vsel %vm659_vm12, %v2713_v4, %v2715_v58 }
 0x5b5   : > { %3024 = vrot.lane.b32.xlu0 %v6533_v47, %s5004_s4  ;;  %2803 = vmatprep.subr.bf16.mxu1 %v2757_v2 }
 0x5b6   : > { %2804 = vmatpush1.bf16.msra.mxu1 %v2756_v12  ;;  %v2717_v21 = vpop.permute.xlu1 %2716 }
 0x5b7   : > { %v2719_v17 = vpop.permute.xlu0 %2718  ;;  %v2301_v27 = vpop.f32.mrb[0].mxu0 }
 0x5b8   : > { %v4585_v39 = vadd.f32 %v2301_v27, %v5268_v9  ;;  %v2303_v16 = vpop.f32.mrb[1].mxu0  ;;  %3026 = vrot.lane.b32.xlu1 %v6465_v50, %s5004_s4 }
 0x5b9   : > { %v4586_v38 = vadd.f32 %v2303_v16, %v5268_v9  ;;  %3022 = vrot.lane.b32.xlu0 %v6528_v8, %s5004_s4  ;;  %v2305_v13 = vpop.f32.mrb[2].mxu0  ;;  %v2758_v8 = vsel %vm659_vm12, %v2717_v21, %v2719_v17 }
 0x5ba   : > { %2314 = vst [vmem:[%s6932_s8] sm:$0xff] %v4585_v39  ;;  %v4587_v47 = vadd.f32 %v2305_v13, %v5274_v11  ;;  %v2307_v19 = vpop.f32.mrb[3].mxu0  ;;  %v2721_v60 = vpop.permute.xlu1 %2720 }
 0x5bb   : > { %2315 = vst [vmem:[%s6932_s8 + $0x8] sm:$0xff] %v4586_v38  ;;  %v4588_v50 = vadd.f32 %v2307_v19, %v5274_v11  ;;  %v2723_v45 = vpop.permute.xlu0 %2722  ;;  %v2759_v61 = vsel %vm659_vm12, %v2719_v17, %v2721_v60  ;;  %v4817_v17 = vld [vmem:[#allocation5 + $0x20] ss:$8 sps:$4 sm:$0xff]  }
 0x5bc   : > { %2316 = vst [vmem:[%s6932_s8 + $0x20] sm:$0xff] %v4587_v47  ;;  %3225 = vrot.lane.b32.xlu1 %v6870_v7, %s4994_s11  ;;  %2805 = vmatprep.subr.bf16.mxu1 %v2759_v61 }
 0x5bd   : > { %2317 = vst [vmem:[%s6932_s8 + $0x28] sm:$0xff] %v4588_v50  ;;  %3227 = vrot.lane.b32.xlu0 %v6875_v29, %s4994_s11  ;;  %2806 = vmatpush1.bf16.msra.mxu1 %v2758_v8 }
 0x5be   : > { %v2725_v33 = vpop.permute.xlu1 %2724 }
 0x5bf   : > { %v2727_v24 = vpop.permute.xlu0 %2726  ;;  %v2760_v15 = vsel %vm659_vm12, %v2723_v45, %v2725_v33 }
 0x5c0   : > { %3223 = vrot.lane.b32.xlu1 %v6883_v22, %s4994_s11  ;;  %v2761_v37 = vsel %vm659_vm12, %v2725_v33, %v2727_v24 }
 0x5c1   : > { %3030 = vrot.lane.b32.xlu0 %v6567_v5, %s5004_s4  ;;  %2807 = vmatprep.subr.bf16.mxu1 %v2761_v37 }
 0x5c2   : > { %2808 = vmatpush1.bf16.msra.mxu1 %v2760_v15  ;;  %v2729_v63 = vpop.permute.xlu1 %2728 }
 0x5c3   : > { %v2731_v30 = vpop.permute.xlu0 %2730 }
 0x5c4   : > { %3032 = vrot.lane.b32.xlu1 %v6561_v28, %s5004_s4  ;;  %v2762_v5 = vsel %vm659_vm12, %v2729_v63, %v2731_v30 }
 0x5c5   : > { %3028 = vrot.lane.b32.xlu0 %v6559_v41, %s5004_s4 }
 0x5c6   : > { %v2733_v0 = vpop.permute.xlu1 %2732 }
 0x5c7   : > { %v2735_v1 = vpop.permute.xlu0 %2734  ;;  %v2763_v6 = vsel %vm659_vm12, %v2731_v30, %v2733_v0 }
 0x5c8   : > { %3233 = vrot.lane.b32.xlu1 %v6870_v7, %s4995_s27  ;;  %2809 = vmatprep.subr.bf16.mxu1 %v2763_v6 }
 0x5c9   : > { %3235 = vrot.lane.b32.xlu0 %v6875_v29, %s4995_s27  ;;  %2810 = vmatpush1.bf16.msra.mxu1 %v2762_v5 }
 0x5ca   : > { %v2737_v44 = vpop.permute.xlu1 %2736 }
 0x5cb   : > { %v2739_v53 = vpop.permute.xlu0 %2738  ;;  %v2764_v28 = vsel %vm659_vm12, %v2735_v1, %v2737_v44 }
 0x5cc   : > { %3231 = vrot.lane.b32.xlu1 %v6883_v22, %s4995_s27  ;;  %v2765_v41 = vsel %vm659_vm12, %v2737_v44, %v2739_v53 }
 0x5cd   : > { %3036 = vrot.lane.b32.xlu0 %v6584_v59, %s5004_s4  ;;  %2811 = vmatprep.subr.bf16.mxu1 %v2765_v41 }
 0x5ce   : > { %2812 = vmatpush1.bf16.msra.mxu1 %v2764_v28  ;;  %v2741_v4 = vpop.permute.xlu1 %2740 }
 0x5cf   : > { %v2743_v58 = vpop.permute.xlu0 %2742 }
 0x5d0   : > { %3038 = vrot.lane.b32.xlu1 %v6580_v23, %s5004_s4  ;;  %v2766_v59 = vsel %vm659_vm12, %v2741_v4, %v2743_v58  ;;  %v4818_v23 = vld [vmem:[#allocation5 + $0x34] ss:$8 sps:$4 sm:$0xff]  }
 0x5d1   : > { %3034 = vrot.lane.b32.xlu0 %v6574_v35, %s5004_s4 }
 0x5d2   : > { %v2745_v12 = vpop.permute.xlu1 %2744 }
 0x5d3   : > { %v2852_v2 = vpop.permute.xlu0 %2851  ;;  %v2767_v21 = vsel %vm659_vm12, %v2743_v58, %v2745_v12  ;;  %vm7868_vm12 = vmmov %vm7867_vm11 }
 0x5d4   : > { %3241 = vrot.lane.b32.xlu1 %v6870_v7, %s4996_s28  ;;  %2813 = vmatprep.subr.bf16.mxu1 %v2767_v21 }
 0x5d5   : > { %3243 = vrot.lane.b32.xlu0 %v6875_v29, %s4996_s28  ;;  %2814 = vmatpush1.bf16.msra.mxu1 %v2766_v59 }
 0x5d6   : > { %v2854_v27 = vpop.permute.xlu1 %2853 }
 0x5d7   : > { %v2856_v39 = vpop.permute.xlu0 %2855  ;;  %v2917_v35 = vsel %vm832_vm13, %v2852_v2, %v2854_v27 }
 0x5d8   : > { %3239 = vrot.lane.b32.xlu1 %v6883_v22, %s4996_s28  ;;  %v2918_v16 = vsel %vm832_vm13, %v2854_v27, %v2856_v39  ;;  %2826 = vmatmul.mubr.bf16.vlgmr.msra.gmra.mrb[0].mxu1 %v4817_v17 }
 0x5d9   : > { %3042 = vrot.lane.b32.xlu0 %v6601_v14, %s5004_s4  ;;  %2964 = vmatprep.subr.bf16.mxu1 %v2918_v16 }
 0x5da   : > { %2965 = vmatpush1.bf16.msra.mxu1 %v2917_v35  ;;  %v2858_v38 = vpop.permute.xlu1 %2857  ;;  %4551 = vmatprep.mubr.msk.bf16.mxu1 %vm357_vm3, %v4818_v23 }
 0x5db   : > { %v2860_v13 = vpop.permute.xlu0 %2859 }
 0x5dc   : > { %3044 = vrot.lane.b32.xlu1 %v6595_v34, %s5004_s4  ;;  %v2919_v14 = vsel %vm832_vm13, %v2858_v38, %v2860_v13 }
 0x5dd   : > { %3040 = vrot.lane.b32.xlu0 %v6593_v54, %s5004_s4 }
 0x5de   : > { %v2862_v47 = vpop.permute.xlu1 %2861 }
 0x5df   : > { %v2864_v19 = vpop.permute.xlu0 %2863  ;;  %v2920_v60 = vsel %vm832_vm13, %v2860_v13, %v2862_v47 }
 0x5e0   : > { %3249 = vrot.lane.b32.xlu1 %v6870_v7, %s4997_s29  ;;  %2966 = vmatprep.subr.bf16.mxu1 %v2920_v60 }
 0x5e1   : > { %3251 = vrot.lane.b32.xlu0 %v6875_v29, %s4997_s29  ;;  %2967 = vmatpush1.bf16.msra.mxu1 %v2919_v14 }
 0x5e2   : > { %v2866_v50 = vpop.permute.xlu1 %2865 }
 0x5e3   : > { %v2868_v45 = vpop.permute.xlu0 %2867  ;;  %v2921_v34 = vsel %vm832_vm13, %v2864_v19, %v2866_v50 }
 0x5e4   : > { %3247 = vrot.lane.b32.xlu1 %v6883_v22, %s4997_s29  ;;  %v2922_v54 = vsel %vm832_vm13, %v2866_v50, %v2868_v45 }
 0x5e5   : > { %3048 = vrot.lane.b32.xlu0 %v6618_v49, %s5004_s4  ;;  %2968 = vmatprep.subr.bf16.mxu1 %v2922_v54 }
 0x5e6   : > { %2969 = vmatpush1.bf16.msra.mxu1 %v2921_v34  ;;  %v2870_v61 = vpop.permute.xlu1 %2869 }
 0x5e7   : > { %v2872_v8 = vpop.permute.xlu0 %2871 }
 0x5e8   : > { %3050 = vrot.lane.b32.xlu1 %v6614_v56, %s5004_s4  ;;  %v2923_v49 = vsel %vm832_vm13, %v2870_v61, %v2872_v8 }
 0x5e9   : > { %3046 = vrot.lane.b32.xlu0 %v6608_v46, %s5004_s4 }
 0x5ea   : > { %v2874_v33 = vpop.permute.xlu1 %2873 }
 0x5eb   : > { %v2878_v24 = vpop.permute.xlu0 %2877  ;;  %v2924_v15 = vsel %vm832_vm13, %v2872_v8, %v2874_v33 }
 0x5ec   : > { %3257 = vrot.lane.b32.xlu1 %v6870_v7, %s4998_s23  ;;  %2970 = vmatprep.subr.bf16.mxu1 %v2924_v15 }
 0x5ed   : > { %3259 = vrot.lane.b32.xlu0 %v6875_v29, %s4998_s23  ;;  %2971 = vmatpush1.bf16.msra.mxu1 %v2923_v49 }
 0x5ee   : > { %v2880_v37 = vpop.permute.xlu1 %2879 }
 0x5ef   : > { %v2876_v63 = vpop.permute.xlu0 %2875  ;;  %v2926_v56 = vsel %vm832_vm13, %v2878_v24, %v2880_v37 }
 0x5f0   : > { %v2925_v46 = vsel %vm832_vm13, %v2876_v63, %v2878_v24  ;;  %3255 = vrot.lane.b32.xlu1 %v6883_v22, %s4998_s23  ;;  %2972 = vmatprep.subr.bf16.mxu1 %v2926_v56 }
 0x5f1   : > { %3054 = vrot.lane.b32.xlu0 %v6635_v42, %s5004_s4  ;;  %2973 = vmatpush1.bf16.msra.mxu1 %v2925_v46 }
 0x5f2   : > { %v2884_v30 = vpop.permute.xlu1 %2883 }
 0x5f3   : > { %v2886_v0 = vpop.permute.xlu0 %2885 }
 0x5f4   : > { %3056 = vrot.lane.b32.xlu1 %v6629_v51, %s5004_s4  ;;  %v2928_v1 = vsel %vm832_vm13, %v2884_v30, %v2886_v0 }
 0x5f5   : > { %3052 = vrot.lane.b32.xlu0 %v6627_v62, %s5004_s4  ;;  %2974 = vmatprep.subr.bf16.mxu1 %v2928_v1 }
 0x5f6   : > { %v2882_v6 = vpop.permute.xlu1 %2881 }
 0x5f7   : > { %v2927_v5 = vsel %vm832_vm13, %v2882_v6, %v2884_v30  ;;  %v2890_v44 = vpop.permute.xlu0 %2889 }
 0x5f8   : > { %3265 = vrot.lane.b32.xlu1 %v6870_v7, %s4999_s30  ;;  %2975 = vmatpush1.bf16.msra.mxu1 %v2927_v5 }
 0x5f9   : > { %3267 = vrot.lane.b32.xlu0 %v6875_v29, %s4999_s30 }
 0x5fa   : > { %v2892_v42 = vpop.permute.xlu1 %2891 }
 0x5fb   : > { %v2888_v53 = vpop.permute.xlu0 %2887  ;;  %v2930_v51 = vsel %vm832_vm13, %v2890_v44, %v2892_v42 }
 0x5fc   : > { %v2929_v28 = vsel %vm832_vm13, %v2888_v53, %v2890_v44  ;;  %3263 = vrot.lane.b32.xlu1 %v6883_v22, %s4999_s30  ;;  %2976 = vmatprep.subr.bf16.mxu1 %v2930_v51 }
 0x5fd   : > { %3060 = vrot.lane.b32.xlu0 %v6652_v36, %s5004_s4  ;;  %2977 = vmatpush1.bf16.msra.mxu1 %v2929_v28 }
 0x5fe   : > { %v2896_v62 = vpop.permute.xlu1 %2895 }
 0x5ff   : > { %v2898_v41 = vpop.permute.xlu0 %2897 }
 0x600   : > { %3062 = vrot.lane.b32.xlu1 %v6648_v20, %s5004_s4  ;;  %v2932_v4 = vsel %vm832_vm13, %v2896_v62, %v2898_v41 }
 0x601   : > { %3058 = vrot.lane.b32.xlu0 %v6642_v18, %s5004_s4  ;;  %2978 = vmatprep.subr.bf16.mxu1 %v2932_v4 }
 0x602   : > { %v2894_v58 = vpop.permute.xlu1 %2893 }
 0x603   : > { %v2931_v12 = vsel %vm832_vm13, %v2894_v58, %v2896_v62  ;;  %v2902_v2 = vpop.permute.xlu0 %2901 }
 0x604   : > { %3273 = vrot.lane.b32.xlu1 %v6870_v7, %s5000_s25  ;;  %2979 = vmatpush1.bf16.msra.mxu1 %v2931_v12 }
 0x605   : > { %3275 = vrot.lane.b32.xlu0 %v6875_v29, %s5000_s25 }
 0x606   : > { %v2904_v36 = vpop.permute.xlu1 %2903 }
 0x607   : > { %v2900_v21 = vpop.permute.xlu0 %2899  ;;  %v2934_v20 = vsel %vm832_vm13, %v2902_v2, %v2904_v36 }
 0x608   : > { %v2933_v59 = vsel %vm832_vm13, %v2900_v21, %v2902_v2  ;;  %3271 = vrot.lane.b32.xlu1 %v6883_v22, %s5000_s25  ;;  %2980 = vmatprep.subr.bf16.mxu1 %v2934_v20 }
 0x609   : > { %3066 = vrot.lane.b32.xlu0 %v6669_v48, %s5004_s4  ;;  %2981 = vmatpush1.bf16.msra.mxu1 %v2933_v59 }
 0x60a   : > { %v3202_v18 = vpop.permute.xlu1 %3201 }
 0x60b   : > { %v7049_v17 = vpop.permute.xlu0 %3203 }
 0x60c   : > { %3068 = vrot.lane.b32.xlu1 %v6663_v55, %s5004_s4 }
 0x60d   : > { %3064 = vrot.lane.b32.xlu0 %v6661_v43, %s5004_s4 }
 0x60e   : > { %v3200_v27 = vpop.permute.xlu1 %3199 }
 0x60f   : > { %v2908_v23 = vpop.permute.xlu0 %2907  ;;  %v7088_v19 = vsel %vm242_vm0, %v3200_v27, %v3202_v18 }
 0x610   : > { %3072 = vrot.lane.b32.xlu1 %v6686_v26, %s5004_s4 }
 0x611   : > { %3074 = vrot.lane.b32.xlu0 %v6682_v40, %s5004_s4 }
 0x612   : > { %v2910_v39 = vpop.permute.xlu1 %2909 }
 0x613   : > { %v2906_v48 = vpop.permute.xlu0 %2905  ;;  %v2936_v35 = vsel %vm832_vm13, %v2908_v23, %v2910_v39 }
 0x614   : > { %v2935_v16 = vsel %vm832_vm13, %v2906_v48, %v2908_v23  ;;  %3070 = vrot.lane.b32.xlu1 %v6676_v10, %s5004_s4  ;;  %2982 = vmatprep.subr.bf16.mxu1 %v2936_v35 }
 0x615   : > { %3078 = vrot.lane.b32.xlu0 %v6703_v3, %s5004_s4  ;;  %2983 = vmatpush1.bf16.msra.mxu1 %v2935_v16 }
 0x616   : > { %v3210_v43 = vpop.permute.xlu1 %3209 }
 0x617   : > { %v7065_v55 = vpop.permute.xlu0 %3211 }
 0x618   : > { %3080 = vrot.lane.b32.xlu1 %v6697_v57, %s5004_s4  ;;  %v4820_v57 = vld [vmem:[#allocation5 + $0x30] ss:$8 sps:$4 sm:$0xff]   ;;  %v7097_v14 = vsel %vm253_vm1, %v3210_v43, %v7065_v55 }
 0x619   : > { %3076 = vrot.lane.b32.xlu0 %v6695_v52, %s5004_s4  ;;  %v7081_v52 = vsel %vm242_vm0, %v3202_v18, %v7049_v17 }
 0x61a   : > { %v3208_v40 = vpop.permute.xlu1 %3207 }
 0x61b   : > { %v2914_v26 = vpop.permute.xlu0 %2913  ;;  %v7104_v45 = vsel %vm253_vm1, %v3208_v40, %v3210_v43 }
 0x61c   : > { %3084 = vrot.lane.b32.xlu1 %v6720_v31, %s5004_s4 }
 0x61d   : > { %3086 = vrot.lane.b32.xlu0 %v6716_v32, %s5004_s4  ;;  %v4821_v32 = vld [vmem:[#allocation5 + $0x44] ss:$8 sps:$4 sm:$0xff]  }
 0x61e   : > { %v2916_v10 = vpop.permute.xlu1 %2915 }
 0x61f   : > { %v2912_v3 = vpop.permute.xlu0 %2911  ;;  %v2938_v38 = vsel %vm832_vm13, %v2914_v26, %v2916_v10 }
 0x620   : > { %v2937_v13 = vsel %vm832_vm13, %v2912_v3, %v2914_v26  ;;  %3082 = vrot.lane.b32.xlu1 %v6710_v25, %s5004_s4  ;;  %2984 = vmatprep.subr.bf16.mxu1 %v2938_v38  ;;  %vm7869_vm13 = vmmov %vm7867_vm11  ;;  %s7883_s4 = smov 74  }
 0x621   : > { %3292 = vrot.lane.b32.xlu0 %v7081_v52, %s4992_s5  ;;  %2985 = vmatpush1.bf16.msra.mxu1 %v2937_v13 }
 0x622   : > { %v3218_v31 = vpop.permute.xlu1 %3217 }
 0x623   : > { %v7085_v47 = vpop.permute.xlu0 %3219 }
 0x624   : > { %3294 = vrot.lane.b32.xlu1 %v7049_v17, %s4992_s5  ;;  %2997 = vmatmul.mubr.bf16.vlgmr.msra.gmra.mrb[0].mxu1 %v4820_v57  ;;  %v7112_v8 = vsel %vm264_vm2, %v3218_v31, %v7085_v47 }
 0x625   : > { %3290 = vrot.lane.b32.xlu0 %v7088_v19, %s4992_s5  ;;  %4554 = vmatprep.mubr.msk.bf16.mxu1 %vm357_vm3, %v4821_v32 }
 0x626   : > { %v3216_v25 = vpop.permute.xlu1 %3215 }
 0x627   : > { %v3025_v60 = vpop.permute.xlu0 %3024  ;;  %v7119_v15 = vsel %vm264_vm2, %v3216_v25, %v3218_v31 }
 0x628   : > { %3298 = vrot.lane.b32.xlu1 %v7097_v14, %s4992_s5 }
 0x629   : > { %3300 = vrot.lane.b32.xlu0 %v7065_v55, %s4992_s5 }
 0x62a   : > { %v3027_v50 = vpop.permute.xlu1 %3026 }
 0x62b   : > { %v3023_v34 = vpop.permute.xlu0 %3022  ;;  %v3089_v54 = vsel %vm7867_vm11, %v3025_v60, %v3027_v50 }
 0x62c   : > { %v3088_v61 = vsel %vm7868_vm12, %v3023_v34, %v3025_v60  ;;  %3296 = vrot.lane.b32.xlu1 %v7104_v45, %s4992_s5  ;;  %3135 = vmatprep.subr.bf16.mxu1 %v3089_v54  ;;  %vm7870_vm12 = vmmov %vm7867_vm11 }
 0x62d   : > { %3304 = vrot.lane.b32.xlu0 %v7112_v8, %s4992_s5  ;;  %3136 = vmatpush1.bf16.msra.mxu1 %v3088_v61 }
 0x62e   : > { %v3226_v33 = vpop.permute.xlu1 %3225 }
 0x62f   : > { %v7116_v24 = vpop.permute.xlu0 %3227 }
 0x630   : > { %3306 = vrot.lane.b32.xlu1 %v7085_v47, %s4992_s5  ;;  %v7127_v63 = vsel %vm275_vm4, %v3226_v33, %v7116_v24 }
 0x631   : > { %3302 = vrot.lane.b32.xlu0 %v7119_v15, %s4992_s5 }
 0x632   : > { %v3224_v49 = vpop.permute.xlu1 %3223 }
 0x633   : > { %v3031_v37 = vpop.permute.xlu0 %3030  ;;  %v7134_v46 = vsel %vm275_vm4, %v3224_v49, %v3226_v33 }
 0x634   : > { %3310 = vrot.lane.b32.xlu1 %v7127_v63, %s4992_s5 }
 0x635   : > { %3312 = vrot.lane.b32.xlu0 %v7116_v24, %s4992_s5 }
 0x636   : > { %v3033_v56 = vpop.permute.xlu1 %3032 }
 0x637   : > { %v3029_v30 = vpop.permute.xlu0 %3028  ;;  %v3091_v0 = vsel %vm7869_vm13, %v3031_v37, %v3033_v56  ;;  %vm7871_vm13 = vmmov %vm7867_vm11 }
 0x638   : > { %v3090_v1 = vsel %vm7867_vm11, %v3029_v30, %v3031_v37  ;;  %3308 = vrot.lane.b32.xlu1 %v7134_v46, %s4992_s5  ;;  %3137 = vmatprep.subr.bf16.mxu1 %v3091_v0 }
 0x639   : > { %3138 = vmatpush1.bf16.msra.mxu1 %v3090_v1 }
 0x63a   : > { %v3234_v6 = vpop.permute.xlu1 %3233 }
 0x63b   : > { %v7140_v5 = vpop.permute.xlu0 %3235 }
 0x63c   : > { %v7144_v44 = vsel %vm286_vm5, %v3234_v6, %v7140_v5  ;;  %3318 = vrot.lane.b32.xlu1 %v7140_v5, %s4992_s5 }
 0x63d   : > { %3316 = vrot.lane.b32.xlu0 %v7144_v44, %s4992_s5 }
 0x63e   : > { %v3232_v42 = vpop.permute.xlu1 %3231 }
 0x63f   : > { %v7151_v53 = vsel %vm286_vm5, %v3232_v42, %v3234_v6  ;;  %v3037_v51 = vpop.permute.xlu0 %3036 }
 0x641   : > { %3314 = vrot.lane.b32.xlu0 %v7151_v53, %s4992_s5 }
 0x642   : > { %v3039_v28 = vpop.permute.xlu1 %3038 }
 0x643   : > { %v3035_v62 = vpop.permute.xlu0 %3034  ;;  %v3093_v41 = vsel %vm7870_vm12, %v3037_v51, %v3039_v28  ;;  %vm7872_vm12 = vmmov %vm7867_vm11 }
 0x644   : > { %v3092_v4 = vsel %vm7871_vm13, %v3035_v62, %v3037_v51  ;;  %3139 = vmatprep.subr.bf16.mxu1 %v3093_v41  ;;  %vm7873_vm13 = vmmov %vm7867_vm11 }
 0x645   : > { %3140 = vmatpush1.bf16.msra.mxu1 %v3092_v4 }
 0x646   : > { %v3242_v58 = vpop.permute.xlu1 %3241 }
 0x647   : > { %v7157_v12 = vpop.permute.xlu0 %3243 }
 0x648   : > { %3324 = vrot.lane.b32.xlu0 %v7157_v12, %s4992_s5  ;;  %v7163_v2 = vsel %vm297_vm6, %v3242_v58, %v7157_v12 }
 0x649   : > { %3322 = vrot.lane.b32.xlu1 %v7163_v2, %s4992_s5 }
 0x64a   : > { %v3240_v36 = vpop.permute.xlu1 %3239 }
 0x64b   : > { %v7168_v21 = vsel %vm297_vm6, %v3240_v36, %v3242_v58  ;;  %v3043_v20 = vpop.permute.xlu0 %3042 }
 0x64d   : > { %3320 = vrot.lane.b32.xlu1 %v7168_v21, %s4992_s5 }
 0x64e   : > { %v3045_v59 = vpop.permute.xlu1 %3044 }
 0x64f   : > { %v3041_v18 = vpop.permute.xlu0 %3040  ;;  %v3095_v27 = vsel %vm7867_vm11, %v3043_v20, %v3045_v59 }
 0x650   : > { %v3094_v23 = vsel %vm7872_vm12, %v3041_v18, %v3043_v20  ;;  %3141 = vmatprep.subr.bf16.mxu1 %v3095_v27  ;;  %vm7874_vm12 = vmmov %vm7867_vm11 }
 0x651   : > { %3142 = vmatpush1.bf16.msra.mxu1 %v3094_v23 }
 0x652   : > { %v3250_v39 = vpop.permute.xlu1 %3249 }
 0x653   : > { %v7174_v48 = vpop.permute.xlu0 %3251 }
 0x654   : > { %3330 = vrot.lane.b32.xlu1 %v7174_v48, %s4992_s5  ;;  %v7180_v35 = vsel %vm308_vm7, %v3250_v39, %v7174_v48 }
 0x655   : > { %3328 = vrot.lane.b32.xlu0 %v7180_v35, %s4992_s5 }
 0x656   : > { %v3248_v16 = vpop.permute.xlu1 %3247 }
 0x657   : > { %v7185_v43 = vsel %vm308_vm7, %v3248_v16, %v3250_v39  ;;  %v3049_v40 = vpop.permute.xlu0 %3048 }
 0x659   : > { %3326 = vrot.lane.b32.xlu0 %v7185_v43, %s4992_s5 }
 0x65a   : > { %v3051_v26 = vpop.permute.xlu1 %3050 }
 0x65b   : > { %v3047_v10 = vpop.permute.xlu0 %3046  ;;  %v3097_v3 = vsel %vm7873_vm13, %v3049_v40, %v3051_v26  ;;  %vm7875_vm13 = vmmov %vm7867_vm11 }
 0x65c   : > { %v3096_v38 = vsel %vm7867_vm11, %v3047_v10, %v3049_v40  ;;  %3143 = vmatprep.subr.bf16.mxu1 %v3097_v3 }
 0x65d   : > { %3144 = vmatpush1.bf16.msra.mxu1 %v3096_v38 }
 0x65e   : > { %v3258_v13 = vpop.permute.xlu1 %3257 }
 0x65f   : > { %v7191_v57 = vpop.permute.xlu0 %3259 }
 0x660   : > { %3336 = vrot.lane.b32.xlu0 %v7191_v57, %s4992_s5  ;;  %v7197_v32 = vsel %vm319_vm8, %v3258_v13, %v7191_v57 }
 0x661   : > { %3334 = vrot.lane.b32.xlu1 %v7197_v32, %s4992_s5 }
 0x662   : > { %v3256_v31 = vpop.permute.xlu1 %3255 }
 0x663   : > { %v7202_v25 = vsel %vm319_vm8, %v3256_v31, %v3258_v13  ;;  %v3055_v60 = vpop.permute.xlu0 %3054 }
 0x665   : > { %3332 = vrot.lane.b32.xlu1 %v7202_v25, %s4992_s5 }
 0x666   : > { %v3057_v50 = vpop.permute.xlu1 %3056 }
 0x667   : > { %v3053_v34 = vpop.permute.xlu0 %3052  ;;  %v3099_v54 = vsel %vm7874_vm12, %v3055_v60, %v3057_v50  ;;  %vm7876_vm12 = vmmov %vm7867_vm11 }
 0x668   : > { %v3098_v61 = vsel %vm7875_vm13, %v3053_v34, %v3055_v60  ;;  %3145 = vmatprep.subr.bf16.mxu1 %v3099_v54  ;;  %vm7878_vm13 = vmmov %vm7867_vm11 }
 0x669   : > { %3146 = vmatpush1.bf16.msra.mxu1 %v3098_v61 }
 0x66a   : > { %v3266_v33 = vpop.permute.xlu1 %3265 }
 0x66b   : > { %v7208_v49 = vpop.permute.xlu0 %3267 }
 0x66c   : > { %3342 = vrot.lane.b32.xlu1 %v7208_v49, %s4992_s5  ;;  %v7214_v37 = vsel %vm330_vm9, %v3266_v33, %v7208_v49 }
 0x66d   : > { %3340 = vrot.lane.b32.xlu0 %v7214_v37, %s4992_s5 }
 0x66e   : > { %v3264_v56 = vpop.permute.xlu1 %3263 }
 0x66f   : > { %v7219_v30 = vsel %vm330_vm9, %v3264_v56, %v3266_v33  ;;  %v3061_v0 = vpop.permute.xlu0 %3060  ;;  %v4823_v56 = vld [vmem:[#allocation5 + $0x40] ss:$8 sps:$4 sm:$0xff]  }
 0x671   : > { %3338 = vrot.lane.b32.xlu0 %v7219_v30, %s4992_s5 }
 0x672   : > { %v3063_v1 = vpop.permute.xlu1 %3062 }
 0x673   : > { %v3059_v6 = vpop.permute.xlu0 %3058  ;;  %v3101_v42 = vsel %vm7867_vm11, %v3061_v0, %v3063_v1  ;;  %v4824_v1 = vld [vmem:[#allocation5 + $0x54] ss:$8 sps:$4 sm:$0xff]  }
 0x674   : > { %v3100_v51 = vsel %vm7876_vm12, %v3059_v6, %v3061_v0  ;;  %3147 = vmatprep.subr.bf16.mxu1 %v3101_v42  ;;  %vm7879_vm12 = vmmov %vm7867_vm11 }
 0x675   : > { %3148 = vmatpush1.bf16.msra.mxu1 %v3100_v51 }
 0x676   : > { %v3274_v28 = vpop.permute.xlu1 %3273 }
 0x677   : > { %v7225_v62 = vpop.permute.xlu0 %3275 }
 0x678   : > { %3348 = vrot.lane.b32.xlu0 %v7225_v62, %s4992_s5  ;;  %v7231_v41 = vsel %vm341_vm10, %v3274_v28, %v7225_v62 }
 0x679   : > { %3346 = vrot.lane.b32.xlu1 %v7231_v41, %s4992_s5 }
 0x67a   : > { %v3272_v4 = vpop.permute.xlu1 %3271 }
 0x67b   : > { %v7236_v58 = vsel %vm341_vm10, %v3272_v4, %v3274_v28  ;;  %v3067_v36 = vpop.permute.xlu0 %3066 }
 0x67c   : > { %3455 = vrot.lane.b32.xlu0 %v6870_v7, %s7877_s20 }
 0x67d   : > { %3344 = vrot.lane.b32.xlu1 %v7236_v58, %s4992_s5 }
 0x67e   : > { %v3069_v20 = vpop.permute.xlu1 %3068 }
 0x67f   : > { %v3065_v59 = vpop.permute.xlu0 %3064  ;;  %v3103_v18 = vsel %vm7878_vm13, %v3067_v36, %v3069_v20  ;;  %vm7880_vm13 = vmmov %vm7867_vm11 }
 0x680   : > { %v3102_v27 = vsel %vm7867_vm11, %v3065_v59, %v3067_v36  ;;  %3453 = vrot.lane.b32.xlu0 %v6883_v22, %s7877_s20  ;;  %3149 = vmatprep.subr.bf16.mxu1 %v3103_v18 }
 0x681   : > { %3457 = vrot.lane.b32.xlu1 %v6875_v29, %s7877_s20  ;;  %3150 = vmatpush1.bf16.msra.mxu1 %v3102_v27 }
 0x682   : > { %v3073_v23 = vpop.permute.xlu1 %3072 }
 0x683   : > { %v3075_v39 = vpop.permute.xlu0 %3074 }
 0x684   : > { %3463 = vrot.lane.b32.xlu0 %v7049_v17, %s7877_s20  ;;  %v3105_v16 = vsel %vm7879_vm12, %v3073_v23, %v3075_v39  ;;  %vm7881_vm12 = vmmov %vm7867_vm11 }
 0x685   : > { %3461 = vrot.lane.b32.xlu1 %v7081_v52, %s7877_s20  ;;  %3151 = vmatprep.subr.bf16.mxu1 %v3105_v16 }
 0x686   : > { %v3071_v40 = vpop.permute.xlu1 %3070 }
 0x687   : > { %v3104_v26 = vsel %vm7880_vm13, %v3071_v40, %v3073_v23  ;;  %v3079_v10 = vpop.permute.xlu0 %3078  ;;  %vm7882_vm13 = vmmov %vm7867_vm11 }
 0x688   : > { %3467 = vrot.lane.b32.xlu0 %v7097_v14, %s7877_s20  ;;  %3152 = vmatpush1.bf16.msra.mxu1 %v3104_v26 }
 0x689   : > { %3459 = vrot.lane.b32.xlu1 %v7088_v19, %s7877_s20 }
 0x68a   : > { %v3081_v3 = vpop.permute.xlu1 %3080 }
 0x68b   : > { %v3077_v38 = vpop.permute.xlu0 %3076  ;;  %v3107_v13 = vsel %vm7867_vm11, %v3079_v10, %v3081_v3 }
 0x68c   : > { %v3106_v31 = vsel %vm7881_vm12, %v3077_v38, %v3079_v10  ;;  %3465 = vrot.lane.b32.xlu0 %v7104_v45, %s7877_s20  ;;  %3153 = vmatprep.subr.bf16.mxu1 %v3107_v13  ;;  %vm7884_vm12 = vcmask 605184  }
 0x68d   : > { %3469 = vrot.lane.b32.xlu1 %v7065_v55, %s7877_s20  ;;  %3154 = vmatpush1.bf16.msra.mxu1 %v3106_v31 }
 0x68e   : > { %v3085_v60 = vpop.permute.xlu1 %3084 }
 0x68f   : > { %v3087_v50 = vpop.permute.xlu0 %3086 }
 0x690   : > { %3475 = vrot.lane.b32.xlu0 %v7085_v47, %s7877_s20  ;;  %v3109_v34 = vsel %vm7882_vm13, %v3085_v60, %v3087_v50  ;;  %vm7886_vm13 = vmmov %vm7884_vm12 }
 0x691   : > { %3473 = vrot.lane.b32.xlu1 %v7112_v8, %s7877_s20  ;;  %3155 = vmatprep.subr.bf16.mxu1 %v3109_v34 }
 0x692   : > { %v3083_v54 = vpop.permute.xlu1 %3082 }
 0x693   : > { %v3108_v61 = vsel %vm7867_vm11, %v3083_v54, %v3085_v60  ;;  %v3293_v33 = vpop.permute.xlu0 %3292  ;;  %vm7887_vm11 = vmmov %vm7884_vm12 }
 0x694   : > { %3479 = vrot.lane.b32.xlu0 %v7127_v63, %s7877_s20  ;;  %3156 = vmatpush1.bf16.msra.mxu1 %v3108_v61 }
 0x695   : > { %3471 = vrot.lane.b32.xlu1 %v7119_v15, %s7877_s20  ;;  %3395 = vmatprep.subr.bf16.mxu1 %v7097_v14 }
 0x696   : > { %v3295_v0 = vpop.permute.xlu1 %3294 }
 0x697   : > { %v3291_v6 = vpop.permute.xlu0 %3290  ;;  %3168 = vmatmul.mubr.bf16.vlgmr.msra.gmra.mrb[0].mxu1 %v4823_v56  ;;  %v3351_v42 = vsel %vm253_vm1, %v3293_v33, %v3295_v0 }
 0x698   : > { %3477 = vrot.lane.b32.xlu0 %v7134_v46, %s7877_s20  ;;  %3396 = vmatpush1.bf16.msra.mxu1 %v7104_v45  ;;  %v3350_v28 = vsel %vm253_vm1, %v3291_v6, %v3293_v33 }
 0x699   : > { %3481 = vrot.lane.b32.xlu1 %v7116_v24, %s7877_s20  ;;  %3397 = vmatprep.subr.bf16.mxu1 %v3351_v42 }
 0x69a   : > { %v3299_v51 = vpop.permute.xlu1 %3298  ;;  %4560 = vmatprep.mubr.msk.bf16.mxu1 %vm357_vm3, %v4824_v1 }
 0x69b   : > { %v3301_v4 = vpop.permute.xlu0 %3300 }
 0x69c   : > { %3487 = vrot.lane.b32.xlu0 %v7140_v5, %s7877_s20  ;;  %3398 = vmatpush1.bf16.msra.mxu1 %v3350_v28  ;;  %v3353_v36 = vsel %vm253_vm1, %v3299_v51, %v3301_v4 }
 0x69d   : > { %3485 = vrot.lane.b32.xlu1 %v7144_v44, %s7877_s20  ;;  %3399 = vmatprep.subr.bf16.mxu1 %v3353_v36 }
 0x69e   : > { %v3297_v20 = vpop.permute.xlu1 %3296 }
 0x69f   : > { %v3352_v59 = vsel %vm253_vm1, %v3297_v20, %v3299_v51  ;;  %v3305_v18 = vpop.permute.xlu0 %3304 }
 0x6a0   : > { %3491 = vrot.lane.b32.xlu0 %v7163_v2, %s7877_s20  ;;  %3400 = vmatpush1.bf16.msra.mxu1 %v3352_v59 }
 0x6a1   : > { %3483 = vrot.lane.b32.xlu1 %v7151_v53, %s7877_s20 }
 0x6a2   : > { %v3307_v27 = vpop.permute.xlu1 %3306 }
 0x6a3   : > { %v3303_v23 = vpop.permute.xlu0 %3302  ;;  %v3355_v39 = vsel %vm253_vm1, %v3305_v18, %v3307_v27 }
 0x6a4   : > { %v3354_v16 = vsel %vm253_vm1, %v3303_v23, %v3305_v18  ;;  %3489 = vrot.lane.b32.xlu0 %v7168_v21, %s7877_s20  ;;  %3401 = vmatprep.subr.bf16.mxu1 %v3355_v39 }
 0x6a5   : > { %3493 = vrot.lane.b32.xlu1 %v7157_v12, %s7877_s20  ;;  %3402 = vmatpush1.bf16.msra.mxu1 %v3354_v16 }
 0x6a6   : > { %v3311_v40 = vpop.permute.xlu1 %3310 }
 0x6a7   : > { %v3313_v26 = vpop.permute.xlu0 %3312 }
 0x6a8   : > { %3499 = vrot.lane.b32.xlu0 %v7174_v48, %s7877_s20  ;;  %v3357_v10 = vsel %vm253_vm1, %v3311_v40, %v3313_v26 }
 0x6a9   : > { %3497 = vrot.lane.b32.xlu1 %v7180_v35, %s7877_s20  ;;  %3403 = vmatprep.subr.bf16.mxu1 %v3357_v10 }
 0x6aa   : > { %v3309_v3 = vpop.permute.xlu1 %3308 }
 0x6ab   : > { %v3356_v38 = vsel %vm253_vm1, %v3309_v3, %v3311_v40 }
 0x6ac   : > { %3503 = vrot.lane.b32.xlu0 %v7197_v32, %s7877_s20  ;;  %3404 = vmatpush1.bf16.msra.mxu1 %v3356_v38  ;;  %v4826_v38 = vld [vmem:[#allocation5 + $0x50] ss:$8 sps:$4 sm:$0xff]  }
 0x6ad   : > { %3495 = vrot.lane.b32.xlu1 %v7185_v43, %s7877_s20 }
 0x6ae   : > { %v3319_v13 = vpop.permute.xlu1 %3318 }
 0x6af   : > { %v3317_v31 = vpop.permute.xlu0 %3316 }
 0x6b0   : > { %3501 = vrot.lane.b32.xlu0 %v7202_v25, %s7877_s20  ;;  %v3359_v60 = vsel %vm253_vm1, %v3317_v31, %v3319_v13 }
 0x6b1   : > { %3505 = vrot.lane.b32.xlu1 %v7191_v57, %s7877_s20  ;;  %3405 = vmatprep.subr.bf16.mxu1 %v3359_v60 }
 0x6b3   : > { %v3315_v50 = vpop.permute.xlu0 %3314 }
 0x6b4   : > { %v3358_v34 = vsel %vm253_vm1, %v3315_v50, %v3317_v31  ;;  %3511 = vrot.lane.b32.xlu0 %v7208_v49, %s7877_s20  ;;  %v4828_v31 = vld [vmem:[#allocation5 + $0x64] ss:$8 sps:$4 sm:$0xff]  }
 0x6b5   : > { %3509 = vrot.lane.b32.xlu1 %v7214_v37, %s7877_s20  ;;  %3406 = vmatpush1.bf16.msra.mxu1 %v3358_v34 }
 0x6b8   : > { %3515 = vrot.lane.b32.xlu0 %v7231_v41, %s7877_s20 }
 0x6b9   : > { %3507 = vrot.lane.b32.xlu1 %v7219_v30, %s7877_s20 }
 0x6ba   : > { %v3325_v54 = vpop.permute.xlu0 %3324 }
 0x6bb   : > { %v3323_v61 = vpop.permute.xlu1 %3322 }
 0x6bc   : > { %3513 = vrot.lane.b32.xlu0 %v7236_v58, %s7877_s20  ;;  %v3361_v33 = vsel %vm253_vm1, %v3323_v61, %v3325_v54 }
 0x6bd   : > { %3517 = vrot.lane.b32.xlu1 %v7225_v62, %s7877_s20  ;;  %3407 = vmatprep.subr.bf16.mxu1 %v3361_v33 }
 0x6bf   : > { %v3321_v56 = vpop.permute.xlu1 %3320 }
 0x6c0   : > { %v3360_v0 = vsel %vm253_vm1, %v3321_v56, %v3323_v61  ;;  %3628 = vrot.lane.b32.xlu0 %v6875_v29, %s7883_s4 }
 0x6c1   : > { %3626 = vrot.lane.b32.xlu1 %v6870_v7, %s7883_s4  ;;  %3408 = vmatpush1.bf16.msra.mxu1 %v3360_v0 }
 0x6c4   : > { %3632 = vrot.lane.b32.xlu0 %v7081_v52, %s7883_s4 }
 0x6c5   : > { %3624 = vrot.lane.b32.xlu1 %v6883_v22, %s7883_s4 }
 0x6c6   : > { %v3331_v1 = vpop.permute.xlu1 %3330 }
 0x6c7   : > { %v3329_v6 = vpop.permute.xlu0 %3328 }
 0x6c8   : > { %3630 = vrot.lane.b32.xlu0 %v7088_v19, %s7883_s4  ;;  %v3363_v42 = vsel %vm253_vm1, %v3329_v6, %v3331_v1 }
 0x6c9   : > { %3634 = vrot.lane.b32.xlu1 %v7049_v17, %s7883_s4  ;;  %3409 = vmatprep.subr.bf16.mxu1 %v3363_v42 }
 0x6cb   : > { %v3327_v29 = vpop.permute.xlu0 %3326 }
 0x6cc   : > { %v3362_v7 = vsel %vm253_vm1, %v3327_v29, %v3329_v6  ;;  %3640 = vrot.lane.b32.xlu0 %v7065_v55, %s7883_s4  ;;  %v7407_v29 = vld [vmem:[%s5175_s9 + $0x10] ss:$28 sps:$4 sm:$0xff]  }
 0x6cd   : > { %3638 = vrot.lane.b32.xlu1 %v7097_v14, %s7883_s4  ;;  %3410 = vmatpush1.bf16.msra.mxu1 %v3362_v7 }
 0x6d0   : > { %3644 = vrot.lane.b32.xlu0 %v7112_v8, %s7883_s4 }
 0x6d1   : > { %3636 = vrot.lane.b32.xlu1 %v7104_v45, %s7883_s4 }
 0x6d2   : > { %v3337_v22 = vpop.permute.xlu0 %3336 }
 0x6d3   : > { %v3335_v51 = vpop.permute.xlu1 %3334 }
 0x6d4   : > { %3642 = vrot.lane.b32.xlu0 %v7119_v15, %s7883_s4  ;;  %v3365_v28 = vsel %vm253_vm1, %v3335_v51, %v3337_v22 }
 0x6d5   : > { %3646 = vrot.lane.b32.xlu1 %v7085_v47, %s7883_s4  ;;  %3411 = vmatprep.subr.bf16.mxu1 %v3365_v28 }
 0x6d7   : > { %v3333_v4 = vpop.permute.xlu1 %3332 }
 0x6d8   : > { %v3364_v36 = vsel %vm253_vm1, %v3333_v4, %v3335_v51  ;;  %3652 = vrot.lane.b32.xlu0 %v7116_v24, %s7883_s4  ;;  %v7416_v4 = vld [vmem:[%s5175_s9 + $0xc] ss:$28 sps:$4 sm:$0xff]  }
 0x6d9   : > { %3650 = vrot.lane.b32.xlu1 %v7127_v63, %s7883_s4  ;;  %3412 = vmatpush1.bf16.msra.mxu1 %v3364_v36 }
 0x6dc   : > { %3656 = vrot.lane.b32.xlu0 %v7144_v44, %s7883_s4 }
 0x6dd   : > { %3648 = vrot.lane.b32.xlu1 %v7134_v46, %s7883_s4 }
 0x6de   : > { %v3343_v20 = vpop.permute.xlu1 %3342 }
 0x6df   : > { %v3341_v59 = vpop.permute.xlu0 %3340 }
 0x6e0   : > { %3654 = vrot.lane.b32.xlu0 %v7151_v53, %s7883_s4  ;;  %v3367_v18 = vsel %vm253_vm1, %v3341_v59, %v3343_v20  ;;  %v7422_v20 = vld [vmem:[%s5175_s9 + $0x14] ss:$28 sps:$4 sm:$0xff]  }
 0x6e1   : > { %3658 = vrot.lane.b32.xlu1 %v7140_v5, %s7883_s4  ;;  %3413 = vmatprep.subr.bf16.mxu1 %v3367_v18 }
 0x6e3   : > { %v3339_v27 = vpop.permute.xlu0 %3338 }
 0x6e4   : > { %v3366_v23 = vsel %vm253_vm1, %v3339_v27, %v3341_v59  ;;  %3664 = vrot.lane.b32.xlu0 %v7157_v12, %s7883_s4 }
 0x6e5   : > { %3662 = vrot.lane.b32.xlu1 %v7163_v2, %s7883_s4  ;;  %3414 = vmatpush1.bf16.msra.mxu1 %v3366_v23 }
 0x6e8   : > { %3668 = vrot.lane.b32.xlu0 %v7180_v35, %s7883_s4 }
 0x6e9   : > { %3660 = vrot.lane.b32.xlu1 %v7168_v21, %s7883_s4 }
 0x6ea   : > { %v3349_v39 = vpop.permute.xlu0 %3348 }
 0x6eb   : > { %v3347_v16 = vpop.permute.xlu1 %3346 }
 0x6ec   : > { %3666 = vrot.lane.b32.xlu0 %v7185_v43, %s7883_s4  ;;  %v3369_v40 = vsel %vm253_vm1, %v3347_v16, %v3349_v39 }
 0x6ed   : > { %3670 = vrot.lane.b32.xlu1 %v7174_v48, %s7883_s4  ;;  %3415 = vmatprep.subr.bf16.mxu1 %v3369_v40 }
 0x6ee   : > { %v3456_v26 = vpop.permute.xlu0 %3455 }
 0x6ef   : > { %v3345_v10 = vpop.permute.xlu1 %3344 }
 0x6f0   : > { %v3368_v3 = vsel %vm253_vm1, %v3345_v10, %v3347_v16  ;;  %3676 = vrot.lane.b32.xlu0 %v7191_v57, %s7883_s4 }
 0x6f1   : > { %3674 = vrot.lane.b32.xlu1 %v7197_v32, %s7883_s4  ;;  %3416 = vmatpush1.bf16.msra.mxu1 %v3368_v3 }
 0x6f2   : > { %v3454_v13 = vpop.permute.xlu0 %3453 }
 0x6f3   : > { %v3458_v60 = vpop.permute.xlu1 %3457  ;;  %v3519_v34 = vsel %vm1439_vm15, %v3454_v13, %v3456_v26 }
 0x6f4   : > { %3680 = vrot.lane.b32.xlu0 %v7214_v37, %s7883_s4  ;;  %v3520_v50 = vsel %vm1439_vm15, %v3456_v26, %v3458_v60  ;;  %3428 = vmatmul.mubr.bf16.vlgmr.msra.gmra.mrb[0].mxu1 %v4826_v38 }
 0x6f5   : > { %3672 = vrot.lane.b32.xlu1 %v7202_v25, %s7883_s4  ;;  %3566 = vmatprep.subr.bf16.mxu1 %v3520_v50 }
 0x6f6   : > { %3567 = vmatpush1.bf16.msra.mxu1 %v3519_v34  ;;  %v3464_v54 = vpop.permute.xlu0 %3463  ;;  %4563 = vmatprep.mubr.msk.bf16.mxu1 %vm357_vm3, %v4828_v31 }
 0x6f7   : > { %v3462_v61 = vpop.permute.xlu1 %3461 }
 0x6f8   : > { %3678 = vrot.lane.b32.xlu0 %v7219_v30, %s7883_s4  ;;  %v3522_v33 = vsel %vm1439_vm15, %v3462_v61, %v3464_v54 }
 0x6f9   : > { %3682 = vrot.lane.b32.xlu1 %v7208_v49, %s7883_s4  ;;  %3568 = vmatprep.subr.bf16.mxu1 %v3522_v33 }
 0x6fa   : > { %v3468_v56 = vpop.permute.xlu0 %3467 }
 0x6fb   : > { %v3460_v0 = vpop.permute.xlu1 %3459 }
 0x6fc   : > { %v3521_v1 = vsel %vm1439_vm15, %v3460_v0, %v3462_v61  ;;  %3688 = vrot.lane.b32.xlu0 %v7225_v62, %s7883_s4 }
 0x6fd   : > { %3686 = vrot.lane.b32.xlu1 %v7231_v41, %s7883_s4  ;;  %3569 = vmatpush1.bf16.msra.mxu1 %v3521_v1 }
 0x6fe   : > { %v3466_v6 = vpop.permute.xlu0 %3465 }
 0x6ff   : > { %v3470_v42 = vpop.permute.xlu1 %3469  ;;  %v3523_v22 = vsel %vm1439_vm15, %v3466_v6, %v3468_v56 }
 0x700   : > { %3797 = vrot.lane.b32.xlu0 %v7407_v29, %s5007_s18  ;;  %v3524_v7 = vsel %vm1439_vm15, %v3468_v56, %v3470_v42 }
 0x701   : > { %3684 = vrot.lane.b32.xlu1 %v7236_v58, %s7883_s4  ;;  %3570 = vmatprep.subr.bf16.mxu1 %v3524_v7 }
 0x702   : > { %3571 = vmatpush1.bf16.msra.mxu1 %v3523_v22  ;;  %v3476_v51 = vpop.permute.xlu0 %3475 }
 0x703   : > { %v3474_v28 = vpop.permute.xlu1 %3473 }
 0x704   : > { %3795 = vrot.lane.b32.xlu0 %v7416_v4, %s5007_s18  ;;  %v3526_v36 = vsel %vm1439_vm15, %v3474_v28, %v3476_v51 }
 0x705   : > { %3799 = vrot.lane.b32.xlu1 %v7422_v20, %s5007_s18  ;;  %3572 = vmatprep.subr.bf16.mxu1 %v3526_v36 }
 0x706   : > { %v3480_v59 = vpop.permute.xlu0 %3479 }
 0x707   : > { %v3472_v18 = vpop.permute.xlu1 %3471 }
 0x708   : > { %v3525_v27 = vsel %vm1439_vm15, %v3472_v18, %v3474_v28  ;;  %3805 = vrot.lane.b32.xlu0 %v7049_v17, %s5007_s18 }
 0x709   : > { %3803 = vrot.lane.b32.xlu1 %v7081_v52, %s5007_s18  ;;  %3573 = vmatpush1.bf16.msra.mxu1 %v3525_v27 }
 0x70a   : > { %v3478_v23 = vpop.permute.xlu0 %3477 }
 0x70b   : > { %v3482_v39 = vpop.permute.xlu1 %3481  ;;  %v3527_v40 = vsel %vm1439_vm15, %v3478_v23, %v3480_v59 }
 0x70c   : > { %3809 = vrot.lane.b32.xlu0 %v7097_v14, %s5007_s18  ;;  %v3528_v16 = vsel %vm1439_vm15, %v3480_v59, %v3482_v39 }
 0x70d   : > { %3801 = vrot.lane.b32.xlu1 %v7088_v19, %s5007_s18  ;;  %3574 = vmatprep.subr.bf16.mxu1 %v3528_v16 }
 0x70e   : > { %3575 = vmatpush1.bf16.msra.mxu1 %v3527_v40  ;;  %v3488_v26 = vpop.permute.xlu0 %3487 }
 0x70f   : > { %v3486_v10 = vpop.permute.xlu1 %3485 }
 0x710   : > { %3807 = vrot.lane.b32.xlu0 %v7104_v45, %s5007_s18  ;;  %v3530_v3 = vsel %vm1439_vm15, %v3486_v10, %v3488_v26 }
 0x711   : > { %3811 = vrot.lane.b32.xlu1 %v7065_v55, %s5007_s18  ;;  %3576 = vmatprep.subr.bf16.mxu1 %v3530_v3  ;;  %v4832_v3 = vld [vmem:[#allocation5 + $0x60] ss:$8 sps:$4 sm:$0xff]  }
 0x712   : > { %v3492_v38 = vpop.permute.xlu0 %3491 }
 0x713   : > { %v3484_v13 = vpop.permute.xlu1 %3483 }
 0x714   : > { %v3529_v31 = vsel %vm1439_vm15, %v3484_v13, %v3486_v10  ;;  %3817 = vrot.lane.b32.xlu0 %v7085_v47, %s5007_s18  ;;  %v4834_v13 = vld [vmem:[#allocation5 + $0x74] ss:$8 sps:$4 sm:$0xff]  }
 0x715   : > { %3815 = vrot.lane.b32.xlu1 %v7112_v8, %s5007_s18  ;;  %3577 = vmatpush1.bf16.msra.mxu1 %v3529_v31 }
 0x716   : > { %v3490_v60 = vpop.permute.xlu0 %3489 }
 0x717   : > { %v3494_v50 = vpop.permute.xlu1 %3493  ;;  %v3531_v54 = vsel %vm1439_vm15, %v3490_v60, %v3492_v38  ;;  %v7489_v60 = vld [vmem:[%s5175_s9 + $0x18] ss:$28 sps:$4 sm:$0xff]  }
 0x718   : > { %3821 = vrot.lane.b32.xlu0 %v7127_v63, %s5007_s18  ;;  %v3532_v34 = vsel %vm1439_vm15, %v3492_v38, %v3494_v50  ;;  %v7494_v50 = vld [vmem:[%s5175_s9 + $0x14] ss:$28 sps:$4 sm:$0xff]  }
 0x719   : > { %3813 = vrot.lane.b32.xlu1 %v7119_v15, %s5007_s18  ;;  %3578 = vmatprep.subr.bf16.mxu1 %v3532_v34 }
 0x71a   : > { %3579 = vmatpush1.bf16.msra.mxu1 %v3531_v54  ;;  %v3500_v61 = vpop.permute.xlu0 %3499 }
 0x71b   : > { %v3498_v33 = vpop.permute.xlu1 %3497 }
 0x71c   : > { %3819 = vrot.lane.b32.xlu0 %v7134_v46, %s5007_s18  ;;  %v3534_v56 = vsel %vm1439_vm15, %v3498_v33, %v3500_v61 }
 0x71d   : > { %3823 = vrot.lane.b32.xlu1 %v7116_v24, %s5007_s18  ;;  %3580 = vmatprep.subr.bf16.mxu1 %v3534_v56 }
 0x71e   : > { %v3504_v0 = vpop.permute.xlu0 %3503 }
 0x71f   : > { %v3496_v1 = vpop.permute.xlu1 %3495 }
 0x720   : > { %v3533_v6 = vsel %vm1439_vm15, %v3496_v1, %v3498_v33  ;;  %3829 = vrot.lane.b32.xlu0 %v7140_v5, %s5007_s18  ;;  %v7503_v33 = vld [vmem:[%s5175_s9 + $0x10] ss:$28 sps:$4 sm:$0xff]   ;;  %s4404_s9 = sshll.u32 %s6932_s8, 4  ;;  %s7787_s9 = int_to_ptr.vmem [resolvable:$true] %s4404_s9 }
 0x721   : > { %3827 = vrot.lane.b32.xlu1 %v7144_v44, %s5007_s18  ;;  %3581 = vmatpush1.bf16.msra.mxu1 %v3533_v6 }
 0x722   : > { %v3502_v42 = vpop.permute.xlu0 %3501 }
 0x723   : > { %v3506_v7 = vpop.permute.xlu1 %3505  ;;  %v3535_v51 = vsel %vm1439_vm15, %v3502_v42, %v3504_v0 }
 0x724   : > { %3833 = vrot.lane.b32.xlu0 %v7163_v2, %s5007_s18  ;;  %v3536_v22 = vsel %vm1439_vm15, %v3504_v0, %v3506_v7 }
 0x725   : > { %3825 = vrot.lane.b32.xlu1 %v7151_v53, %s5007_s18  ;;  %3582 = vmatprep.subr.bf16.mxu1 %v3536_v22 }
 0x726   : > { %3583 = vmatpush1.bf16.msra.mxu1 %v3535_v51  ;;  %v3512_v28 = vpop.permute.xlu0 %3511 }
 0x727   : > { %v3510_v36 = vpop.permute.xlu1 %3509 }
 0x728   : > { %3831 = vrot.lane.b32.xlu0 %v7168_v21, %s5007_s18  ;;  %v3538_v59 = vsel %vm1439_vm15, %v3510_v36, %v3512_v28 }
 0x729   : > { %3835 = vrot.lane.b32.xlu1 %v7157_v12, %s5007_s18  ;;  %3584 = vmatprep.subr.bf16.mxu1 %v3538_v59 }
 0x72a   : > { %v3516_v18 = vpop.permute.xlu0 %3515 }
 0x72b   : > { %v3508_v27 = vpop.permute.xlu1 %3507 }
 0x72c   : > { %v3537_v23 = vsel %vm1439_vm15, %v3508_v27, %v3510_v36  ;;  %3841 = vrot.lane.b32.xlu0 %v7174_v48, %s5007_s18 }
 0x72d   : > { %3839 = vrot.lane.b32.xlu1 %v7180_v35, %s5007_s18  ;;  %3585 = vmatpush1.bf16.msra.mxu1 %v3537_v23 }
 0x72e   : > { %v3514_v39 = vpop.permute.xlu0 %3513 }
 0x72f   : > { %v3518_v16 = vpop.permute.xlu1 %3517  ;;  %v3539_v26 = vsel %vm1439_vm15, %v3514_v39, %v3516_v18 }
 0x730   : > { %3845 = vrot.lane.b32.xlu0 %v7197_v32, %s5007_s18  ;;  %v3540_v40 = vsel %vm1439_vm15, %v3516_v18, %v3518_v16  ;;  %vm7885_vm15 = vmmov %vm7884_vm12 }
 0x731   : > { %3837 = vrot.lane.b32.xlu1 %v7185_v43, %s5007_s18  ;;  %3586 = vmatprep.subr.bf16.mxu1 %v3540_v40 }
 0x732   : > { %3587 = vmatpush1.bf16.msra.mxu1 %v3539_v26  ;;  %v3629_v10 = vpop.permute.xlu0 %3628 }
 0x733   : > { %v3627_v38 = vpop.permute.xlu1 %3626 }
 0x734   : > { %3843 = vrot.lane.b32.xlu0 %v7202_v25, %s5007_s18  ;;  %v3691_v31 = vsel %vm7884_vm12, %v3627_v38, %v3629_v10  ;;  %vm7888_vm12 = vmmov %vm7887_vm11 }
 0x735   : > { %3847 = vrot.lane.b32.xlu1 %v7191_v57, %s5007_s18  ;;  %3737 = vmatprep.subr.bf16.mxu1 %v3691_v31 }
 0x736   : > { %v3633_v34 = vpop.permute.xlu0 %3632  ;;  %3599 = vmatmul.mubr.bf16.vlgmr.msra.gmra.mrb[0].mxu1 %v4832_v3 }
 0x737   : > { %v3625_v54 = vpop.permute.xlu1 %3624  ;;  %4566 = vmatprep.mubr.msk.bf16.mxu1 %vm357_vm3, %v4834_v13 }
 0x738   : > { %v3690_v61 = vsel %vm7885_vm15, %v3625_v54, %v3627_v38  ;;  %4147 = vrot.lane.b32.xlu0 %v7489_v60, %s4991_s26  ;;  %vm7889_vm15 = vmmov %vm7887_vm11 }
 0x739   : > { %4145 = vrot.lane.b32.xlu1 %v7494_v50, %s4991_s26  ;;  %3738 = vmatpush1.bf16.msra.mxu1 %v3690_v61 }
 0x73a   : > { %v3631_v56 = vpop.permute.xlu0 %3630 }
 0x73b   : > { %v3635_v0 = vpop.permute.xlu1 %3634  ;;  %v3692_v6 = vsel %vm7887_vm11, %v3631_v56, %v3633_v34 }
 0x73c   : > { %3851 = vrot.lane.b32.xlu0 %v7214_v37, %s5007_s18  ;;  %v3693_v1 = vsel %vm7886_vm13, %v3633_v34, %v3635_v0  ;;  %vm7890_vm13 = vmmov %vm7887_vm11 }
 0x73d   : > { %4143 = vrot.lane.b32.xlu1 %v7503_v33, %s4991_s26  ;;  %3739 = vmatprep.subr.bf16.mxu1 %v3693_v1  ;;  %s4584_s26 = sshll.u32 %s5053_s16, 10 }
 0x73e   : > { %3740 = vmatpush1.bf16.msra.mxu1 %v3692_v6  ;;  %v3641_v42 = vpop.permute.xlu0 %3640  ;;  %s7795_s16 = scalar_lea.hbm %s7846_s3, %s4584_s26 }
 0x73f   : > { %v3639_v7 = vpop.permute.xlu1 %3638 }
 0x740   : > { %3849 = vrot.lane.b32.xlu0 %v7219_v30, %s5007_s18  ;;  %v3695_v22 = vsel %vm7888_vm12, %v3639_v7, %v3641_v42  ;;  %vm7891_vm12 = vmmov %vm7887_vm11 }
 0x741   : > { %3853 = vrot.lane.b32.xlu1 %v7208_v49, %s5007_s18  ;;  %3741 = vmatprep.subr.bf16.mxu1 %v3695_v22 }
 0x742   : > { %v3645_v51 = vpop.permute.xlu0 %3644 }
 0x743   : > { %v3637_v28 = vpop.permute.xlu1 %3636 }
 0x744   : > { %v3694_v36 = vsel %vm7889_vm15, %v3637_v28, %v3639_v7  ;;  %4155 = vrot.lane.b32.xlu0 %v7489_v60, %s4992_s5  ;;  %vm7892_vm15 = vmmov %vm7887_vm11 }
 0x745   : > { %4153 = vrot.lane.b32.xlu1 %v7494_v50, %s4992_s5  ;;  %3742 = vmatpush1.bf16.msra.mxu1 %v3694_v36 }
 0x746   : > { %v3643_v59 = vpop.permute.xlu0 %3642 }
 0x747   : > { %v3647_v18 = vpop.permute.xlu1 %3646  ;;  %v3696_v23 = vsel %vm7887_vm11, %v3643_v59, %v3645_v51 }
 0x748   : > { %3857 = vrot.lane.b32.xlu0 %v7231_v41, %s5007_s18  ;;  %v3697_v27 = vsel %vm7890_vm13, %v3645_v51, %v3647_v18  ;;  %vm7893_vm13 = vmmov %vm7887_vm11 }
 0x749   : > { %4151 = vrot.lane.b32.xlu1 %v7503_v33, %s4992_s5  ;;  %3743 = vmatprep.subr.bf16.mxu1 %v3697_v27 }
 0x74a   : > { %3744 = vmatpush1.bf16.msra.mxu1 %v3696_v23  ;;  %v3653_v39 = vpop.permute.xlu0 %3652 }
 0x74b   : > { %v3651_v16 = vpop.permute.xlu1 %3650 }
 0x74c   : > { %3855 = vrot.lane.b32.xlu0 %v7236_v58, %s5007_s18  ;;  %v3699_v40 = vsel %vm7891_vm12, %v3651_v16, %v3653_v39  ;;  %vm7894_vm12 = vmmov %vm7887_vm11 }
 0x74d   : > { %3859 = vrot.lane.b32.xlu1 %v7225_v62, %s5007_s18  ;;  %3745 = vmatprep.subr.bf16.mxu1 %v3699_v40 }
 0x74e   : > { %v3657_v26 = vpop.permute.xlu0 %3656 }
 0x74f   : > { %v3649_v10 = vpop.permute.xlu1 %3648 }
 0x750   : > { %v3698_v3 = vsel %vm7892_vm15, %v3649_v10, %v3651_v16  ;;  %4163 = vrot.lane.b32.xlu0 %v7489_v60, %s4993_s10  ;;  %vm7895_vm15 = vmmov %vm7887_vm11 }
 0x751   : > { %4161 = vrot.lane.b32.xlu1 %v7494_v50, %s4993_s10  ;;  %3746 = vmatpush1.bf16.msra.mxu1 %v3698_v3 }
 0x752   : > { %v3655_v38 = vpop.permute.xlu0 %3654 }
 0x753   : > { %v3659_v13 = vpop.permute.xlu1 %3658  ;;  %v3700_v34 = vsel %vm7887_vm11, %v3655_v38, %v3657_v26 }
 0x754   : > { %3968 = vrot.lane.b32.xlu0 %v7407_v29, %s5008_s22  ;;  %v3701_v31 = vsel %vm7893_vm13, %v3657_v26, %v3659_v13  ;;  %vm7896_vm13 = vmmov %vm7887_vm11  ;;  %v4836_v26 = vld [vmem:[#allocation5 + $0x70] ss:$8 sps:$4 sm:$0xff]  }
 0x755   : > { %4159 = vrot.lane.b32.xlu1 %v7503_v33, %s4993_s10  ;;  %3747 = vmatprep.subr.bf16.mxu1 %v3701_v31 }
 0x756   : > { %3748 = vmatpush1.bf16.msra.mxu1 %v3700_v34  ;;  %v3665_v54 = vpop.permute.xlu0 %3664 }
 0x757   : > { %v3663_v61 = vpop.permute.xlu1 %3662 }
 0x758   : > { %3966 = vrot.lane.b32.xlu0 %v7416_v4, %s5008_s22  ;;  %v3703_v56 = vsel %vm7894_vm12, %v3663_v61, %v3665_v54  ;;  %vm7897_vm12 = vmmov %vm7887_vm11 }
 0x759   : > { %3970 = vrot.lane.b32.xlu1 %v7422_v20, %s5008_s22  ;;  %3749 = vmatprep.subr.bf16.mxu1 %v3703_v56 }
 0x75a   : > { %v3669_v29 = vpop.permute.xlu0 %3668 }
 0x75b   : > { %v3661_v0 = vpop.permute.xlu1 %3660 }
 0x75c   : > { %v3702_v1 = vsel %vm7895_vm15, %v3661_v0, %v3663_v61  ;;  %4171 = vrot.lane.b32.xlu0 %v7489_v60, %s4994_s11  ;;  %vm7898_vm15 = vmmov %vm7887_vm11 }
 0x75d   : > { %4169 = vrot.lane.b32.xlu1 %v7494_v50, %s4994_s11  ;;  %3750 = vmatpush1.bf16.msra.mxu1 %v3702_v1 }
 0x75e   : > { %v3667_v6 = vpop.permute.xlu0 %3666 }
 0x75f   : > { %v3671_v42 = vpop.permute.xlu1 %3670  ;;  %v3704_v20 = vsel %vm7887_vm11, %v3667_v6, %v3669_v29 }
 0x760   : > { %3974 = vrot.lane.b32.xlu0 %v7081_v52, %s5008_s22  ;;  %v3705_v4 = vsel %vm7896_vm13, %v3669_v29, %v3671_v42  ;;  %vm7899_vm13 = vmmov %vm7887_vm11 }
 0x761   : > { %4167 = vrot.lane.b32.xlu1 %v7503_v33, %s4994_s11  ;;  %3751 = vmatprep.subr.bf16.mxu1 %v3705_v4 }
 0x762   : > { %3752 = vmatpush1.bf16.msra.mxu1 %v3704_v20  ;;  %v3677_v7 = vpop.permute.xlu0 %3676 }
 0x763   : > { %v3675_v22 = vpop.permute.xlu1 %3674 }
 0x764   : > { %3972 = vrot.lane.b32.xlu0 %v7088_v19, %s5008_s22  ;;  %v3707_v51 = vsel %vm7897_vm12, %v3675_v22, %v3677_v7  ;;  %vm7900_vm12 = vmmov %vm7887_vm11 }
 0x765   : > { %3976 = vrot.lane.b32.xlu1 %v7049_v17, %s5008_s22  ;;  %3753 = vmatprep.subr.bf16.mxu1 %v3707_v51 }
 0x766   : > { %v3681_v52 = vpop.permute.xlu0 %3680 }
 0x767   : > { %v3673_v28 = vpop.permute.xlu1 %3672 }
 0x768   : > { %v3706_v36 = vsel %vm7898_vm15, %v3673_v28, %v3675_v22  ;;  %4179 = vrot.lane.b32.xlu0 %v7489_v60, %s4995_s27  ;;  %vm7901_vm15 = vmmov %vm7887_vm11 }
 0x769   : > { %4177 = vrot.lane.b32.xlu1 %v7494_v50, %s4995_s27  ;;  %3754 = vmatpush1.bf16.msra.mxu1 %v3706_v36 }
 0x76a   : > { %v3679_v59 = vpop.permute.xlu0 %3678 }
 0x76b   : > { %v3683_v18 = vpop.permute.xlu1 %3682  ;;  %v3708_v17 = vsel %vm7887_vm11, %v3679_v59, %v3681_v52 }
 0x76c   : > { %3980 = vrot.lane.b32.xlu0 %v7097_v14, %s5008_s22  ;;  %v3709_v19 = vsel %vm7899_vm13, %v3681_v52, %v3683_v18 }
 0x76d   : > { %4175 = vrot.lane.b32.xlu1 %v7503_v33, %s4995_s27  ;;  %3755 = vmatprep.subr.bf16.mxu1 %v3709_v19  ;;  %s4912_s27 = scalar_lea.vmem %s7787_s9, 1024 }
 0x76e   : > { %3756 = vmatpush1.bf16.msra.mxu1 %v3708_v17  ;;  %v3689_v27 = vpop.permute.xlu0 %3688  ;;  %p4913_p4 = scmp.ne.s32.totalorder %s7787_s9, %s4912_s27 }
 0x76f   : > { %v3687_v23 = vpop.permute.xlu1 %3686 }
 0x770   : > { %3978 = vrot.lane.b32.xlu0 %v7104_v45, %s5008_s22  ;;  %v3711_v39 = vsel %vm7900_vm12, %v3687_v23, %v3689_v27  ;;  %v4837_v45 = vld [vmem:[#allocation5 + $0x84] ss:$8 sps:$4 sm:$0xff]   ;;  %p4914_p6 = pnand %p4913_p4, %p5123_p12 }
 0x771   : > { %3982 = vrot.lane.b32.xlu1 %v7065_v55, %s5008_s22  ;;  %3757 = vmatprep.subr.bf16.mxu1 %v3711_v39 }
 0x772   : > { %v3798_v14 = vpop.permute.xlu0 %3797  ;;  %p4915_p8 = pneg %p4914_p6 }
 0x773   : > { %v3685_v16 = vpop.permute.xlu1 %3684 }
 0x774   : > { %v3710_v40 = vsel %vm7901_vm15, %v3685_v16, %v3687_v23  ;;  %4187 = vrot.lane.b32.xlu0 %v7489_v60, %s4996_s28 }
 0x775   : > { %4185 = vrot.lane.b32.xlu1 %v7494_v50, %s4996_s28  ;;  %3758 = vmatpush1.bf16.msra.mxu1 %v3710_v40 }
 0x776   : > { %v3796_v10 = vpop.permute.xlu0 %3795 }
 0x777   : > { %v3800_v3 = vpop.permute.xlu1 %3799  ;;  %v3861_v38 = vsel %vm357_vm3, %v3796_v10, %v3798_v14 }
 0x778   : > { %3986 = vrot.lane.b32.xlu0 %v7112_v8, %s5008_s22  ;;  %v3862_v55 = vsel %vm357_vm3, %v3798_v14, %v3800_v3  ;;  %3770 = vmatmul.mubr.bf16.vlgmr.msra.gmra.mrb[0].mxu1 %v4836_v26 }
 0x779   : > { %4183 = vrot.lane.b32.xlu1 %v7503_v33, %s4996_s28  ;;  %3908 = vmatprep.subr.bf16.mxu1 %v3862_v55  ;;  %s5009_s28 = smov [#allocation7]  }
 0x77a   : > { %3909 = vmatpush1.bf16.msra.mxu1 %v3861_v38  ;;  %v3806_v13 = vpop.permute.xlu0 %3805  ;;  %4569 = vmatprep.mubr.msk.bf16.mxu1 %vm357_vm3, %v4837_v45  ;;  %v4840_v38 = vld [vmem:[#allocation5 + $0x94] ss:$8 sps:$4 sm:$0xff]  }
 0x77b   : > { %v3804_v31 = vpop.permute.xlu1 %3803 }
 0x77c   : > { %3984 = vrot.lane.b32.xlu0 %v7119_v15, %s5008_s22  ;;  %v3864_v34 = vsel %vm357_vm3, %v3804_v31, %v3806_v13 }
 0x77d   : > { %3988 = vrot.lane.b32.xlu1 %v7085_v47, %s5008_s22  ;;  %3910 = vmatprep.subr.bf16.mxu1 %v3864_v34 }
 0x77e   : > { %v3810_v8 = vpop.permute.xlu0 %3809 }
 0x77f   : > { %v3802_v54 = vpop.permute.xlu1 %3801 }
 0x780   : > { %v3863_v61 = vsel %vm357_vm3, %v3802_v54, %v3804_v31  ;;  %4195 = vrot.lane.b32.xlu0 %v7489_v60, %s4997_s29 }
 0x781   : > { %4193 = vrot.lane.b32.xlu1 %v7494_v50, %s4997_s29  ;;  %3911 = vmatpush1.bf16.msra.mxu1 %v3863_v61 }
 0x782   : > { %v3808_v56 = vpop.permute.xlu0 %3807 }
 0x783   : > { %v3812_v29 = vpop.permute.xlu1 %3811  ;;  %v3865_v47 = vsel %vm357_vm3, %v3808_v56, %v3810_v8 }
 0x784   : > { %3992 = vrot.lane.b32.xlu0 %v7127_v63, %s5008_s22  ;;  %v3866_v15 = vsel %vm357_vm3, %v3810_v8, %v3812_v29 }
 0x785   : > { %4191 = vrot.lane.b32.xlu1 %v7503_v33, %s4997_s29  ;;  %3912 = vmatprep.subr.bf16.mxu1 %v3866_v15  ;;  %s4916_s29 = sshll.u32 %s5009_s28, 4  ;;  %s4917_s29 = int_to_ptr.vmem [resolvable:$false] %s4916_s29 }
 0x786   : > { %3913 = vmatpush1.bf16.msra.mxu1 %v3865_v47  ;;  %v3818_v0 = vpop.permute.xlu0 %3817  ;;  %p4919_p10 = scmp.lt.s32.totalorder %s7787_s9, %s4917_s29 }
 0x787   : > { %v3816_v1 = vpop.permute.xlu1 %3815 }
 0x788   : > { %3990 = vrot.lane.b32.xlu0 %v7134_v46, %s5008_s22  ;;  %v3868_v6 = vsel %vm357_vm3, %v3816_v1, %v3818_v0 }
 0x789   : > { %3994 = vrot.lane.b32.xlu1 %v7116_v24, %s5008_s22  ;;  %3914 = vmatprep.subr.bf16.mxu1 %v3868_v6 }
 0x78a   : > { %v3822_v63 = vpop.permute.xlu0 %3821 }
 0x78b   : > { %v3814_v42 = vpop.permute.xlu1 %3813 }
 0x78c   : > { %v3867_v4 = vsel %vm357_vm3, %v3814_v42, %v3816_v1  ;;  %4203 = vrot.lane.b32.xlu0 %v7489_v60, %s4998_s23 }
 0x78d   : > { %4201 = vrot.lane.b32.xlu1 %v7494_v50, %s4998_s23  ;;  %3915 = vmatpush1.bf16.msra.mxu1 %v3867_v4 }
 0x78e   : > { %v3820_v20 = vpop.permute.xlu0 %3819 }
 0x78f   : > { %v3824_v7 = vpop.permute.xlu1 %3823  ;;  %v3869_v24 = vsel %vm357_vm3, %v3820_v20, %v3822_v63 }
 0x790   : > { %3998 = vrot.lane.b32.xlu0 %v7144_v44, %s5008_s22  ;;  %v3870_v46 = vsel %vm357_vm3, %v3822_v63, %v3824_v7 }
 0x791   : > { %4199 = vrot.lane.b32.xlu1 %v7503_v33, %s4998_s23  ;;  %3916 = vmatprep.subr.bf16.mxu1 %v3870_v46  ;;  %s4918_s23 = scalar_lea.vmem %s4917_s29, 2048 }
 0x792   : > { %3917 = vmatpush1.bf16.msra.mxu1 %v3869_v24  ;;  %v3830_v22 = vpop.permute.xlu0 %3829  ;;  %p4920_p13 = scmp.lt.s32.totalorder %s4918_s23, %s4912_s27 }
 0x793   : > { %v3828_v51 = vpop.permute.xlu1 %3827 }
 0x794   : > { %3996 = vrot.lane.b32.xlu0 %v7151_v53, %s5008_s22  ;;  %v3872_v52 = vsel %vm357_vm3, %v3828_v51, %v3830_v22  ;;  %p4921_p3 = por %p4920_p13, %p4919_p10 }
 0x795   : > { %4000 = vrot.lane.b32.xlu1 %v7140_v5, %s5008_s22  ;;  %3918 = vmatprep.subr.bf16.mxu1 %v3872_v52 }
 0x796   : > { %v3834_v44 = vpop.permute.xlu0 %3833  ;;  %p4922_p7 = pnand %p4921_p3, %p4915_p8 }
 0x797   : > { %v3826_v28 = vpop.permute.xlu1 %3825 }
 0x798   : > { %v3871_v36 = vsel %vm357_vm3, %v3826_v28, %v3828_v51  ;;  %4211 = vrot.lane.b32.xlu0 %v7489_v60, %s4999_s30 }
 0x799   : > { %4209 = vrot.lane.b32.xlu1 %v7494_v50, %s4999_s30  ;;  %3919 = vmatpush1.bf16.msra.mxu1 %v3871_v36 }
 0x79a   : > { %v3832_v59 = vpop.permute.xlu0 %3831 }
 0x79b   : > { %v3836_v18 = vpop.permute.xlu1 %3835  ;;  %v3873_v5 = vsel %vm357_vm3, %v3832_v59, %v3834_v44 }
 0x79c   : > { %4004 = vrot.lane.b32.xlu0 %v7163_v2, %s5008_s22  ;;  %v3874_v53 = vsel %vm357_vm3, %v3834_v44, %v3836_v18 }
 0x79d   : > { %4207 = vrot.lane.b32.xlu1 %v7503_v33, %s4999_s30  ;;  %3920 = vmatprep.subr.bf16.mxu1 %v3874_v53 }
 0x79e   : > { %3921 = vmatpush1.bf16.msra.mxu1 %v3873_v5  ;;  %v3842_v19 = vpop.permute.xlu0 %3841 }
 0x79f   : > { %v3840_v17 = vpop.permute.xlu1 %3839 }
 0x7a0   : > { %4002 = vrot.lane.b32.xlu0 %v7168_v21, %s5008_s22  ;;  %v3876_v27 = vsel %vm357_vm3, %v3840_v17, %v3842_v19 }
 0x7a1   : > { %4006 = vrot.lane.b32.xlu1 %v7157_v12, %s5008_s22  ;;  %3922 = vmatprep.subr.bf16.mxu1 %v3876_v27 }
 0x7a2   : > { %v3846_v2 = vpop.permute.xlu0 %3845 }
 0x7a3   : > { %v3838_v23 = vpop.permute.xlu1 %3837 }
 0x7a4   : > { %v3875_v39 = vsel %vm357_vm3, %v3838_v23, %v3840_v17  ;;  %4219 = vrot.lane.b32.xlu0 %v7489_v60, %s5000_s25 }
 0x7a5   : > { %4217 = vrot.lane.b32.xlu1 %v7494_v50, %s5000_s25  ;;  %3923 = vmatpush1.bf16.msra.mxu1 %v3875_v39 }
 0x7a6   : > { %v3844_v14 = vpop.permute.xlu0 %3843 }
 0x7a7   : > { %v3848_v16 = vpop.permute.xlu1 %3847  ;;  %v3877_v12 = vsel %vm357_vm3, %v3844_v14, %v3846_v2 }
 0x7a8   : > { %4010 = vrot.lane.b32.xlu0 %v7180_v35, %s5008_s22  ;;  %v3878_v21 = vsel %vm357_vm3, %v3846_v2, %v3848_v16 }
 0x7a9   : > { %4215 = vrot.lane.b32.xlu1 %v7503_v33, %s5000_s25  ;;  %3924 = vmatprep.subr.bf16.mxu1 %v3878_v21 }
 0x7aa   : > { %3925 = vmatpush1.bf16.msra.mxu1 %v3877_v12  ;;  %v4148_v40 = vpop.permute.xlu0 %4147 }
 0x7ab   : > { %v4146_v60 = vpop.permute.xlu1 %4145 }
 0x7ac   : > { %4008 = vrot.lane.b32.xlu0 %v7185_v43, %s5008_s22  ;;  %v4150_v3 = vsel %vm242_vm0, %v4146_v60, %v4148_v40 }
 0x7ad   : > { %4012 = vrot.lane.b32.xlu1 %v7174_v48, %s5008_s22 }
 0x7ae   : > { %v3852_v50 = vpop.permute.xlu0 %3851 }
 0x7af   : > { %v4144_v26 = vpop.permute.xlu1 %4143 }
 0x7b0   : > { %4018 = vrot.lane.b32.xlu0 %v7191_v57, %s5008_s22 }
 0x7b1   : > { %4016 = vrot.lane.b32.xlu1 %v7197_v32, %s5008_s22 }
 0x7b2   : > { %v3850_v35 = vpop.permute.xlu0 %3849 }
 0x7b3   : > { %v3854_v33 = vpop.permute.xlu1 %3853  ;;  %v3879_v43 = vsel %vm357_vm3, %v3850_v35, %v3852_v50 }
 0x7b4   : > { %4022 = vrot.lane.b32.xlu0 %v7214_v37, %s5008_s22  ;;  %v3880_v10 = vsel %vm357_vm3, %v3852_v50, %v3854_v33 }
 0x7b5   : > { %4014 = vrot.lane.b32.xlu1 %v7202_v25, %s5008_s22  ;;  %3926 = vmatprep.subr.bf16.mxu1 %v3880_v10 }
 0x7b6   : > { %3927 = vmatpush1.bf16.msra.mxu1 %v3879_v43  ;;  %v4156_v48 = vpop.permute.xlu0 %4155 }
 0x7b7   : > { %v4154_v45 = vpop.permute.xlu1 %4153 }
 0x7b8   : > { %4020 = vrot.lane.b32.xlu0 %v7219_v30, %s5008_s22  ;;  %v4158_v8 = vsel %vm253_vm1, %v4154_v45, %v4156_v48 }
 0x7b9   : > { %4024 = vrot.lane.b32.xlu1 %v7208_v49, %s5008_s22  ;;  %v4839_v49 = vld [vmem:[#allocation5 + $0x80] ss:$8 sps:$4 sm:$0xff]  }
 0x7ba   : > { %v3858_v57 = vpop.permute.xlu0 %3857 }
 0x7bb   : > { %v4152_v32 = vpop.permute.xlu1 %4151 }
 0x7bc   : > { %4030 = vrot.lane.b32.xlu0 %v7225_v62, %s5008_s22  ;;  %v4157_v56 = vsel %vm253_vm1, %v4152_v32, %v4154_v45 }
 0x7bd   : > { %4028 = vrot.lane.b32.xlu1 %v7231_v41, %s5008_s22  ;;  %v4149_v41 = vsel %vm242_vm0, %v4144_v26, %v4146_v60 }
 0x7be   : > { %v3856_v37 = vpop.permute.xlu0 %3855 }
 0x7bf   : > { %v3860_v25 = vpop.permute.xlu1 %3859  ;;  %v3881_v30 = vsel %vm357_vm3, %v3856_v37, %v3858_v57 }
 0x7c0   : > { %4236 = vrot.lane.b32.xlu0 %v4150_v3, %s4994_s11  ;;  %v3882_v55 = vsel %vm357_vm3, %v3858_v57, %v3860_v25 }
 0x7c1   : > { %4026 = vrot.lane.b32.xlu1 %v7236_v58, %s5008_s22  ;;  %3928 = vmatprep.subr.bf16.mxu1 %v3882_v55 }
 0x7c2   : > { %3929 = vmatpush1.bf16.msra.mxu1 %v3881_v30  ;;  %v4164_v62 = vpop.permute.xlu0 %4163 }
 0x7c3   : > { %v4162_v13 = vpop.permute.xlu1 %4161 }
 0x7c4   : > { %4234 = vrot.lane.b32.xlu0 %v4149_v41, %s4994_s11  ;;  %v4166_v54 = vsel %vm264_vm2, %v4162_v13, %v4164_v62 }
 0x7c5   : > { %4238 = vrot.lane.b32.xlu1 %v4148_v40, %s4994_s11  ;;  %3941 = vmatmul.mubr.bf16.vlgmr.msra.gmra.mrb[0].mxu1 %v4839_v49 }
 0x7c6   : > { %v3969_v31 = vpop.permute.xlu0 %3968  ;;  %4572 = vmatprep.mubr.msk.bf16.mxu1 %vm357_vm3, %v4840_v38 }
 0x7c7   : > { %v4160_v34 = vpop.permute.xlu1 %4159 }
 0x7c8   : > { %4244 = vrot.lane.b32.xlu0 %v4156_v48, %s4994_s11  ;;  %v4165_v0 = vsel %vm264_vm2, %v4160_v34, %v4162_v13 }
 0x7c9   : > { %4242 = vrot.lane.b32.xlu1 %v4158_v8, %s4994_s11 }
 0x7ca   : > { %v3967_v58 = vpop.permute.xlu0 %3966 }
 0x7cb   : > { %v3971_v61 = vpop.permute.xlu1 %3970  ;;  %v4032_v15 = vsel %vm1958_vm14, %v3967_v58, %v3969_v31 }
 0x7cc   : > { %4248 = vrot.lane.b32.xlu0 %v4166_v54, %s4994_s11  ;;  %v4033_v29 = vsel %vm1958_vm14, %v3969_v31, %v3971_v61 }
 0x7cd   : > { %4240 = vrot.lane.b32.xlu1 %v4157_v56, %s4994_s11  ;;  %4079 = vmatprep.subr.bf16.mxu1 %v4033_v29 }
 0x7ce   : > { %4080 = vmatpush1.bf16.msra.mxu1 %v4032_v15  ;;  %v4172_v47 = vpop.permute.xlu0 %4171 }
 0x7cf   : > { %v4170_v1 = vpop.permute.xlu1 %4169 }
 0x7d0   : > { %4246 = vrot.lane.b32.xlu0 %v4165_v0, %s4994_s11  ;;  %v7701_v42 = vsel %vm275_vm4, %v4170_v1, %v4172_v47 }
 0x7d1   : > { %4250 = vrot.lane.b32.xlu1 %v4164_v62, %s4994_s11 }
 0x7d2   : > { %v3975_v6 = vpop.permute.xlu0 %3974 }
 0x7d3   : > { %v4168_v63 = vpop.permute.xlu1 %4167 }
 0x7d4   : > { %4256 = vrot.lane.b32.xlu0 %v4172_v47, %s4994_s11  ;;  %v7707_v7 = vsel %vm275_vm4, %v4168_v63, %v4170_v1 }
 0x7d5   : > { %4254 = vrot.lane.b32.xlu1 %v7701_v42, %s4994_s11 }
 0x7d6   : > { %v3973_v4 = vpop.permute.xlu0 %3972 }
 0x7d7   : > { %v3977_v20 = vpop.permute.xlu1 %3976  ;;  %v4034_v24 = vsel %vm1958_vm14, %v3973_v4, %v3975_v6 }
 0x7d8   : > { %v4035_v46 = vsel %vm1958_vm14, %v3975_v6, %v3977_v20 }
 0x7d9   : > { %4252 = vrot.lane.b32.xlu1 %v7707_v7, %s4994_s11  ;;  %4081 = vmatprep.subr.bf16.mxu1 %v4035_v46 }
 0x7da   : > { %4082 = vmatpush1.bf16.msra.mxu1 %v4034_v24  ;;  %v4180_v22 = vpop.permute.xlu0 %4179 }
 0x7db   : > { %v4178_v51 = vpop.permute.xlu1 %4177 }
 0x7dc   : > { %v4182_v52 = vsel %vm286_vm5, %v4178_v51, %v4180_v22 }
 0x7dd   : > { %4260 = vrot.lane.b32.xlu0 %v4182_v52, %s4994_s11  ;;  %4262 = vrot.lane.b32.xlu1 %v4180_v22, %s4994_s11 }
 0x7de   : > { %v3981_v44 = vpop.permute.xlu0 %3980 }
 0x7df   : > { %v4176_v28 = vpop.permute.xlu1 %4175 }
 0x7e0   : > { %v4181_v36 = vsel %vm286_vm5, %v4176_v28, %v4178_v51 }
 0x7e1   : > { %4258 = vrot.lane.b32.xlu0 %v4181_v36, %s4994_s11 }
 0x7e2   : > { %v3979_v59 = vpop.permute.xlu0 %3978 }
 0x7e3   : > { %v3983_v18 = vpop.permute.xlu1 %3982  ;;  %v4036_v5 = vsel %vm1958_vm14, %v3979_v59, %v3981_v44 }
 0x7e4   : > { %v4037_v53 = vsel %vm1958_vm14, %v3981_v44, %v3983_v18 }
 0x7e5   : > { %4083 = vmatprep.subr.bf16.mxu1 %v4037_v53 }
 0x7e6   : > { %4084 = vmatpush1.bf16.msra.mxu1 %v4036_v5  ;;  %v4188_v19 = vpop.permute.xlu0 %4187 }
 0x7e7   : > { %v4186_v17 = vpop.permute.xlu1 %4185  ;;  %4268 = vrot.lane.b32.xlu0 %v4188_v19, %s4994_s11 }
 0x7e8   : > { %v4190_v27 = vsel %vm297_vm6, %v4186_v17, %v4188_v19 }
 0x7e9   : > { %4266 = vrot.lane.b32.xlu1 %v4190_v27, %s4994_s11 }
 0x7ea   : > { %v3987_v2 = vpop.permute.xlu0 %3986 }
 0x7eb   : > { %v4184_v23 = vpop.permute.xlu1 %4183 }
 0x7ec   : > { %v4189_v39 = vsel %vm297_vm6, %v4184_v23, %v4186_v17 }
 0x7ed   : > { %4264 = vrot.lane.b32.xlu1 %v4189_v39, %s4994_s11 }
 0x7ee   : > { %v3985_v14 = vpop.permute.xlu0 %3984 }
 0x7ef   : > { %v3989_v16 = vpop.permute.xlu1 %3988  ;;  %v4038_v12 = vsel %vm1958_vm14, %v3985_v14, %v3987_v2  ;;  %v4842_v14 = vld [vmem:[#allocation5 + $0x90] ss:$8 sps:$4 sm:$0xff]  }
 0x7f0   : > { %v4039_v21 = vsel %vm1958_vm14, %v3987_v2, %v3989_v16  ;;  %v4843_v16 = vld [vmem:[#allocation5 + $0xa4] ss:$8 sps:$4 sm:$0xff]  }
 0x7f1   : > { %4085 = vmatprep.subr.bf16.mxu1 %v4039_v21 }
 0x7f2   : > { %4086 = vmatpush1.bf16.msra.mxu1 %v4038_v12  ;;  %v4196_v40 = vpop.permute.xlu0 %4195 }
 0x7f3   : > { %v4194_v60 = vpop.permute.xlu1 %4193  ;;  %4274 = vrot.lane.b32.xlu1 %v4196_v40, %s4994_s11 }
 0x7f4   : > { %v4198_v50 = vsel %vm308_vm7, %v4194_v60, %v4196_v40 }
 0x7f5   : > { %4272 = vrot.lane.b32.xlu0 %v4198_v50, %s4994_s11 }
 0x7f6   : > { %v3993_v26 = vpop.permute.xlu0 %3992 }
 0x7f7   : > { %v4192_v35 = vpop.permute.xlu1 %4191 }
 0x7f8   : > { %v4197_v33 = vsel %vm308_vm7, %v4192_v35, %v4194_v60 }
 0x7f9   : > { %4270 = vrot.lane.b32.xlu0 %v4197_v33, %s4994_s11 }
 0x7fa   : > { %v3991_v10 = vpop.permute.xlu0 %3990 }
 0x7fb   : > { %v3995_v43 = vpop.permute.xlu1 %3994  ;;  %v4040_v45 = vsel %vm1958_vm14, %v3991_v10, %v3993_v26 }
 0x7fc   : > { %v4041_v48 = vsel %vm1958_vm14, %v3993_v26, %v3995_v43 }
 0x7fd   : > { %4087 = vmatprep.subr.bf16.mxu1 %v4041_v48 }
 0x7fe   : > { %4088 = vmatpush1.bf16.msra.mxu1 %v4040_v45  ;;  %v4204_v57 = vpop.permute.xlu0 %4203 }
 0x7ff   : > { %v4202_v32 = vpop.permute.xlu1 %4201  ;;  %4280 = vrot.lane.b32.xlu0 %v4204_v57, %s4994_s11 }
 0x800   : > { %v4206_v37 = vsel %vm319_vm8, %v4202_v32, %v4204_v57 }
 0x801   : > { %4278 = vrot.lane.b32.xlu1 %v4206_v37, %s4994_s11 }
 0x802   : > { %v3999_v25 = vpop.permute.xlu0 %3998 }
 0x803   : > { %v4200_v3 = vpop.permute.xlu1 %4199 }
 0x804   : > { %v4205_v55 = vsel %vm319_vm8, %v4200_v3, %v4202_v32 }
 0x805   : > { %4276 = vrot.lane.b32.xlu1 %v4205_v55, %s4994_s11 }
 0x806   : > { %v3997_v30 = vpop.permute.xlu0 %3996 }
 0x807   : > { %v4001_v49 = vpop.permute.xlu1 %4000  ;;  %v4042_v38 = vsel %vm1958_vm14, %v3997_v30, %v3999_v25 }
 0x808   : > { %v4043_v62 = vsel %vm1958_vm14, %v3999_v25, %v4001_v49 }
 0x809   : > { %4089 = vmatprep.subr.bf16.mxu1 %v4043_v62 }
 0x80a   : > { %4090 = vmatpush1.bf16.msra.mxu1 %v4042_v38  ;;  %v4212_v41 = vpop.permute.xlu0 %4211 }
 0x80b   : > { %v4210_v13 = vpop.permute.xlu1 %4209  ;;  %4286 = vrot.lane.b32.xlu1 %v4212_v41, %s4994_s11 }
 0x80c   : > { %v4214_v31 = vsel %vm330_vm9, %v4210_v13, %v4212_v41 }
 0x80d   : > { %4284 = vrot.lane.b32.xlu0 %v4214_v31, %s4994_s11 }
 0x80e   : > { %v4005_v34 = vpop.permute.xlu0 %4004 }
 0x80f   : > { %v4208_v8 = vpop.permute.xlu1 %4207 }
 0x810   : > { %v4213_v58 = vsel %vm330_vm9, %v4208_v8, %v4210_v13 }
 0x811   : > { %4282 = vrot.lane.b32.xlu0 %v4213_v58, %s4994_s11 }
 0x812   : > { %v4003_v54 = vpop.permute.xlu0 %4002 }
 0x813   : > { %v4007_v61 = vpop.permute.xlu1 %4006  ;;  %v4044_v29 = vsel %vm1958_vm14, %v4003_v54, %v4005_v34 }
 0x814   : > { %v4045_v56 = vsel %vm1958_vm14, %v4005_v34, %v4007_v61 }
 0x815   : > { %4091 = vmatprep.subr.bf16.mxu1 %v4045_v56 }
 0x816   : > { %4092 = vmatpush1.bf16.msra.mxu1 %v4044_v29  ;;  %v4220_v15 = vpop.permute.xlu0 %4219 }
 0x817   : > { %v4218_v47 = vpop.permute.xlu1 %4217  ;;  %4292 = vrot.lane.b32.xlu0 %v4220_v15, %s4994_s11 }
 0x818   : > { %v4222_v0 = vsel %vm341_vm10, %v4218_v47, %v4220_v15 }
 0x819   : > { %4290 = vrot.lane.b32.xlu1 %v4222_v0, %s4994_s11 }
 0x81a   : > { %v4011_v1 = vpop.permute.xlu0 %4010 }
 0x81b   : > { %v4216_v6 = vpop.permute.xlu1 %4215 }
 0x81c   : > { %v4221_v63 = vsel %vm341_vm10, %v4216_v6, %v4218_v47 }
 0x81d   : > { %4288 = vrot.lane.b32.xlu1 %v4221_v63, %s4994_s11  ;;  %s4391_s11 = scalar_lea.sflag [#allocation4], %s5171_s6 }
 0x81e   : > { %v4009_v4 = vpop.permute.xlu0 %4008 }
 0x81f   : > { %v4013_v20 = vpop.permute.xlu1 %4012  ;;  %v4046_v24 = vsel %vm1958_vm14, %v4009_v4, %v4011_v1 }
 0x820   : > { %v4047_v46 = vsel %vm1958_vm14, %v4011_v1, %v4013_v20 }
 0x821   : > { %4093 = vmatprep.subr.bf16.mxu1 %v4047_v46 }
 0x822   : > { %4094 = vmatpush1.bf16.msra.mxu1 %v4046_v24  ;;  %v4019_v22 = vpop.permute.xlu0 %4018 }
 0x823   : > { %v4017_v51 = vpop.permute.xlu1 %4016 }
 0x824   : > { %v4049_v52 = vsel %vm1958_vm14, %v4017_v51, %v4019_v22 }
 0x825   : > { %4095 = vmatprep.subr.bf16.mxu1 %v4049_v52 }
 0x826   : > { %v4023_v44 = vpop.permute.xlu0 %4022 }
 0x827   : > { %v4015_v28 = vpop.permute.xlu1 %4014 }
 0x828   : > { %v4048_v36 = vsel %vm1958_vm14, %v4015_v28, %v4017_v51 }
 0x829   : > { %4096 = vmatpush1.bf16.msra.mxu1 %v4048_v36  ;;  %v4845_v36 = vld [vmem:[#allocation5 + $0xa0] ss:$8 sps:$4 sm:$0xff]  }
 0x82a   : > { %v4021_v59 = vpop.permute.xlu0 %4020 }
 0x82b   : > { %v4025_v18 = vpop.permute.xlu1 %4024  ;;  %v4050_v5 = vsel %vm1958_vm14, %v4021_v59, %v4023_v44 }
 0x82c   : > { %v4051_v53 = vsel %vm1958_vm14, %v4023_v44, %v4025_v18 }
 0x82d   : > { %4097 = vmatprep.subr.bf16.mxu1 %v4051_v53 }
 0x82e   : > { %4098 = vmatpush1.bf16.msra.mxu1 %v4050_v5  ;;  %v4031_v19 = vpop.permute.xlu0 %4030 }
 0x82f   : > { %v4029_v17 = vpop.permute.xlu1 %4028 }
 0x830   : > { %v4053_v27 = vsel %vm1958_vm14, %v4029_v17, %v4031_v19 }
 0x831   : > { %4099 = vmatprep.subr.bf16.mxu1 %v4053_v27 }
 0x832   : > { %v4237_v2 = vpop.permute.xlu0 %4236 }
 0x833   : > { %v4027_v23 = vpop.permute.xlu1 %4026 }
 0x834   : > { %v4052_v39 = vsel %vm1958_vm14, %v4027_v23, %v4029_v17 }
 0x835   : > { %4100 = vmatpush1.bf16.msra.mxu1 %v4052_v39 }
 0x836   : > { %4339 = vmatprep.subr.bf16.mxu1 %v7701_v42  ;;  %v4235_v21 = vpop.permute.xlu0 %4234 }
 0x837   : > { %v4239_v12 = vpop.permute.xlu1 %4238  ;;  %v4294_v26 = vsel %vm275_vm4, %v4235_v21, %v4237_v2 }
 0x838   : > { %4112 = vmatmul.mubr.bf16.vlgmr.msra.gmra.mrb[0].mxu1 %v4842_v14  ;;  %v4295_v40 = vsel %vm275_vm4, %v4237_v2, %v4239_v12 }
 0x839   : > { %4340 = vmatpush1.bf16.msra.mxu1 %v7707_v7  ;;  %4578 = vmatprep.mubr.msk.bf16.mxu1 %vm357_vm3, %v4843_v16 }
 0x83a   : > { %4341 = vmatprep.subr.bf16.mxu1 %v4295_v40  ;;  %v4245_v60 = vpop.permute.xlu0 %4244 }
 0x83b   : > { %v4243_v50 = vpop.permute.xlu1 %4242 }
 0x83c   : > { %v4297_v35 = vsel %vm275_vm4, %v4243_v50, %v4245_v60 }
 0x83d   : > { %4342 = vmatpush1.bf16.msra.mxu1 %v4294_v26 }
 0x83e   : > { %4343 = vmatprep.subr.bf16.mxu1 %v4297_v35  ;;  %v4249_v33 = vpop.permute.xlu0 %4248 }
 0x83f   : > { %v4241_v42 = vpop.permute.xlu1 %4240 }
 0x840   : > { %v4296_v10 = vsel %vm275_vm4, %v4241_v42, %v4243_v50 }
 0x841   : > { %4344 = vmatpush1.bf16.msra.mxu1 %v4296_v10 }
 0x842   : > { %v4247_v43 = vpop.permute.xlu0 %4246 }
 0x843   : > { %v4251_v48 = vpop.permute.xlu1 %4250  ;;  %v4298_v45 = vsel %vm275_vm4, %v4247_v43, %v4249_v33 }
 0x844   : > { %v4299_v7 = vsel %vm275_vm4, %v4249_v33, %v4251_v48 }
 0x845   : > { %4345 = vmatprep.subr.bf16.mxu1 %v4299_v7 }
 0x846   : > { %4346 = vmatpush1.bf16.msra.mxu1 %v4298_v45  ;;  %v4257_v57 = vpop.permute.xlu0 %4256 }
 0x847   : > { %v4255_v32 = vpop.permute.xlu1 %4254 }
 0x848   : > { %v4301_v37 = vsel %vm275_vm4, %v4255_v32, %v4257_v57 }
 0x849   : > { %4347 = vmatprep.subr.bf16.mxu1 %v4301_v37 }
 0x84b   : > { %v4253_v25 = vpop.permute.xlu1 %4252 }
 0x84c   : > { %v4300_v3 = vsel %vm275_vm4, %v4253_v25, %v4255_v32 }
 0x84d   : > { %4348 = vmatpush1.bf16.msra.mxu1 %v4300_v3 }
 0x84f   : > { %v4263_v55 = vpop.permute.xlu1 %4262  ;;  %v4261_v30 = vpop.permute.xlu0 %4260 }
 0x850   : > { %v4303_v49 = vsel %vm275_vm4, %v4261_v30, %v4263_v55 }
 0x851   : > { %4349 = vmatprep.subr.bf16.mxu1 %v4303_v49 }
 0x853   : > { %v4259_v62 = vpop.permute.xlu0 %4258 }
 0x854   : > { %v4302_v38 = vsel %vm275_vm4, %v4259_v62, %v4261_v30 }
 0x855   : > { %4350 = vmatpush1.bf16.msra.mxu1 %v4302_v38 }
 0x859   : > { %v4269_v41 = vpop.permute.xlu0 %4268 }
 0x85b   : > { %v4267_v13 = vpop.permute.xlu1 %4266 }
 0x85c   : > { %v4305_v31 = vsel %vm275_vm4, %v4267_v13, %v4269_v41 }
 0x85d   : > { %4351 = vmatprep.subr.bf16.mxu1 %v4305_v31 }
 0x85f   : > { %v4265_v34 = vpop.permute.xlu1 %4264 }
 0x860   : > { %v4304_v8 = vsel %vm275_vm4, %v4265_v34, %v4267_v13 }
 0x861   : > { %4352 = vmatpush1.bf16.msra.mxu1 %v4304_v8 }
 0x865   : > { %v4275_v58 = vpop.permute.xlu1 %4274 }
 0x867   : > { %v4273_v54 = vpop.permute.xlu0 %4272 }
 0x868   : > { %v4307_v61 = vsel %vm275_vm4, %v4273_v54, %v4275_v58 }
 0x869   : > { %4353 = vmatprep.subr.bf16.mxu1 %v4307_v61 }
 0x86b   : > { %v4271_v56 = vpop.permute.xlu0 %4270 }
 0x86c   : > { %v4306_v29 = vsel %vm275_vm4, %v4271_v56, %v4273_v54 }
 0x86d   : > { %4354 = vmatpush1.bf16.msra.mxu1 %v4306_v29 }
 0x871   : > { %v4281_v15 = vpop.permute.xlu0 %4280 }
 0x873   : > { %v4279_v47 = vpop.permute.xlu1 %4278 }
 0x874   : > { %v4309_v0 = vsel %vm275_vm4, %v4279_v47, %v4281_v15 }
 0x875   : > { %4355 = vmatprep.subr.bf16.mxu1 %v4309_v0 }
 0x877   : > { %v4277_v1 = vpop.permute.xlu1 %4276 }
 0x878   : > { %v4308_v6 = vsel %vm275_vm4, %v4277_v1, %v4279_v47 }
 0x879   : > { %4356 = vmatpush1.bf16.msra.mxu1 %v4308_v6 }
 0x87d   : > { %v4287_v63 = vpop.permute.xlu1 %4286 }
 0x87f   : > { %v4285_v4 = vpop.permute.xlu0 %4284 }
 0x880   : > { %v4311_v20 = vsel %vm275_vm4, %v4285_v4, %v4287_v63 }
 0x881   : > { %4357 = vmatprep.subr.bf16.mxu1 %v4311_v20 }
 0x883   : > { %v4283_v46 = vpop.permute.xlu0 %4282 }
 0x884   : > { %v4310_v24 = vsel %vm275_vm4, %v4283_v46, %v4285_v4 }
 0x885   : > { %4358 = vmatpush1.bf16.msra.mxu1 %v4310_v24 }
 0x889   : > { %v4293_v22 = vpop.permute.xlu0 %4292 }
 0x88b   : > { %v4291_v51 = vpop.permute.xlu1 %4290 }
 0x88c   : > { %v4313_v52 = vsel %vm275_vm4, %v4291_v51, %v4293_v22 }
 0x88d   : > { %4359 = vmatprep.subr.bf16.mxu1 %v4313_v52 }
 0x88f   : > { %v4289_v44 = vpop.permute.xlu1 %4288 }
 0x890   : > { %v4312_v28 = vsel %vm275_vm4, %v4289_v44, %v4291_v51 }
 0x891   : > { %4360 = vmatpush1.bf16.msra.mxu1 %v4312_v28 }
 0x894   : > { %4372 = vmatmul.mubr.bf16.vlgmr.msra.gmra.mrb[0].mxu1 %v4845_v36 }
 0x967   : > { %v4373_v59 = vpop.f32.mrb[0].mxu1 }
 0x968   : > { %v4589_v18 = vadd.f32 %v4373_v59, %v5268_v9  ;;  %v4375_v53 = vpop.f32.mrb[1].mxu1 }
 0x969   : > { %v4590_v5 = vadd.f32 %v4375_v53, %v5268_v9  ;;  %v4377_v19 = vpop.f32.mrb[2].mxu1 }
 0x96a   : > { %4386 = vst [vmem:[%s6932_s8 + $0x10] sm:$0xff] %v4589_v18  ;;  %v4591_v17 = vadd.f32 %v4377_v19, %v5274_v11  ;;  %v4379_v27 = vpop.f32.mrb[3].mxu1 }
 0x96b   : > { %4387 = vst [vmem:[%s6932_s8 + $0x18] sm:$0xff] %v4590_v5  ;;  %v4592_v2 = vadd.f32 %v4379_v27, %v5274_v11 }
 0x96c   : > { %4388 = vst [vmem:[%s6932_s8 + $0x30] sm:$0xff] %v4591_v17 }
 0x96d   : > { %4389 = vst [vmem:[%s6932_s8 + $0x38] sm:$0xff] %v4592_v2 }
 0x96e   : > { %4925 = shalt.err (!%p4922_p7)
}
 0x96f   : > { %s4926_s30 = scalar_lea.hbm %s7795_s16, 1024  ;;  %s4930_s22 = scalar_lea.hbm %s7846_s3, 2048 }
 0x970   : > { %p4927_p9 = scmp.ne.s32.totalorder %s7795_s16, %s4926_s30  ;;  %p4931_p5 = scmp.lt.u32.totalorder %s7795_s16, %s7846_s3 }
 0x971   : > { %p4932_p11 = scmp.lt.u32.totalorder %s4930_s22, %s4926_s30  ;;  %p4934_p4 = scmp.lt.u32.totalorder %s4926_s30, %s7795_s16 }
 0x972   : > { %p4928_p2 = pnand %p4927_p9, %p5123_p12 }
 0x973   : > { %p4933_p1 = por %p4932_p11, %p4931_p5 }
 0x974   : > { %p4929_p0 = pneg %p4928_p2 }
 0x975   : > { %p4935_p6 = por %p4934_p4, %p4933_p1 }
 0x977   : > { %p4936_p8 = pnand %p4935_p6, %p4929_p0 }
 0x979   : > { %4939 = shalt.err (!%p4936_p8)
}
 0x97a   : > { %s5010_s20 = smov 512   ;;  %s5011_s4 = smov 32  }
 0x97b   : > { %4682 = dma.vmem_to_hbm [thread:$0]  (%p5123_p12), %s7787_s9, 1024, %s7795_s16, %s4391_s11, %s5010_s20, %s5010_s20, %s5011_s4  }
 0x97c PF: > { %s4419_s26 = sand.u32 1, %s4970_s12   ;;  %p7902_p10 = scmp.ne.s32.totalorder %s7857_s19, 0 }
 0x97d   : > { %p7903_p13 = scmp.ge.s32.totalorder %s4982_s15, 2  ;;  %s4420_s5 = scalar_lea.sflag [#allocation4], %s4419_s26 }
 0x97f   : > { %p4693_p3 = pnand %p7903_p13, %p7902_p10 }
 0x981   : > { %4965 = dma.done.wait (!%p4693_p3), %s4420_s5, 1024  }
 0x982   : > { %4967 = vsyncadd (!%p4693_p3), %s4420_s5, 4294966272  ;;  %p17_p7 = scmp.ge.s32.totalorder %s5088_s24, 4   ;;  %s7904_s12 = smov %s4974_s13 }
 0x983   : > { %s7905_s13 = smov %s4978_s14  ;;  %s7906_s14 = smov %s5119_s17 }
 0x984   : > { %s7907_s15 = smov %s5088_s24  ;;  %19 = sbr.rel (!%p17_p7) target bundleno = 6 (0x6), region = 91 }
 0x98b   :  { %4425 = vsyncpa [#allocation3], 1 }
 0x98c   :  { %4427 = vsyncpa [#allocation3 + $0x1], 1 }
 0x98d   :  { %4428 = vsyncpa [#allocation6], 1 }
 0x98e   :  { %4429 = vsyncpa [#allocation4], 1 }
 0x98f   :  { %4431 = vsyncpa [#allocation4 + $0x1], 1 }

</bundles_post_ra>
